<compile_context>
chip_gen: v7x
topology: tpu7x:2x2x1
jax: 0.10.0
libtpu: 0.0.40
codegen_flags: <defaults>
</compile_context>

<pallas_src>
import math

import jax
import jax.numpy as jnp
from jax.experimental import pallas as pl
from jax.experimental.pallas import tpu as pltpu

MIDDLE = 500
HIDDENS = (100,) * 4


def _round_up(x: int, m: int) -> int:
    return (x + m - 1) // m * m


def _make_kernel(n_lin: int, mid_pad: int):
    """Kernel body. Refs: x_cat, W_cat, b_cat, (W,b)*n_lin, out."""

    def kernel(x_ref, wcat_ref, bcat_ref, *rest):
        out_ref = rest[-1]
        lin_refs = rest[:-1]                       # 2*n_lin refs

        # Fused head: one f32 matmul over the block-diagonal weight, then split
        # into the priv/pub halves (each padded to mid_pad rows, sublane-aligned).
        ab = jnp.dot(wcat_ref[...], x_ref[...],
                     preferred_element_type=jnp.float32) + bcat_ref[...]
        a = ab[:mid_pad]                           # (mid_pad, TB) f32
        b = ab[mid_pad:]                           # (mid_pad, TB) f32

        # ReLU(joined), fused with downcast -> bf16 activations between layers.
        h = jnp.maximum(a * b, 0.0).astype(jnp.bfloat16)

        # Hidden Linear + ReLU stack (bf16 operands, f32 accumulate/bias).
        for k in range(n_lin - 1):
            w = lin_refs[2 * k][...]               # (out, in)  bf16
            bias = lin_refs[2 * k + 1][...]        # (out, 1)   f32
            h = jnp.maximum(
                jnp.dot(w, h, preferred_element_type=jnp.float32) + bias,
                0.0).astype(jnp.bfloat16)

        # Final Linear(h_last -> 1) + Tanh; output stays lane-dense (1, TB).
        wl = lin_refs[-2][...]                     # (1, h_last) bf16
        bl = lin_refs[-1][...]                     # (1, 1)      f32
        y = jnp.dot(wl, h, preferred_element_type=jnp.float32) + bl
        out_ref[...] = jnp.tanh(y)

    return kernel


def net_comp_bilin_forward(priv, pub, params, *, block_b: int = 2048):
    """NetCompBilin forward with a batch-blocked Pallas kernel (call under jit)."""
    B, d_pri = priv.shape
    d_pub = pub.shape[1]
    d_cat = d_pri + d_pub
    middle = params["wp"].shape[0]
    mid_pad = _round_up(middle, 8)                 # 500 -> 512 (sublane-aligned split)

    # Lane-dense batch blocks: multiple of 256 (MXU N-dim on v6e/v7x), large to
    # amortize per-step overhead, but at least 2 grid steps when the batch is
    # big enough so both v7x TensorCores get work.
    bp_min = _round_up(B, 256)
    block_b = max(256, min(_round_up(block_b, 256), bp_min))
    if bp_min > 256:
        block_b = min(block_b, _round_up(pl.cdiv(bp_min, 2), 256))
    Bp = _round_up(B, block_b)

    # Single concat -> pad -> transpose chain (one fused HBM pass under jit).
    x = jnp.concatenate([priv, pub], axis=1)       # (B, d_cat)
    if Bp != B:
        x = jnp.pad(x, ((0, Bp - B), (0, 0)))
    x_t = x.T.astype(jnp.float32)                  # (d_cat, Bp), head stays f32

    # Block-diagonal head weight/bias; each half padded 500 -> mid_pad rows.
    w_cat = jnp.zeros((2 * mid_pad, d_cat), jnp.float32)
    w_cat = w_cat.at[:middle, :d_pri].set(params["wp"])
    w_cat = w_cat.at[mid_pad:mid_pad + middle, d_pri:].set(params["wq"])
    b_cat = jnp.zeros((2 * mid_pad, 1), jnp.float32)
    b_cat = b_cat.at[:middle, 0].set(params["bp"])
    b_cat = b_cat.at[mid_pad:mid_pad + middle, 0].set(params["bq"])

    n_lin = len(params["seq_w"])
    kernel_args = [x_t, w_cat, b_cat]
    for idx, (w, b) in enumerate(zip(params["seq_w"], params["seq_b"])):
        if idx == 0:
            # Pad the 500-wide input dim of the first hidden layer to mid_pad;
            # the padded activation rows are exactly zero so results match.
            w = jnp.pad(w, ((0, 0), (0, mid_pad - middle)))
        kernel_args += [w.astype(jnp.bfloat16),
                        b.reshape(-1, 1).astype(jnp.float32)]

    grid = (Bp // block_b,)
    in_specs = [pl.BlockSpec((d_cat, block_b), lambda i: (0, i))]
    # Weights/biases: full-array blocks, constant index -> VMEM resident.
    in_specs += [pl.BlockSpec(a.shape, lambda i: (0, 0)) for a in kernel_args[1:]]

    flops = 2 * Bp * (2 * mid_pad * d_cat
                      + sum(w.shape[0] * w.shape[1] for w in params["seq_w"]))
    bytes_accessed = sum(int(a.size) * a.dtype.itemsize for a in kernel_args) + Bp * 4

    out = pl.pallas_call(
        _make_kernel(n_lin, mid_pad),
        out_shape=jax.ShapeDtypeStruct((1, Bp), jnp.float32),
        grid=grid,
        in_specs=in_specs,
        out_specs=pl.BlockSpec((1, block_b), lambda i: (0, i)),
        compiler_params=pltpu.CompilerParams(
            dimension_semantics=("parallel",),
            vmem_limit_bytes=32 * 1024 * 1024),
        cost_estimate=pl.CostEstimate(
            flops=flops, transcendentals=Bp, bytes_accessed=bytes_accessed),
    )(*kernel_args)

    # Back to PyTorch layout (B, 1); drop batch padding.
    return out[:, :B].T


def net_comp_bilin_reference(priv, pub, params):
    """Pure-JAX f32 reference for correctness checking."""
    a = priv @ params["wp"].T + params["bp"]
    b = pub @ params["wq"].T + params["bq"]
    h = jnp.maximum(a * b, 0.0)
    n_lin = len(params["seq_w"])
    for k in range(n_lin - 1):
        h = jnp.maximum(h @ params["seq_w"][k].T + params["seq_b"][k], 0.0)
    y = h @ params["seq_w"][-1].T + params["seq_b"][-1]
    return jnp.tanh(y)


def init_params(key, d_pri, d_pub, middle=MIDDLE, hiddens=HIDDENS):
    """Deterministic PyTorch-style uniform init (weights stored (out, in))."""
    seq_sizes = [(hiddens[0], middle)]
    seq_sizes += [(s1, s0) for s0, s1 in zip(hiddens, hiddens[1:])]
    seq_sizes += [(1, hiddens[-1])]

    keys = jax.random.split(key, 2 * (2 + len(seq_sizes)))
    kit = iter(keys)

    def linear(out_f, in_f):
        bound = 1.0 / math.sqrt(in_f)
        w = jax.random.uniform(next(kit), (out_f, in_f), jnp.float32, -bound, bound)
        b = jax.random.uniform(next(kit), (out_f,), jnp.float32, -bound, bound)
        return w, b

    wp, bp = linear(middle, d_pri)
    wq, bq = linear(middle, d_pub)
    seq_w, seq_b = [], []
    for out_f, in_f in seq_sizes:
        w, b = linear(out_f, in_f)
        seq_w.append(w)
        seq_b.append(b)
    return {"wp": wp, "bp": bp, "wq": wq, "bq": bq,
            "seq_w": seq_w, "seq_b": seq_b}


if __name__ == "__main__":
    B, d_pri, d_pub = 512, 16, 24

    key = jax.random.PRNGKey(0)
    k_priv, k_pub, k_params = jax.random.split(key, 3)
    priv = jax.random.normal(k_priv, (B, d_pri), jnp.float32)
    pub = jax.random.normal(k_pub, (B, d_pub), jnp.float32)
    params = init_params(k_params, d_pri, d_pub)

    # jit so the wrapper-side concat/pad/transpose/cast fuse into one HBM pass.
    fwd = jax.jit(net_comp_bilin_forward)
    out = jax.block_until_ready(fwd(priv, pub, params))   # B=512 -> grid of 2 blocks

    ref = jax.block_until_ready(net_comp_bilin_reference(priv, pub, params))
    assert out.shape == (B, 1) and out.dtype == jnp.float32
    # bf16 hidden-layer operands (f32 accumulate, f32 head) vs f32 reference.
    max_err = float(jnp.max(jnp.abs(out - ref)))
    assert jnp.allclose(out, ref, atol=2e-2, rtol=2e-2), max_err

    print("KERNEL_OK")
</pallas_src>

<mosaic_0001>
module attributes {stable_mosaic.version = 11 : i64} {
  func.func @kernel(%arg0: i32, %arg1: memref<40x256xf32, #tpu.memory_space<vmem>>, %arg2: memref<1008x40xf32, #tpu.memory_space<vmem>>, %arg3: memref<1008x1xf32, #tpu.memory_space<vmem>>, %arg4: memref<100x504xbf16, #tpu.memory_space<vmem>>, %arg5: memref<100x1xf32, #tpu.memory_space<vmem>>, %arg6: memref<100x100xbf16, #tpu.memory_space<vmem>>, %arg7: memref<100x1xf32, #tpu.memory_space<vmem>>, %arg8: memref<100x100xbf16, #tpu.memory_space<vmem>>, %arg9: memref<100x1xf32, #tpu.memory_space<vmem>>, %arg10: memref<100x100xbf16, #tpu.memory_space<vmem>>, %arg11: memref<100x1xf32, #tpu.memory_space<vmem>>, %arg12: memref<1x100xbf16, #tpu.memory_space<vmem>>, %arg13: memref<1x1xf32, #tpu.memory_space<vmem>>, %arg14: memref<1x256xf32, #tpu.memory_space<vmem>>) attributes {dimension_semantics = [#tpu.dimension_semantics<parallel>], iteration_bounds = array<i64: 2>, scalar_prefetch = 0 : i64, scratch_operands = 0 : i64, tpu.core_type = #tpu.core_type<tc>, window_params = [{transform_indices = @transform_0, window_bounds = array<i64: 40, 256>}, {pipeline_mode = #tpu.pipeline_mode<synchronous>, transform_indices = @transform_1, window_bounds = array<i64: 1008, 40>}, {pipeline_mode = #tpu.pipeline_mode<synchronous>, transform_indices = @transform_2, window_bounds = array<i64: 1008, 1>}, {pipeline_mode = #tpu.pipeline_mode<synchronous>, transform_indices = @transform_3, window_bounds = array<i64: 100, 504>}, {pipeline_mode = #tpu.pipeline_mode<synchronous>, transform_indices = @transform_4, window_bounds = array<i64: 100, 1>}, {pipeline_mode = #tpu.pipeline_mode<synchronous>, transform_indices = @transform_5, window_bounds = array<i64: 100, 100>}, {pipeline_mode = #tpu.pipeline_mode<synchronous>, transform_indices = @transform_6, window_bounds = array<i64: 100, 1>}, {pipeline_mode = #tpu.pipeline_mode<synchronous>, transform_indices = @transform_7, window_bounds = array<i64: 100, 100>}, {pipeline_mode = #tpu.pipeline_mode<synchronous>, transform_indices = @transform_8, window_bounds = array<i64: 100, 1>}, {pipeline_mode = #tpu.pipeline_mode<synchronous>, transform_indices = @transform_9, window_bounds = array<i64: 100, 100>}, {pipeline_mode = #tpu.pipeline_mode<synchronous>, transform_indices = @transform_10, window_bounds = array<i64: 100, 1>}, {pipeline_mode = #tpu.pipeline_mode<synchronous>, transform_indices = @transform_11, window_bounds = array<i64: 1, 100>}, {pipeline_mode = #tpu.pipeline_mode<synchronous>, transform_indices = @transform_12, window_bounds = array<i64: 1, 1>}, {transform_indices = @transform_13, window_bounds = array<i64: 1, 256>}]} {
    %c0 = arith.constant 0 : index
    %c0_0 = arith.constant 0 : index
    %0 = vector.load %arg2[%c0, %c0_0] : memref<1008x40xf32, #tpu.memory_space<vmem>>, vector<1008x40xf32>
    %c0_1 = arith.constant 0 : index
    %c0_2 = arith.constant 0 : index
    %1 = vector.load %arg1[%c0_1, %c0_2] : memref<40x256xf32, #tpu.memory_space<vmem>>, vector<40x256xf32>
    %cst = arith.constant dense<0.000000e+00> : vector<1008x256xf32>
    %2 = tpu.matmul %0, %1, %cst {dimension_numbers = #tpu.dot_dimension_numbers<[1], [0], [0], [1], [0, 0, 1, 1], [], []>} : vector<1008x40xf32>, vector<40x256xf32>, vector<1008x256xf32> -> vector<1008x256xf32>
    %c0_3 = arith.constant 0 : index
    %c0_4 = arith.constant 0 : index
    %3 = vector.load %arg3[%c0_3, %c0_4] : memref<1008x1xf32, #tpu.memory_space<vmem>>, vector<1008x1xf32>
    %4 = vector.broadcast %3 : vector<1008x1xf32> to vector<1008x256xf32>
    %5 = arith.addf %2, %4 : vector<1008x256xf32>
    %6 = vector.extract_strided_slice %5 {offsets = [0, 0], sizes = [504, 256], strides = [1, 1]} : vector<1008x256xf32> to vector<504x256xf32>
    %7 = vector.extract_strided_slice %5 {offsets = [504, 0], sizes = [504, 256], strides = [1, 1]} : vector<1008x256xf32> to vector<504x256xf32>
    %8 = arith.mulf %6, %7 : vector<504x256xf32>
    %cst_5 = arith.constant 0.000000e+00 : f32
    %9 = vector.broadcast %cst_5 : f32 to vector<504x256xf32>
    %10 = arith.maximumf %8, %9 : vector<504x256xf32>
    %11 = arith.truncf %10 : vector<504x256xf32> to vector<504x256xbf16>
    %c0_6 = arith.constant 0 : index
    %c0_7 = arith.constant 0 : index
    %12 = vector.load %arg4[%c0_6, %c0_7] : memref<100x504xbf16, #tpu.memory_space<vmem>>, vector<100x504xbf16>
    %c0_8 = arith.constant 0 : index
    %c0_9 = arith.constant 0 : index
    %13 = vector.load %arg5[%c0_8, %c0_9] : memref<100x1xf32, #tpu.memory_space<vmem>>, vector<100x1xf32>
    %cst_10 = arith.constant dense<0.000000e+00> : vector<100x256xf32>
    %14 = tpu.matmul %12, %11, %cst_10 {dimension_numbers = #tpu.dot_dimension_numbers<[1], [0], [0], [1], [0, 0, 1, 1], [], []>} : vector<100x504xbf16>, vector<504x256xbf16>, vector<100x256xf32> -> vector<100x256xf32>
    %15 = vector.broadcast %13 : vector<100x1xf32> to vector<100x256xf32>
    %16 = arith.addf %14, %15 : vector<100x256xf32>
    %cst_11 = arith.constant 0.000000e+00 : f32
    %17 = vector.broadcast %cst_11 : f32 to vector<100x256xf32>
    %18 = arith.maximumf %16, %17 : vector<100x256xf32>
    %19 = arith.truncf %18 : vector<100x256xf32> to vector<100x256xbf16>
    %c0_12 = arith.constant 0 : index
    %c0_13 = arith.constant 0 : index
    %20 = vector.load %arg6[%c0_12, %c0_13] : memref<100x100xbf16, #tpu.memory_space<vmem>>, vector<100x100xbf16>
    %c0_14 = arith.constant 0 : index
    %c0_15 = arith.constant 0 : index
    %21 = vector.load %arg7[%c0_14, %c0_15] : memref<100x1xf32, #tpu.memory_space<vmem>>, vector<100x1xf32>
    %cst_16 = arith.constant dense<0.000000e+00> : vector<100x256xf32>
    %22 = tpu.matmul %20, %19, %cst_16 {dimension_numbers = #tpu.dot_dimension_numbers<[1], [0], [0], [1], [0, 0, 1, 1], [], []>} : vector<100x100xbf16>, vector<100x256xbf16>, vector<100x256xf32> -> vector<100x256xf32>
    %23 = vector.broadcast %21 : vector<100x1xf32> to vector<100x256xf32>
    %24 = arith.addf %22, %23 : vector<100x256xf32>
    %cst_17 = arith.constant 0.000000e+00 : f32
    %25 = vector.broadcast %cst_17 : f32 to vector<100x256xf32>
    %26 = arith.maximumf %24, %25 : vector<100x256xf32>
    %27 = arith.truncf %26 : vector<100x256xf32> to vector<100x256xbf16>
    %c0_18 = arith.constant 0 : index
    %c0_19 = arith.constant 0 : index
    %28 = vector.load %arg8[%c0_18, %c0_19] : memref<100x100xbf16, #tpu.memory_space<vmem>>, vector<100x100xbf16>
    %c0_20 = arith.constant 0 : index
    %c0_21 = arith.constant 0 : index
    %29 = vector.load %arg9[%c0_20, %c0_21] : memref<100x1xf32, #tpu.memory_space<vmem>>, vector<100x1xf32>
    %cst_22 = arith.constant dense<0.000000e+00> : vector<100x256xf32>
    %30 = tpu.matmul %28, %27, %cst_22 {dimension_numbers = #tpu.dot_dimension_numbers<[1], [0], [0], [1], [0, 0, 1, 1], [], []>} : vector<100x100xbf16>, vector<100x256xbf16>, vector<100x256xf32> -> vector<100x256xf32>
    %31 = vector.broadcast %29 : vector<100x1xf32> to vector<100x256xf32>
    %32 = arith.addf %30, %31 : vector<100x256xf32>
    %cst_23 = arith.constant 0.000000e+00 : f32
    %33 = vector.broadcast %cst_23 : f32 to vector<100x256xf32>
    %34 = arith.maximumf %32, %33 : vector<100x256xf32>
    %35 = arith.truncf %34 : vector<100x256xf32> to vector<100x256xbf16>
    %c0_24 = arith.constant 0 : index
    %c0_25 = arith.constant 0 : index
    %36 = vector.load %arg10[%c0_24, %c0_25] : memref<100x100xbf16, #tpu.memory_space<vmem>>, vector<100x100xbf16>
    %c0_26 = arith.constant 0 : index
    %c0_27 = arith.constant 0 : index
    %37 = vector.load %arg11[%c0_26, %c0_27] : memref<100x1xf32, #tpu.memory_space<vmem>>, vector<100x1xf32>
    %cst_28 = arith.constant dense<0.000000e+00> : vector<100x256xf32>
    %38 = tpu.matmul %36, %35, %cst_28 {dimension_numbers = #tpu.dot_dimension_numbers<[1], [0], [0], [1], [0, 0, 1, 1], [], []>} : vector<100x100xbf16>, vector<100x256xbf16>, vector<100x256xf32> -> vector<100x256xf32>
    %39 = vector.broadcast %37 : vector<100x1xf32> to vector<100x256xf32>
    %40 = arith.addf %38, %39 : vector<100x256xf32>
    %cst_29 = arith.constant 0.000000e+00 : f32
    %41 = vector.broadcast %cst_29 : f32 to vector<100x256xf32>
    %42 = arith.maximumf %40, %41 : vector<100x256xf32>
    %43 = arith.truncf %42 : vector<100x256xf32> to vector<100x256xbf16>
    %c0_30 = arith.constant 0 : index
    %c0_31 = arith.constant 0 : index
    %44 = vector.load %arg12[%c0_30, %c0_31] : memref<1x100xbf16, #tpu.memory_space<vmem>>, vector<1x100xbf16>
    %c0_32 = arith.constant 0 : index
    %c0_33 = arith.constant 0 : index
    %45 = vector.load %arg13[%c0_32, %c0_33] : memref<1x1xf32, #tpu.memory_space<vmem>>, vector<1x1xf32>
    %cst_34 = arith.constant dense<0.000000e+00> : vector<1x256xf32>
    %46 = tpu.matmul %44, %43, %cst_34 {dimension_numbers = #tpu.dot_dimension_numbers<[1], [0], [0], [1], [0, 0, 1, 1], [], []>} : vector<1x100xbf16>, vector<100x256xbf16>, vector<1x256xf32> -> vector<1x256xf32>
    %47 = vector.broadcast %45 : vector<1x1xf32> to vector<1x256xf32>
    %48 = arith.addf %46, %47 : vector<1x256xf32>
    %49 = math.tanh %48 : vector<1x256xf32>
    %c0_35 = arith.constant 0 : index
    %c0_36 = arith.constant 0 : index
    %50 = vector.load %arg14[%c0_35, %c0_36] : memref<1x256xf32, #tpu.memory_space<vmem>>, vector<1x256xf32>
    tpu.vector_store %arg14[%c0_35, %c0_36], %49 {strides = array<i32>} : memref<1x256xf32, #tpu.memory_space<vmem>>, vector<1x256xf32>,
    return
  }
  func.func @transform_0(%arg0: i32) -> (i32, i32) {
    %c0_i32 = arith.constant 0 : i32
    %c0_i32_0 = arith.constant 0 : i32
    return %c0_i32, %arg0 : i32, i32
  }
  func.func @transform_1(%arg0: i32) -> (i32, i32) {
    %c0_i32 = arith.constant 0 : i32
    %c0_i32_0 = arith.constant 0 : i32
    %c0_i32_1 = arith.constant 0 : i32
    return %c0_i32, %c0_i32_0 : i32, i32
  }
  func.func @transform_2(%arg0: i32) -> (i32, i32) {
    %c0_i32 = arith.constant 0 : i32
    %c0_i32_0 = arith.constant 0 : i32
    %c0_i32_1 = arith.constant 0 : i32
    return %c0_i32, %c0_i32_0 : i32, i32
  }
  func.func @transform_3(%arg0: i32) -> (i32, i32) {
    %c0_i32 = arith.constant 0 : i32
    %c0_i32_0 = arith.constant 0 : i32
    %c0_i32_1 = arith.constant 0 : i32
    return %c0_i32, %c0_i32_0 : i32, i32
  }
  func.func @transform_4(%arg0: i32) -> (i32, i32) {
    %c0_i32 = arith.constant 0 : i32
    %c0_i32_0 = arith.constant 0 : i32
    %c0_i32_1 = arith.constant 0 : i32
    return %c0_i32, %c0_i32_0 : i32, i32
  }
  func.func @transform_5(%arg0: i32) -> (i32, i32) {
    %c0_i32 = arith.constant 0 : i32
    %c0_i32_0 = arith.constant 0 : i32
    %c0_i32_1 = arith.constant 0 : i32
    return %c0_i32, %c0_i32_0 : i32, i32
  }
  func.func @transform_6(%arg0: i32) -> (i32, i32) {
    %c0_i32 = arith.constant 0 : i32
    %c0_i32_0 = arith.constant 0 : i32
    %c0_i32_1 = arith.constant 0 : i32
    return %c0_i32, %c0_i32_0 : i32, i32
  }
  func.func @transform_7(%arg0: i32) -> (i32, i32) {
    %c0_i32 = arith.constant 0 : i32
    %c0_i32_0 = arith.constant 0 : i32
    %c0_i32_1 = arith.constant 0 : i32
    return %c0_i32, %c0_i32_0 : i32, i32
  }
  func.func @transform_8(%arg0: i32) -> (i32, i32) {
    %c0_i32 = arith.constant 0 : i32
    %c0_i32_0 = arith.constant 0 : i32
    %c0_i32_1 = arith.constant 0 : i32
    return %c0_i32, %c0_i32_0 : i32, i32
  }
  func.func @transform_9(%arg0: i32) -> (i32, i32) {
    %c0_i32 = arith.constant 0 : i32
    %c0_i32_0 = arith.constant 0 : i32
    %c0_i32_1 = arith.constant 0 : i32
    return %c0_i32, %c0_i32_0 : i32, i32
  }
  func.func @transform_10(%arg0: i32) -> (i32, i32) {
    %c0_i32 = arith.constant 0 : i32
    %c0_i32_0 = arith.constant 0 : i32
    %c0_i32_1 = arith.constant 0 : i32
    return %c0_i32, %c0_i32_0 : i32, i32
  }
  func.func @transform_11(%arg0: i32) -> (i32, i32) {
    %c0_i32 = arith.constant 0 : i32
    %c0_i32_0 = arith.constant 0 : i32
    %c0_i32_1 = arith.constant 0 : i32
    return %c0_i32, %c0_i32_0 : i32, i32
  }
  func.func @transform_12(%arg0: i32) -> (i32, i32) {
    %c0_i32 = arith.constant 0 : i32
    %c0_i32_0 = arith.constant 0 : i32
    %c0_i32_1 = arith.constant 0 : i32
    return %c0_i32, %c0_i32_0 : i32, i32
  }
  func.func @transform_13(%arg0: i32) -> (i32, i32) {
    %c0_i32 = arith.constant 0 : i32
    %c0_i32_0 = arith.constant 0 : i32
    return %c0_i32, %arg0 : i32, i32
  }
}

</mosaic_0001>

<bundles_post_ra>
// kernel: net_comp_bilin_forward.1
= control target key start
LH: loop header
LB: loop body
LE: loop exit
PB: predicated region body
PF: predicated region fallthrough
CT: control target
= control target key end

     0   :  { %s7372_s0 = inlined_call_operand.vmem [shape: f32[40,512], index: 0, kind: input, shape index: {}]   ;;  %s7373_s1 = inlined_call_operand.vmem [shape: f32[1008,40], index: 1, kind: input, shape index: {}]   ;;  %s7374_s2 = inlined_call_operand.vmem [shape: f32[1008,1], index: 2, kind: input, shape index: {}]   ;;  %s7375_s3 = inlined_call_operand.vmem [shape: bf16[100,504], index: 3, kind: input, shape index: {}]   ;;  %s7376_s4 = inlined_call_operand.vmem [shape: f32[100,1], index: 4, kind: input, shape index: {}]   ;;  %s7377_s5 = inlined_call_operand.vmem [shape: bf16[100,100], index: 5, kind: input, shape index: {}]   ;;  %s7378_s6 = inlined_call_operand.vmem [shape: f32[100,1], index: 6, kind: input, shape index: {}]   ;;  %s7379_s7 = inlined_call_operand.vmem [shape: bf16[100,100], index: 7, kind: input, shape index: {}]   ;;  %s7380_s8 = inlined_call_operand.vmem [shape: f32[100,1], index: 8, kind: input, shape index: {}]   ;;  %s7381_s9 = inlined_call_operand.vmem [shape: bf16[100,100], index: 9, kind: input, shape index: {}]   ;;  %s7382_s10 = inlined_call_operand.vmem [shape: f32[100,1], index: 10, kind: input, shape index: {}]   ;;  %s7383_s11 = inlined_call_operand.vmem [shape: bf16[1,100], index: 11, kind: input, shape index: {}]   ;;  %s7384_s12 = inlined_call_operand.<no memory space> [shape: f32[1,1], index: 12, kind: input, shape index: {}]   ;;  %s7385_s13 = inlined_call_operand.hbm [shape: f32[1,512], index: 13, kind: output, shape index: {}]  }
   0x1   :  { %7465 = sst [smem:[#allocation175_spill]] %s7372_s0  ;;  %v18_v0 = vstv %s7384_s12 }
   0x2   :  { %7466 = sst [smem:[#allocation176_spill]] %s7373_s1  ;;  %19 = vst [vmem:[#allocation2] sm:$0x1] %v18_v0 }
   0x3   :  { %20 = vsyncpa [#allocation5], 0 }
   0x4   :  { %22 = vsyncpa [#allocation5 + $0x1], 0  ;;  %s4979_s27 = smov 0   ;;  %s4981_s28 = smov 0  }
   0x5   :  { %s4983_s29 = smov 0   ;;  %s4985_s30 = smov 0  }
   0x6 LB: > { %s7386_s12 = sadd.s32 4294967295, %s4900_s30   ;;  %s4436_s14 = sadd.s32 4294967294, %s4900_s30   ;;  %s4900_s30 = sphi %s4985_s30, %s7813_s30   ;;  %s4896_s29 = sphi %s4983_s29, %s7812_s29   ;;  %s4892_s28 = sphi %s4981_s28, %s7811_s28   ;;  %s4888_s27 = sphi %s4979_s27, %s7810_s27  }
   0x7   : > { %s5002_s15 = sadd.s32 1, %s4900_s30   ;;  %s35_s16 = sadd.s32 1, %s4896_s29 }
   0x8   : > { %s32_s17 = ssub.s32 %s4900_s30, %s5002_s15  ;;  %p42_p0 = scmp.ne.s32.totalorder %s4896_s29, %s4892_s28 }
   0x9   : > { %p33_p1 = scmp.eq.s32.totalorder %s32_s17, 0  ;;  %p43_p2 = scmp.eq.s32.totalorder %s4900_s30, 0 }
   0xa   : > { %p324_p3 = scmp.eq.s32.totalorder %s7386_s12, 1  ;;  %p329_p4 = scmp.ne.s32.totalorder %s4892_s28, %s4888_s27 }
   0xb   : > { %s5015_s18 = scalar_select %p33_p1, %s4896_s29, %s35_s16  }
   0xc   : > { %p44_p5 = por %p43_p2, %p42_p0  ;;  %p5017_p6 = por %p324_p3, %p42_p0 }
   0xd   : > { %p330_p7 = scmp.eq.s32.totalorder %s4436_s14, 1  ;;  %p4438_p9 = scmp.ge.s32.totalorder %s4900_s30, 2 }
   0xf   : > { %p5021_p8 = por %p330_p7, %p329_p4  ;;  %382 = sbr.rel (%p4438_p9) target bundleno = 37 (0x25), region = 64 }
  0x16   : > { %385 = sbr.rel (!%p44_p5) target bundleno = 37 (0x25), region = 68  ;;  %s387_s21 = sand.u32 (%p44_p5), 1, %s4896_s29  }
  0x17   : > { %s4657_s22 = sshll.u32 (%p44_p5), %s4900_s30, 4  ;;  %s4727_s23 = smul.u32 (%p44_p5), 80, %s387_s21 }
  0x18   : > { %s7469_s0 = sld [smem:[#allocation175_spill]] (%p44_p5) }
  0x19   : > { %s389_s14 = scalar_lea.vmem (%p44_p5), [#allocation3], %s4727_s23 }
  0x1e   : > { %s392_s26 = scalar_lea.vmem %s7469_s0, %s4657_s22 }
  0x1f   : > { %v405_v1 = vld [vmem:[%s392_s26] sm:$0xff]  ;;  %v407_v2 = vld [vmem:[%s392_s26 + $0x8] sm:$0xff] }
  0x20   : > { %v409_v3 = vld [vmem:[%s392_s26 + $0x20] sm:$0xff]  ;;  %v411_v4 = vld [vmem:[%s392_s26 + $0x28] sm:$0xff]  ;;  %406 = vst [vmem:[%s389_s14] sm:$0xff] %v405_v1  ;;  %408 = vst [vmem:[%s389_s14 + $0x8] sm:$0xff] %v407_v2 }
  0x21   : > { %v413_v5 = vld [vmem:[%s392_s26 + $0x40] sm:$0xff]  ;;  %v415_v6 = vld [vmem:[%s392_s26 + $0x48] sm:$0xff]  ;;  %410 = vst [vmem:[%s389_s14 + $0x10] sm:$0xff] %v409_v3  ;;  %412 = vst [vmem:[%s389_s14 + $0x18] sm:$0xff] %v411_v4 }
  0x22   : > { %414 = vst [vmem:[%s389_s14 + $0x20] sm:$0xff] %v413_v5  ;;  %416 = vst [vmem:[%s389_s14 + $0x28] sm:$0xff] %v415_v6  ;;  %v417_v7 = vld [vmem:[%s392_s26 + $0x60] sm:$0xff]  ;;  %v419_v8 = vld [vmem:[%s392_s26 + $0x68] sm:$0xff] }
  0x23   : > { %v421_v9 = vld [vmem:[%s392_s26 + $0x80] sm:$0xff]  ;;  %418 = vst [vmem:[%s389_s14 + $0x30] sm:$0xff] %v417_v7  ;;  %420 = vst [vmem:[%s389_s14 + $0x38] sm:$0xff] %v419_v8  ;;  %v423_v10 = vld [vmem:[%s392_s26 + $0x88] sm:$0xff] }
  0x24   : > { %422 = vst [vmem:[%s389_s14 + $0x40] sm:$0xff] %v421_v9  ;;  %424 = vst [vmem:[%s389_s14 + $0x48] sm:$0xff] %v423_v10 }
  0x25 PF: > { %p4441_p10 = scmp.ge.s32.totalorder %s4900_s30, 1  ;;  %p429_p11 = scmp.lt.s32.totalorder %s4900_s30, 3 }
  0x27   : > { %p430_p12 = pnand %p4441_p10, %p429_p11 }
  0x29   : > { %433 = sbr.rel (%p430_p12) target bundleno = 2068 (0x814), region = 91 }
  0x30   : > { %v681_v11 = vld [vmem:[%s7374_s2 + $0x1f8] sm:$0xff]  ;;  %v618_v12 = vld [vmem:[%s7374_s2] sm:$0xff]  ;;  %s5042_s23 = sand.u32 1, %s4892_s28   ;;  %v7387_v13 = vmov 0   ;;  %v619_v15 = vld [vmem:[%s7374_s2 + $0x8] sm:$0xff]  ;;  %v7389_v16 = vmov 0.0  }
  0x31   : > { %4772 = vset.pattern.permute.xlu1 %v7387_v13  ;;  %4771 = vset.pattern.permute.xlu0 %v7387_v13  ;;  %s4728_s24 = smul.u32 80, %s5042_s23  ;;  %v682_v14 = vld [vmem:[%s7374_s2 + $0x200] sm:$0xff]  ;;  %v621_v28 = vld [vmem:[%s7374_s2 + $0x18] sm:$0xff]  ;;  %v620_v29 = vld [vmem:[%s7374_s2 + $0x10] sm:$0xff]  ;;  %s7470_s1 = sld [smem:[#allocation176_spill]]  ;;  %vm1374_vm0 = vcmask 326656  }
  0x32   : > { %1061 = vperm.xlu1 %4772, %v681_v11   ;;  %746 = vperm.xlu0 %4771, %v618_v12   ;;  %v684_v32 = vld [vmem:[%s7374_s2 + $0x210] sm:$0xff]  ;;  %v683_v33 = vld [vmem:[%s7374_s2 + $0x208] sm:$0xff]  ;;  %v622_v37 = vld [vmem:[%s7374_s2 + $0x20] sm:$0xff]  ;;  %vm3121_vm1 = vcmask 982016   ;;  %vm3143_vm2 = vcmask 1043456   ;;  %vm3538_vm3 = vcmask 1041408  }
  0x33   : > { %1817 = vmatprep.mubr.f32.mxu0 %v7389_v16  ;;  %2417 = vmatprep.mubr.f32.mxu1 %v7389_v16  ;;  %s5055_s17 = scalar_lea.vmem [#allocation3], %s4728_s24  ;;  %v623_v36 = vld [vmem:[%s7374_s2 + $0x28] sm:$0xff]  ;;  %v686_v39 = vld [vmem:[%s7374_s2 + $0x220] sm:$0xff]  ;;  %v685_v40 = vld [vmem:[%s7374_s2 + $0x218] sm:$0xff]  ;;  %vm3516_vm4 = vcmask 818176   ;;  %s4442_s14 = sshll.u32 %s5042_s23, 1 }
  0x34   : > { %v609_v17 = vld [vmem:[%s5055_s17 + $0x8] sm:$0xff]  ;;  %v611_v18 = vld [vmem:[%s5055_s17 + $0x18] sm:$0xff]  ;;  %v608_v19 = vld [vmem:[%s5055_s17] sm:$0xff]  ;;  %s478_s16 = scalar_lea.vmem [#allocation4], %s4442_s14  ;;  %s4357_s25 = scalar_lea.sflag [#allocation5], %s5042_s23 }
  0x35   : > { %v4659_v20 = vpack.c.bf16 %v611_v18, %v609_v17  ;;  %v610_v21 = vld [vmem:[%s5055_s17 + $0x10] sm:$0xff]  ;;  %v613_v22 = vld [vmem:[%s5055_s17 + $0x28] sm:$0xff]  ;;  %v615_v23 = vld [vmem:[%s5055_s17 + $0x38] sm:$0xff]  ;;  %s4371_s21 = sshll.u32 %s478_s16, 4  ;;  %s4905_s14 = smov [#allocation4]   ;;  %s7330_s21 = int_to_ptr.vmem [resolvable:$true] %s4371_s21 }
  0x36   : > { %1066 = vperm.xlu1 %4772, %v682_v14   ;;  %751 = vperm.xlu0 %4771, %v619_v15   ;;  %v4661_v24 = vpack.c.bf16 %v610_v21, %v608_v19  ;;  %v4663_v25 = vpack.c.bf16 %v615_v23, %v613_v22  ;;  %v612_v26 = vld [vmem:[%s5055_s17 + $0x20] sm:$0xff]  ;;  %v614_v27 = vld [vmem:[%s5055_s17 + $0x30] sm:$0xff]  ;;  %v617_v31 = vld [vmem:[%s5055_s17 + $0x48] sm:$0xff]  ;;  %s4838_s26 = scalar_lea.vmem %s7330_s21, 32 }
  0x37   : > { %4660 = vmatprep.subr.bf16.mxu0 %v4659_v20  ;;  %4667 = vmatprep.subr.bf16.mxu1 %v4659_v20  ;;  %v4665_v30 = vpack.c.bf16 %v614_v27, %v612_v26  ;;  %v616_v34 = vld [vmem:[%s5055_s17 + $0x40] sm:$0xff]  ;;  %s7809_s17 = sadd.s32 4294967295, %s4900_s30   ;;  %p4839_p13 = scmp.ne.s32.totalorder %s7330_s21, %s4838_s26 }
  0x38   : > { %4662 = vmatpush1.bf16.msra.mxu0 %v4661_v24  ;;  %4670 = vmatpush1.bf16.msra.mxu1 %v4661_v24  ;;  %v482_v35 = vld [vmem:[%s7470_s1] sm:$0xff]  ;;  %v483_v38 = vld [vmem:[%s7470_s1 + $0x8] sm:$0xff]  ;;  %v484_v41 = vld [vmem:[%s7470_s1 + $0x10] sm:$0xff]  ;;  %s4658_s0 = sshll.u32 %s7809_s17, 5  ;;  %s4842_s17 = sshll.u32 %s4905_s14, 4  ;;  %s4843_s17 = int_to_ptr.vmem [resolvable:$false] %s4842_s17 }
  0x39   : > { %4664 = vmatprep.subr.bf16.mxu0 %v4663_v25  ;;  %4668 = vmatprep.subr.bf16.mxu1 %v4663_v25  ;;  %v625_v42 = vld [vmem:[%s7374_s2 + $0x38] sm:$0xff]  ;;  %v624_v43 = vld [vmem:[%s7374_s2 + $0x30] sm:$0xff]  ;;  %v687_v46 = vld [vmem:[%s7374_s2 + $0x228] sm:$0xff]  ;;  %s7328_s24 = scalar_lea.hbm %s7385_s13, %s4658_s0  ;;  %p4840_p0 = pnand %p4839_p13, %p5017_p6 }
  0x3a   : > { %761 = vperm.xlu1 %4772, %v621_v28   ;;  %756 = vperm.xlu0 %4771, %v620_v29   ;;  %v485_v44 = vld [vmem:[%s7470_s1 + $0x18] sm:$0xff]  ;;  %v688_v45 = vld [vmem:[%s7374_s2 + $0x230] sm:$0xff]  ;;  %v486_v47 = vld [vmem:[%s7470_s1 + $0x20] sm:$0xff]  ;;  %p4845_p2 = scmp.lt.s32.totalorder %s7330_s21, %s4843_s17 }
  0x3b   : > { %v627_v48 = vld [vmem:[%s7374_s2 + $0x48] sm:$0xff]  ;;  %v626_v49 = vld [vmem:[%s7374_s2 + $0x40] sm:$0xff]  ;;  %v689_v54 = vld [vmem:[%s7374_s2 + $0x238] sm:$0xff]  ;;  %p4841_p1 = pneg %p4840_p0 }
  0x3c   : > { %4666 = vmatpush1.bf16.msra.mxu0 %v4665_v30  ;;  %4671 = vmatpush1.bf16.msra.mxu1 %v4665_v30  ;;  %v582_v50 = vld [vmem:[%s7470_s1 + $0x320] sm:$0xff]  ;;  %v583_v51 = vld [vmem:[%s7470_s1 + $0x328] sm:$0xff]  ;;  %v584_v55 = vld [vmem:[%s7470_s1 + $0x330] sm:$0xff] }
  0x3d   : > { %1761 = vmatprep.subr.mxu0 %v617_v31  ;;  %4669 = vmatprep.subr.mxu1 %v617_v31  ;;  %v487_v52 = vld [vmem:[%s7470_s1 + $0x28] sm:$0xff]  ;;  %v690_v53 = vld [vmem:[%s7374_s2 + $0x240] sm:$0xff]  ;;  %v488_v56 = vld [vmem:[%s7470_s1 + $0x30] sm:$0xff] }
  0x3e   : > { %1076 = vperm.xlu1 %4772, %v684_v32   ;;  %1071 = vperm.xlu0 %4771, %v683_v33   ;;  %v629_v57 = vld [vmem:[%s7374_s2 + $0x58] sm:$0xff]  ;;  %v628_v58 = vld [vmem:[%s7374_s2 + $0x50] sm:$0xff]  ;;  %v691_v62 = vld [vmem:[%s7374_s2 + $0x248] sm:$0xff] }
  0x3f   : > { %v585_v59 = vld [vmem:[%s7470_s1 + $0x338] sm:$0xff]  ;;  %v692_v61 = vld [vmem:[%s7374_s2 + $0x250] sm:$0xff]  ;;  %v586_v63 = vld [vmem:[%s7470_s1 + $0x340] sm:$0xff] }
  0x40   : > { %1762 = vmatpush1.msra.mxu0 %v616_v34  ;;  %4672 = vmatpush1.msra.mxu1 %v616_v34  ;;  %v489_v60 = vld [vmem:[%s7470_s1 + $0x38] sm:$0xff]  ;;  %v490_v0 = vld [vmem:[%s7470_s1 + $0x40] sm:$0xff]  ;;  %v631_v1 = vld [vmem:[%s7374_s2 + $0x68] sm:$0xff] }
  0x41   : > { %4443 = vmatmul.mubr.msk.f32.vlgmr.msra.gmra.mrb[0].mxu0 %vm1374_vm0, %v482_v35  ;;  %4543 = vmatmul.mubr.msk.f32.vlgmr.msra.gmra.mrb[0].mxu1 %vm1374_vm0, %v582_v50  ;;  %v630_v2 = vld [vmem:[%s7374_s2 + $0x60] sm:$0xff]  ;;  %v587_v3 = vld [vmem:[%s7470_s1 + $0x348] sm:$0xff]  ;;  %v693_v6 = vld [vmem:[%s7374_s2 + $0x258] sm:$0xff] }
  0x42   : > { %771 = vperm.xlu1 %4772, %v623_v36   ;;  %766 = vperm.xlu0 %4771, %v622_v37   ;;  %v491_v4 = vld [vmem:[%s7470_s1 + $0x48] sm:$0xff]  ;;  %v694_v5 = vld [vmem:[%s7374_s2 + $0x260] sm:$0xff]  ;;  %v492_v7 = vld [vmem:[%s7470_s1 + $0x50] sm:$0xff] }
  0x43   : > { %1823 = vmatprep.mubr.f32.mxu0 %v7389_v16  ;;  %2423 = vmatprep.mubr.f32.mxu1 %v7389_v16  ;;  %v633_v8 = vld [vmem:[%s7374_s2 + $0x78] sm:$0xff]  ;;  %v632_v9 = vld [vmem:[%s7374_s2 + $0x70] sm:$0xff]  ;;  %v695_v14 = vld [vmem:[%s7374_s2 + $0x268] sm:$0xff] }
  0x44   : > { %v588_v10 = vld [vmem:[%s7470_s1 + $0x350] sm:$0xff]  ;;  %v493_v11 = vld [vmem:[%s7470_s1 + $0x58] sm:$0xff]  ;;  %v494_v17 = vld [vmem:[%s7470_s1 + $0x60] sm:$0xff] }
  0x45   : > { %4444 = vmatmul.mubr.msk.f32.gmra.mrb[2].mxu0 %vm1374_vm0, %v483_v38  ;;  %4544 = vmatmul.mubr.msk.f32.gmra.mrb[2].mxu1 %vm1374_vm0, %v583_v51  ;;  %v696_v12 = vld [vmem:[%s7374_s2 + $0x270] sm:$0xff]  ;;  %v589_v15 = vld [vmem:[%s7470_s1 + $0x358] sm:$0xff]  ;;  %v635_v18 = vld [vmem:[%s7374_s2 + $0x88] sm:$0xff] }
  0x46   : > { %1086 = vperm.xlu1 %4772, %v686_v39   ;;  %1081 = vperm.xlu0 %4771, %v685_v40   ;;  %v634_v19 = vld [vmem:[%s7374_s2 + $0x80] sm:$0xff]  ;;  %v495_v21 = vld [vmem:[%s7470_s1 + $0x68] sm:$0xff]  ;;  %v697_v23 = vld [vmem:[%s7374_s2 + $0x278] sm:$0xff] }
  0x47   : > { %1829 = vmatprep.mubr.f32.mxu0 %v7389_v16  ;;  %2429 = vmatprep.mubr.f32.mxu1 %v7389_v16  ;;  %v590_v20 = vld [vmem:[%s7470_s1 + $0x360] sm:$0xff]  ;;  %v591_v24 = vld [vmem:[%s7470_s1 + $0x368] sm:$0xff]  ;;  %v496_v25 = vld [vmem:[%s7470_s1 + $0x70] sm:$0xff] }
  0x48   : > { %v698_v22 = vld [vmem:[%s7374_s2 + $0x280] sm:$0xff]  ;;  %v637_v26 = vld [vmem:[%s7374_s2 + $0x98] sm:$0xff]  ;;  %v636_v27 = vld [vmem:[%s7374_s2 + $0x90] sm:$0xff] }
  0x49   : > { %4445 = vmatmul.mubr.msk.f32.gmra.mrb[4].mxu0 %vm1374_vm0, %v484_v41  ;;  %4545 = vmatmul.mubr.msk.f32.gmra.mrb[4].mxu1 %vm1374_vm0, %v584_v55  ;;  %v592_v28 = vld [vmem:[%s7470_s1 + $0x370] sm:$0xff]  ;;  %v497_v29 = vld [vmem:[%s7470_s1 + $0x78] sm:$0xff]  ;;  %v699_v31 = vld [vmem:[%s7374_s2 + $0x288] sm:$0xff] }
  0x4a   : > { %781 = vperm.xlu1 %4772, %v625_v42   ;;  %776 = vperm.xlu0 %4771, %v624_v43   ;;  %v700_v30 = vld [vmem:[%s7374_s2 + $0x290] sm:$0xff]  ;;  %v593_v32 = vld [vmem:[%s7470_s1 + $0x378] sm:$0xff]  ;;  %v498_v33 = vld [vmem:[%s7470_s1 + $0x80] sm:$0xff] }
  0x4b   : > { %1835 = vmatprep.mubr.f32.mxu0 %v7389_v16  ;;  %2435 = vmatprep.mubr.f32.mxu1 %v7389_v16  ;;  %v639_v34 = vld [vmem:[%s7374_s2 + $0xa8] sm:$0xff]  ;;  %v638_v35 = vld [vmem:[%s7374_s2 + $0xa0] sm:$0xff]  ;;  %v701_v39 = vld [vmem:[%s7374_s2 + $0x298] sm:$0xff] }
  0x4c   : > { %v594_v36 = vld [vmem:[%s7470_s1 + $0x380] sm:$0xff]  ;;  %v499_v37 = vld [vmem:[%s7470_s1 + $0x88] sm:$0xff]  ;;  %v596_v41 = vld [vmem:[%s7470_s1 + $0x390] sm:$0xff] }
  0x4d   : > { %4446 = vmatmul.mubr.msk.f32.gmra.mrb[6].mxu0 %vm1374_vm0, %v485_v44  ;;  %4546 = vmatmul.mubr.msk.f32.gmra.mrb[6].mxu1 %vm1374_vm0, %v585_v59  ;;  %v702_v38 = vld [vmem:[%s7374_s2 + $0x2a0] sm:$0xff]  ;;  %v595_v40 = vld [vmem:[%s7470_s1 + $0x388] sm:$0xff]  ;;  %v500_v42 = vld [vmem:[%s7470_s1 + $0x90] sm:$0xff] }
  0x4e   : > { %1096 = vperm.xlu1 %4772, %v688_v45   ;;  %1091 = vperm.xlu0 %4771, %v687_v46   ;;  %v641_v43 = vld [vmem:[%s7374_s2 + $0xb8] sm:$0xff]  ;;  %v640_v44 = vld [vmem:[%s7374_s2 + $0xb0] sm:$0xff]  ;;  %v502_v50 = vld [vmem:[%s7470_s1 + $0xa0] sm:$0xff] }
  0x4f   : > { %1841 = vmatprep.mubr.f32.mxu0 %v7389_v16  ;;  %2441 = vmatprep.mubr.f32.mxu1 %v7389_v16  ;;  %v597_v45 = vld [vmem:[%s7470_s1 + $0x398] sm:$0xff]  ;;  %v643_v51 = vld [vmem:[%s7374_s2 + $0xc8] sm:$0xff]  ;;  %v706_v55 = vld [vmem:[%s7374_s2 + $0x2c0] sm:$0xff] }
  0x50   : > { %v501_v46 = vld [vmem:[%s7470_s1 + $0x98] sm:$0xff] }
  0x51   : > { %4447 = vmatmul.mubr.msk.f32.gmra.mrb[8].mxu0 %vm1374_vm0, %v486_v47  ;;  %4547 = vmatmul.mubr.msk.f32.gmra.mrb[8].mxu1 %vm1374_vm0, %v586_v63  ;;  %v704_v47 = vld [vmem:[%s7374_s2 + $0x2b0] sm:$0xff]  ;;  %v645_v59 = vld [vmem:[%s7374_s2 + $0xd8] sm:$0xff] }
  0x52   : > { %791 = vperm.xlu1 %4772, %v627_v48   ;;  %786 = vperm.xlu0 %4771, %v626_v49   ;;  %v703_v48 = vld [vmem:[%s7374_s2 + $0x2a8] sm:$0xff]  ;;  %v598_v49 = vld [vmem:[%s7470_s1 + $0x3a0] sm:$0xff]  ;;  %v708_v63 = vld [vmem:[%s7374_s2 + $0x2d0] sm:$0xff] }
  0x53   : > { %1847 = vmatprep.mubr.f32.mxu0 %v7389_v16  ;;  %2447 = vmatprep.mubr.f32.mxu1 %v7389_v16 }
  0x55   : > { %4448 = vmatmul.mubr.msk.f32.gmra.mrb[10].mxu0 %vm1374_vm0, %v487_v52  ;;  %4548 = vmatmul.mubr.msk.f32.gmra.mrb[10].mxu1 %vm1374_vm0, %v587_v3  ;;  %v642_v52 = vld [vmem:[%s7374_s2 + $0xc0] sm:$0xff]  ;;  %v647_v3 = vld [vmem:[%s7374_s2 + $0xe8] sm:$0xff] }
  0x56   : > { %1106 = vperm.xlu1 %4772, %v690_v53   ;;  %1101 = vperm.xlu0 %4771, %v689_v54   ;;  %v599_v53 = vld [vmem:[%s7470_s1 + $0x3a8] sm:$0xff] }
  0x57   : > { %1853 = vmatprep.mubr.f32.mxu0 %v7389_v16  ;;  %2453 = vmatprep.mubr.f32.mxu1 %v7389_v16  ;;  %v503_v54 = vld [vmem:[%s7470_s1 + $0xa8] sm:$0xff] }
  0x59   : > { %4449 = vmatmul.mubr.msk.f32.gmra.mrb[12].mxu0 %vm1374_vm0, %v488_v56  ;;  %4549 = vmatmul.mubr.msk.f32.gmra.mrb[12].mxu1 %vm1374_vm0, %v588_v10  ;;  %v705_v56 = vld [vmem:[%s7374_s2 + $0x2b8] sm:$0xff]  ;;  %v508_v10 = vld [vmem:[%s7470_s1 + $0xd0] sm:$0xff] }
  0x5a   : > { %801 = vperm.xlu1 %4772, %v629_v57   ;;  %796 = vperm.xlu0 %4771, %v628_v58   ;;  %v600_v57 = vld [vmem:[%s7470_s1 + $0x3b0] sm:$0xff] }
  0x5b   : > { %1859 = vmatprep.mubr.f32.mxu0 %v7389_v16  ;;  %2459 = vmatprep.mubr.f32.mxu1 %v7389_v16  ;;  %v504_v58 = vld [vmem:[%s7470_s1 + $0xb0] sm:$0xff] }
  0x5d   : > { %4450 = vmatmul.mubr.msk.f32.gmra.mrb[14].mxu0 %vm1374_vm0, %v489_v60  ;;  %4550 = vmatmul.mubr.msk.f32.gmra.mrb[14].mxu1 %vm1374_vm0, %v589_v15  ;;  %v644_v60 = vld [vmem:[%s7374_s2 + $0xd0] sm:$0xff]  ;;  %v509_v15 = vld [vmem:[%s7470_s1 + $0xd8] sm:$0xff] }
  0x5e   : > { %1116 = vperm.xlu1 %4772, %v692_v61   ;;  %1111 = vperm.xlu0 %4771, %v691_v62   ;;  %v601_v61 = vld [vmem:[%s7470_s1 + $0x3b8] sm:$0xff] }
  0x5f   : > { %1865 = vmatprep.mubr.f32.mxu0 %v7389_v16  ;;  %2465 = vmatprep.mubr.f32.mxu1 %v7389_v16  ;;  %v505_v62 = vld [vmem:[%s7470_s1 + $0xb8] sm:$0xff] }
  0x61   : > { %4451 = vmatmul.mubr.msk.f32.gmra.mrb[16].mxu0 %vm1374_vm0, %v490_v0  ;;  %4551 = vmatmul.mubr.msk.f32.gmra.mrb[16].mxu1 %vm1374_vm0, %v590_v20  ;;  %v707_v0 = vld [vmem:[%s7374_s2 + $0x2c8] sm:$0xff]  ;;  %v510_v20 = vld [vmem:[%s7470_s1 + $0xe0] sm:$0xff] }
  0x62   : > { %811 = vperm.xlu1 %4772, %v631_v1   ;;  %806 = vperm.xlu0 %4771, %v630_v2   ;;  %v602_v1 = vld [vmem:[%s7470_s1 + $0x3c0] sm:$0xff] }
  0x63   : > { %1871 = vmatprep.mubr.f32.mxu0 %v7389_v16  ;;  %2471 = vmatprep.mubr.f32.mxu1 %v7389_v16  ;;  %v506_v2 = vld [vmem:[%s7470_s1 + $0xc0] sm:$0xff] }
  0x65   : > { %4452 = vmatmul.mubr.msk.f32.gmra.mrb[18].mxu0 %vm1374_vm0, %v491_v4  ;;  %4552 = vmatmul.mubr.msk.f32.gmra.mrb[18].mxu1 %vm1374_vm0, %v591_v24  ;;  %v646_v4 = vld [vmem:[%s7374_s2 + $0xe0] sm:$0xff] }
  0x66   : > { %1126 = vperm.xlu1 %4772, %v694_v5   ;;  %1121 = vperm.xlu0 %4771, %v693_v6   ;;  %v603_v5 = vld [vmem:[%s7470_s1 + $0x3c8] sm:$0xff] }
  0x67   : > { %1877 = vmatprep.mubr.f32.mxu0 %v7389_v16  ;;  %2477 = vmatprep.mubr.f32.mxu1 %v7389_v16  ;;  %v507_v6 = vld [vmem:[%s7470_s1 + $0xc8] sm:$0xff] }
  0x69   : > { %4453 = vmatmul.mubr.msk.f32.gmra.mrb[20].mxu0 %vm1374_vm0, %v492_v7  ;;  %4553 = vmatmul.mubr.msk.f32.gmra.mrb[20].mxu1 %vm1374_vm0, %v592_v28  ;;  %v710_v7 = vld [vmem:[%s7374_s2 + $0x2e0] sm:$0xff]  ;;  %v713_v28 = vld [vmem:[%s7374_s2 + $0x2f8] sm:$0xff] }
  0x6a   : > { %821 = vperm.xlu1 %4772, %v633_v8   ;;  %816 = vperm.xlu0 %4771, %v632_v9   ;;  %v709_v8 = vld [vmem:[%s7374_s2 + $0x2d8] sm:$0xff]  ;;  %v604_v9 = vld [vmem:[%s7470_s1 + $0x3d0] sm:$0xff] }
  0x6b   : > { %1883 = vmatprep.mubr.f32.mxu0 %v7389_v16  ;;  %2483 = vmatprep.mubr.f32.mxu1 %v7389_v16 }
  0x6d   : > { %4454 = vmatmul.mubr.msk.f32.gmra.mrb[22].mxu0 %vm1374_vm0, %v493_v11  ;;  %4554 = vmatmul.mubr.msk.f32.gmra.mrb[22].mxu1 %vm1374_vm0, %v593_v32  ;;  %v649_v11 = vld [vmem:[%s7374_s2 + $0xf8] sm:$0xff] }
  0x6e   : > { %1136 = vperm.xlu1 %4772, %v696_v12   ;;  %1131 = vperm.xlu0 %4771, %v695_v14   ;;  %v648_v12 = vld [vmem:[%s7374_s2 + $0xf0] sm:$0xff]  ;;  %v605_v14 = vld [vmem:[%s7470_s1 + $0x3d8] sm:$0xff] }
  0x6f   : > { %1889 = vmatprep.mubr.f32.mxu0 %v7389_v16  ;;  %2489 = vmatprep.mubr.f32.mxu1 %v7389_v16  ;;  %v653_v32 = vld [vmem:[%s7374_s2 + $0x118] sm:$0xff] }
  0x71   : > { %4455 = vmatmul.mubr.msk.f32.gmra.mrb[24].mxu0 %vm1374_vm0, %v494_v17  ;;  %4555 = vmatmul.mubr.msk.f32.gmra.mrb[24].mxu1 %vm1374_vm0, %v594_v36  ;;  %v712_v17 = vld [vmem:[%s7374_s2 + $0x2f0] sm:$0xff]  ;;  %v513_v36 = vld [vmem:[%s7470_s1 + $0xf8] sm:$0xff] }
  0x72   : > { %831 = vperm.xlu1 %4772, %v635_v18   ;;  %826 = vperm.xlu0 %4771, %v634_v19   ;;  %v711_v18 = vld [vmem:[%s7374_s2 + $0x2e8] sm:$0xff]  ;;  %v606_v19 = vld [vmem:[%s7470_s1 + $0x3e0] sm:$0xff] }
  0x73   : > { %1895 = vmatprep.mubr.f32.mxu0 %v7389_v16  ;;  %2495 = vmatprep.mubr.f32.mxu1 %v7389_v16 }
  0x75   : > { %4456 = vmatmul.mubr.msk.f32.gmra.mrb[26].mxu0 %vm1374_vm0, %v495_v21  ;;  %4556 = vmatmul.mubr.msk.f32.gmra.mrb[26].mxu1 %vm1374_vm0, %v595_v40  ;;  %v651_v21 = vld [vmem:[%s7374_s2 + $0x108] sm:$0xff] }
  0x76   : > { %1146 = vperm.xlu1 %4772, %v698_v22   ;;  %1141 = vperm.xlu0 %4771, %v697_v23   ;;  %v650_v22 = vld [vmem:[%s7374_s2 + $0x100] sm:$0xff] }
  0x77   : > { %1901 = vmatprep.mubr.f32.mxu0 %v7389_v16  ;;  %2501 = vmatprep.mubr.f32.mxu1 %v7389_v16 }
  0x79   : > { %4457 = vmatmul.mubr.msk.f32.gmra.mrb[28].mxu0 %vm1374_vm0, %v496_v25  ;;  %4557 = vmatmul.mubr.msk.f32.gmra.mrb[28].mxu1 %vm1374_vm0, %v596_v41  ;;  %v607_v25 = vld [vmem:[%s7470_s1 + $0x3e8] sm:$0xff]  ;;  %v514_v41 = vld [vmem:[%s7470_s1 + $0x100] sm:$0xff] }
  0x7a   : > { %841 = vperm.xlu1 %4772, %v637_v26   ;;  %836 = vperm.xlu0 %4771, %v636_v27   ;;  %v511_v26 = vld [vmem:[%s7470_s1 + $0xe8] sm:$0xff]  ;;  %v714_v27 = vld [vmem:[%s7374_s2 + $0x300] sm:$0xff] }
  0x7b   : > { %1907 = vmatprep.mubr.f32.mxu0 %v7389_v16  ;;  %2507 = vmatprep.mubr.f32.mxu1 %v7389_v16 }
  0x7d   : > { %4458 = vmatmul.mubr.msk.f32.gmra.mrb[30].mxu0 %vm1374_vm0, %v497_v29  ;;  %4558 = vmatmul.mubr.msk.f32.gmra.mrb[30].mxu1 %vm1374_vm0, %v597_v45 }
  0x7e   : > { %1156 = vperm.xlu1 %4772, %v700_v30   ;;  %1151 = vperm.xlu0 %4771, %v699_v31   ;;  %v512_v31 = vld [vmem:[%s7470_s1 + $0xf0] sm:$0xff] }
  0x7f   : > { %1913 = vmatprep.mubr.f32.mxu0 %v7389_v16  ;;  %2513 = vmatprep.mubr.f32.mxu1 %v7389_v16 }
  0x81   : > { %4459 = vmatmul.mubr.msk.f32.gmra.mrb[32].mxu0 %vm1374_vm0, %v498_v33  ;;  %4559 = vmatmul.mubr.msk.f32.gmra.mrb[32].mxu1 %vm1374_vm0, %v598_v49  ;;  %v652_v33 = vld [vmem:[%s7374_s2 + $0x110] sm:$0xff] }
  0x82   : > { %851 = vperm.xlu1 %4772, %v639_v34   ;;  %846 = vperm.xlu0 %4771, %v638_v35  }
  0x83   : > { %1919 = vmatprep.mubr.f32.mxu0 %v7389_v16  ;;  %2519 = vmatprep.mubr.f32.mxu1 %v7389_v16 }
  0x85   : > { %4460 = vmatmul.mubr.msk.f32.gmra.mrb[34].mxu0 %vm1374_vm0, %v499_v37  ;;  %4560 = vmatmul.mubr.msk.f32.gmra.mrb[34].mxu1 %vm1374_vm0, %v599_v53  ;;  %v716_v37 = vld [vmem:[%s7374_s2 + $0x310] sm:$0xff] }
  0x86   : > { %1166 = vperm.xlu1 %4772, %v702_v38   ;;  %1161 = vperm.xlu0 %4771, %v701_v39   ;;  %v715_v38 = vld [vmem:[%s7374_s2 + $0x308] sm:$0xff]  ;;  %v656_v53 = vld [vmem:[%s7374_s2 + $0x130] sm:$0xff] }
  0x87   : > { %1925 = vmatprep.mubr.f32.mxu0 %v7389_v16  ;;  %2525 = vmatprep.mubr.f32.mxu1 %v7389_v16 }
  0x89   : > { %4461 = vmatmul.mubr.msk.f32.gmra.mrb[36].mxu0 %vm1374_vm0, %v500_v42  ;;  %4561 = vmatmul.mubr.msk.f32.gmra.mrb[36].mxu1 %vm1374_vm0, %v600_v57  ;;  %v655_v42 = vld [vmem:[%s7374_s2 + $0x128] sm:$0xff]  ;;  %v720_v57 = vld [vmem:[%s7374_s2 + $0x330] sm:$0xff] }
  0x8a   : > { %861 = vperm.xlu1 %4772, %v641_v43   ;;  %856 = vperm.xlu0 %4771, %v640_v44   ;;  %v654_v43 = vld [vmem:[%s7374_s2 + $0x120] sm:$0xff] }
  0x8b   : > { %1931 = vmatprep.mubr.f32.mxu0 %v7389_v16  ;;  %2531 = vmatprep.mubr.f32.mxu1 %v7389_v16 }
  0x8d   : > { %4462 = vmatmul.mubr.msk.f32.gmra.mrb[38].mxu0 %vm1374_vm0, %v501_v46  ;;  %4562 = vmatmul.mubr.msk.f32.gmra.mrb[38].mxu1 %vm1374_vm0, %v601_v61  ;;  %v515_v46 = vld [vmem:[%s7470_s1 + $0x108] sm:$0xff]  ;;  %v518_v61 = vld [vmem:[%s7470_s1 + $0x120] sm:$0xff] }
  0x8e   : > { %1176 = vperm.xlu1 %4772, %v704_v47   ;;  %1171 = vperm.xlu0 %4771, %v703_v48   ;;  %v718_v47 = vld [vmem:[%s7374_s2 + $0x320] sm:$0xff]  ;;  %v717_v48 = vld [vmem:[%s7374_s2 + $0x318] sm:$0xff] }
  0x8f   : > { %1937 = vmatprep.mubr.f32.mxu0 %v7389_v16  ;;  %2537 = vmatprep.mubr.f32.mxu1 %v7389_v16 }
  0x91   : > { %4463 = vmatmul.mubr.msk.f32.gmra.mrb[40].mxu0 %vm1374_vm0, %v502_v50  ;;  %4563 = vmatmul.mubr.msk.f32.gmra.mrb[40].mxu1 %vm1374_vm0, %v602_v1 }
  0x92   : > { %871 = vperm.xlu1 %4772, %v643_v51   ;;  %866 = vperm.xlu0 %4771, %v642_v52   ;;  %v516_v51 = vld [vmem:[%s7470_s1 + $0x110] sm:$0xff]  ;;  %v657_v52 = vld [vmem:[%s7374_s2 + $0x138] sm:$0xff] }
  0x93   : > { %1943 = vmatprep.mubr.f32.mxu0 %v7389_v16  ;;  %2543 = vmatprep.mubr.f32.mxu1 %v7389_v16 }
  0x95   : > { %4464 = vmatmul.mubr.msk.f32.gmra.mrb[42].mxu0 %vm1374_vm0, %v503_v54  ;;  %4564 = vmatmul.mubr.msk.f32.gmra.mrb[42].mxu1 %vm1374_vm0, %v603_v5 }
  0x96   : > { %1186 = vperm.xlu1 %4772, %v706_v55   ;;  %1181 = vperm.xlu0 %4771, %v705_v56   ;;  %v517_v56 = vld [vmem:[%s7470_s1 + $0x118] sm:$0xff] }
  0x97   : > { %1949 = vmatprep.mubr.f32.mxu0 %v7389_v16  ;;  %2549 = vmatprep.mubr.f32.mxu1 %v7389_v16 }
  0x99   : > { %4465 = vmatmul.mubr.msk.f32.gmra.mrb[44].mxu0 %vm1374_vm0, %v504_v58  ;;  %4565 = vmatmul.mubr.msk.f32.gmra.mrb[44].mxu1 %vm1374_vm0, %v604_v9  ;;  %v719_v58 = vld [vmem:[%s7374_s2 + $0x328] sm:$0xff]  ;;  %v660_v9 = vld [vmem:[%s7374_s2 + $0x150] sm:$0xff] }
  0x9a   : > { %881 = vperm.xlu1 %4772, %v645_v59   ;;  %876 = vperm.xlu0 %4771, %v644_v60  }
  0x9b   : > { %1955 = vmatprep.mubr.f32.mxu0 %v7389_v16  ;;  %2555 = vmatprep.mubr.f32.mxu1 %v7389_v16 }
  0x9d   : > { %4466 = vmatmul.mubr.msk.f32.gmra.mrb[46].mxu0 %vm1374_vm0, %v505_v62  ;;  %4566 = vmatmul.mubr.msk.f32.gmra.mrb[46].mxu1 %vm1374_vm0, %v605_v14  ;;  %v659_v62 = vld [vmem:[%s7374_s2 + $0x148] sm:$0xff]  ;;  %v724_v14 = vld [vmem:[%s7374_s2 + $0x350] sm:$0xff] }
  0x9e   : > { %1196 = vperm.xlu1 %4772, %v708_v63   ;;  %1191 = vperm.xlu0 %4771, %v707_v0   ;;  %v658_v63 = vld [vmem:[%s7374_s2 + $0x140] sm:$0xff] }
  0x9f   : > { %1961 = vmatprep.mubr.f32.mxu0 %v7389_v16  ;;  %2561 = vmatprep.mubr.f32.mxu1 %v7389_v16 }
  0xa1   : > { %4467 = vmatmul.mubr.msk.f32.gmra.mrb[48].mxu0 %vm1374_vm0, %v506_v2  ;;  %4567 = vmatmul.mubr.msk.f32.gmra.mrb[48].mxu1 %vm1374_vm0, %v606_v19  ;;  %v519_v2 = vld [vmem:[%s7470_s1 + $0x128] sm:$0xff]  ;;  %v522_v19 = vld [vmem:[%s7470_s1 + $0x140] sm:$0xff] }
  0xa2   : > { %891 = vperm.xlu1 %4772, %v647_v3   ;;  %886 = vperm.xlu0 %4771, %v646_v4   ;;  %v722_v3 = vld [vmem:[%s7374_s2 + $0x340] sm:$0xff]  ;;  %v721_v4 = vld [vmem:[%s7374_s2 + $0x338] sm:$0xff] }
  0xa3   : > { %1967 = vmatprep.mubr.f32.mxu0 %v7389_v16  ;;  %2567 = vmatprep.mubr.f32.mxu1 %v7389_v16 }
  0xa5   : > { %4468 = vmatmul.mubr.msk.f32.gmra.mrb[50].mxu0 %vm1374_vm0, %v507_v6  ;;  %4568 = vmatmul.mubr.msk.f32.gmra.mrb[50].mxu1 %vm1374_vm0, %v607_v25 }
  0xa6   : > { %1206 = vperm.xlu1 %4772, %v710_v7   ;;  %1201 = vperm.xlu0 %4771, %v709_v8   ;;  %v520_v7 = vld [vmem:[%s7470_s1 + $0x130] sm:$0xff]  ;;  %v661_v8 = vld [vmem:[%s7374_s2 + $0x158] sm:$0xff] }
  0xa7   : > { %1973 = vmatprep.mubr.f32.mxu0 %v7389_v16 }
  0xa9   : > { %4469 = vmatmul.mubr.msk.f32.gmra.mrb[52].mxu0 %vm1374_vm0, %v508_v10 }
  0xaa   : > { %901 = vperm.xlu1 %4772, %v649_v11   ;;  %896 = vperm.xlu0 %4771, %v648_v12   ;;  %v521_v12 = vld [vmem:[%s7470_s1 + $0x138] sm:$0xff] }
  0xab   : > { %1979 = vmatprep.mubr.f32.mxu0 %v7389_v16 }
  0xad   : > { %4470 = vmatmul.mubr.msk.f32.gmra.mrb[54].mxu0 %vm1374_vm0, %v509_v15  ;;  %v723_v15 = vld [vmem:[%s7374_s2 + $0x348] sm:$0xff] }
  0xae   : > { %1216 = vperm.xlu1 %4772, %v712_v17   ;;  %1211 = vperm.xlu0 %4771, %v711_v18  }
  0xaf   : > { %1985 = vmatprep.mubr.f32.mxu0 %v7389_v16 }
  0xb1   : > { %v5520_v23 = vpop.permute.xlu1 %1061  ;;  %v5522_v24 = vpop.permute.xlu0 %746  ;;  %4471 = vmatmul.mubr.msk.f32.gmra.mrb[56].mxu0 %vm1374_vm0, %v510_v20  ;;  %v663_v20 = vld [vmem:[%s7374_s2 + $0x168] sm:$0xff] }
  0xb2   : > { %7471 = vst [vmem:[#allocation7_spill] sm:$0xff] %v5520_v23  ;;  %7472 = vst [vmem:[#allocation8_spill] sm:$0xff] %v5522_v24  ;;  %911 = vperm.xlu1 %4772, %v651_v21   ;;  %906 = vperm.xlu0 %4771, %v650_v22   ;;  %v662_v21 = vld [vmem:[%s7374_s2 + $0x160] sm:$0xff]  ;;  %v3996_v23 = vld [vmem:[%s7382_s10 + $0x28] sm:$0xff] }
  0xb3   : > { %1991 = vmatprep.mubr.f32.mxu0 %v7389_v16  ;;  %v564_v24 = vld [vmem:[%s7470_s1 + $0x290] sm:$0xff] }
  0xb5   : > { %v5540_v29 = vpop.permute.xlu1 %1066  ;;  %v5542_v30 = vpop.permute.xlu0 %751  ;;  %4472 = vmatmul.mubr.msk.f32.gmra.mrb[58].mxu0 %vm1374_vm0, %v511_v26  ;;  %v523_v26 = vld [vmem:[%s7470_s1 + $0x148] sm:$0xff] }
  0xb6   : > { %7473 = vst [vmem:[#allocation9_spill] sm:$0xff] %v5540_v29  ;;  %7474 = vst [vmem:[#allocation10_spill] sm:$0xff] %v5542_v30  ;;  %1226 = vperm.xlu1 %4772, %v714_v27   ;;  %1221 = vperm.xlu0 %4771, %v713_v28   ;;  %v726_v27 = vld [vmem:[%s7374_s2 + $0x360] sm:$0xff]  ;;  %v725_v28 = vld [vmem:[%s7374_s2 + $0x358] sm:$0xff] }
  0xb7   : > { %1997 = vmatprep.mubr.f32.mxu0 %v7389_v16 }
  0xb9   : > { %v5555_v34 = vpop.permute.xlu1 %761  ;;  %v5557_v35 = vpop.permute.xlu0 %756  ;;  %4473 = vmatmul.mubr.msk.f32.gmra.mrb[60].mxu0 %vm1374_vm0, %v512_v31 }
  0xba   : > { %7475 = vst [vmem:[#allocation11_spill] sm:$0xff] %v5555_v34  ;;  %7476 = vst [vmem:[#allocation12_spill] sm:$0xff] %v5557_v35  ;;  %921 = vperm.xlu1 %4772, %v653_v32   ;;  %916 = vperm.xlu0 %4771, %v652_v33   ;;  %v524_v33 = vld [vmem:[%s7470_s1 + $0x150] sm:$0xff]  ;;  %v3711_v34 = vld [vmem:[%s7380_s8 + $0x60] sm:$0xf] }
  0xbb   : > { %2003 = vmatprep.mubr.f32.mxu0 %v7389_v16 }
  0xbd   : > { %v5570_v39 = vpop.permute.xlu1 %1076  ;;  %v5572_v40 = vpop.permute.xlu0 %1071  ;;  %4474 = vmatmul.mubr.msk.f32.gmra.mrb[62].mxu0 %vm1374_vm0, %v513_v36  ;;  %v665_v36 = vld [vmem:[%s7374_s2 + $0x178] sm:$0xff] }
  0xbe   : > { %7477 = vst [vmem:[#allocation13_spill] sm:$0xff] %v5570_v39  ;;  %7478 = vst [vmem:[#allocation14_spill] sm:$0xff] %v5572_v40  ;;  %1236 = vperm.xlu1 %4772, %v716_v37   ;;  %1231 = vperm.xlu0 %4771, %v715_v38   ;;  %v664_v37 = vld [vmem:[%s7374_s2 + $0x170] sm:$0xff]  ;;  %v561_v40 = vld [vmem:[%s7470_s1 + $0x278] sm:$0xff] }
  0xbf   : > { %2009 = vmatprep.mubr.f32.mxu0 %v7389_v16 }
  0xc1   : > { %v5585_v44 = vpop.permute.xlu1 %771  ;;  %v5587_v45 = vpop.permute.xlu0 %766  ;;  %4475 = vmatmul.mubr.msk.f32.gmra.mrb[64].mxu0 %vm1374_vm0, %v514_v41  ;;  %v525_v41 = vld [vmem:[%s7470_s1 + $0x158] sm:$0xff] }
  0xc2   : > { %7479 = vst [vmem:[#allocation15_spill] sm:$0xff] %v5585_v44  ;;  %7480 = vst [vmem:[#allocation16_spill] sm:$0xff] %v5587_v45  ;;  %931 = vperm.xlu1 %4772, %v655_v42   ;;  %926 = vperm.xlu0 %4771, %v654_v43   ;;  %v728_v43 = vld [vmem:[%s7374_s2 + $0x370] sm:$0xff]  ;;  %v557_v44 = vld [vmem:[%s7470_s1 + $0x258] sm:$0xff] }
  0xc3   : > { %2015 = vmatprep.mubr.f32.mxu0 %v7389_v16  ;;  %v559_v45 = vld [vmem:[%s7470_s1 + $0x268] sm:$0xff] }
  0xc5   : > { %v5600_v49 = vpop.permute.xlu1 %1086  ;;  %v5602_v50 = vpop.permute.xlu0 %1081  ;;  %4476 = vmatmul.mubr.msk.f32.gmra.mrb[66].mxu0 %vm1374_vm0, %v515_v46  ;;  %v727_v46 = vld [vmem:[%s7374_s2 + $0x368] sm:$0xff] }
  0xc6   : > { %7481 = vst [vmem:[#allocation17_spill] sm:$0xff] %v5600_v49  ;;  %7482 = vst [vmem:[#allocation18_spill] sm:$0xff] %v5602_v50  ;;  %1246 = vperm.xlu1 %4772, %v718_v47   ;;  %1241 = vperm.xlu0 %4771, %v717_v48   ;;  %v526_v47 = vld [vmem:[%s7470_s1 + $0x160] sm:$0xff] }
  0xc7   : > { %2021 = vmatprep.mubr.f32.mxu0 %v7389_v16  ;;  %v558_v50 = vld [vmem:[%s7470_s1 + $0x260] sm:$0xff] }
  0xc9   : > { %v5615_v54 = vpop.permute.xlu1 %781  ;;  %v5617_v55 = vpop.permute.xlu0 %776  ;;  %4477 = vmatmul.mubr.msk.f32.gmra.mrb[68].mxu0 %vm1374_vm0, %v516_v51  ;;  %v667_v51 = vld [vmem:[%s7374_s2 + $0x188] sm:$0xff] }
  0xca   : > { %7483 = vst [vmem:[#allocation19_spill] sm:$0xff] %v5615_v54  ;;  %7484 = vst [vmem:[#allocation20_spill] sm:$0xff] %v5617_v55  ;;  %941 = vperm.xlu1 %4772, %v657_v52   ;;  %936 = vperm.xlu0 %4771, %v656_v53   ;;  %v666_v52 = vld [vmem:[%s7374_s2 + $0x180] sm:$0xff]  ;;  %v555_v55 = vld [vmem:[%s7470_s1 + $0x248] sm:$0xff] }
  0xcb   : > { %2027 = vmatprep.mubr.f32.mxu0 %v7389_v16 }
  0xcd   : > { %v5630_v59 = vpop.permute.xlu1 %1096  ;;  %v5632_v60 = vpop.permute.xlu0 %1091  ;;  %4478 = vmatmul.mubr.msk.f32.gmra.mrb[70].mxu0 %vm1374_vm0, %v517_v56  ;;  %v527_v56 = vld [vmem:[%s7470_s1 + $0x168] sm:$0xff] }
  0xce   : > { %7485 = vst [vmem:[#allocation21_spill] sm:$0xff] %v5630_v59  ;;  %7486 = vst [vmem:[#allocation22_spill] sm:$0xff] %v5632_v60  ;;  %1256 = vperm.xlu1 %4772, %v720_v57   ;;  %1251 = vperm.xlu0 %4771, %v719_v58   ;;  %v730_v57 = vld [vmem:[%s7374_s2 + $0x380] sm:$0xff]  ;;  %v729_v58 = vld [vmem:[%s7374_s2 + $0x378] sm:$0xff] }
  0xcf   : > { %2033 = vmatprep.mubr.f32.mxu0 %v7389_v16  ;;  %v552_v59 = vld [vmem:[%s7470_s1 + $0x230] sm:$0xff]  ;;  %v554_v60 = vld [vmem:[%s7470_s1 + $0x240] sm:$0xff] }
  0xd1   : > { %v5645_v0 = vpop.permute.xlu1 %791  ;;  %v5647_v1 = vpop.permute.xlu0 %786  ;;  %4479 = vmatmul.mubr.msk.f32.gmra.mrb[72].mxu0 %vm1374_vm0, %v518_v61 }
  0xd2   : > { %7487 = vst [vmem:[#allocation23_spill] sm:$0xff] %v5645_v0  ;;  %7488 = vst [vmem:[#allocation24_spill] sm:$0xff] %v5647_v1  ;;  %951 = vperm.xlu1 %4772, %v659_v62   ;;  %946 = vperm.xlu0 %4771, %v658_v63   ;;  %v528_v62 = vld [vmem:[%s7470_s1 + $0x170] sm:$0xff]  ;;  %v549_v0 = vld [vmem:[%s7470_s1 + $0x218] sm:$0xff] }
  0xd3   : > { %2039 = vmatprep.mubr.f32.mxu0 %v7389_v16  ;;  %v551_v1 = vld [vmem:[%s7470_s1 + $0x228] sm:$0xff] }
  0xd5   : > { %v5660_v5 = vpop.permute.xlu1 %1106  ;;  %v5662_v6 = vpop.permute.xlu0 %1101  ;;  %4480 = vmatmul.mubr.msk.f32.gmra.mrb[74].mxu0 %vm1374_vm0, %v519_v2  ;;  %v669_v2 = vld [vmem:[%s7374_s2 + $0x198] sm:$0xff] }
  0xd6   : > { %7489 = vst [vmem:[#allocation25_spill] sm:$0xff] %v5660_v5  ;;  %7490 = vst [vmem:[#allocation26_spill] sm:$0xff] %v5662_v6  ;;  %1266 = vperm.xlu1 %4772, %v722_v3   ;;  %1261 = vperm.xlu0 %4771, %v721_v4   ;;  %v668_v3 = vld [vmem:[%s7374_s2 + $0x190] sm:$0xff]  ;;  %v529_v4 = vld [vmem:[%s7470_s1 + $0x178] sm:$0xff] }
  0xd7   : > { %2045 = vmatprep.mubr.f32.mxu0 %v7389_v16  ;;  %v548_v5 = vld [vmem:[%s7470_s1 + $0x210] sm:$0xff] }
  0xd9   : > { %v5675_v10 = vpop.permute.xlu1 %801  ;;  %v5677_v11 = vpop.permute.xlu0 %796  ;;  %4481 = vmatmul.mubr.msk.f32.gmra.mrb[76].mxu0 %vm1374_vm0, %v520_v7 }
  0xda   : > { %7491 = vst [vmem:[#allocation27_spill] sm:$0xff] %v5675_v10  ;;  %7492 = vst [vmem:[#allocation28_spill] sm:$0xff] %v5677_v11  ;;  %961 = vperm.xlu1 %4772, %v661_v8   ;;  %956 = vperm.xlu0 %4771, %v660_v9   ;;  %v732_v8 = vld [vmem:[%s7374_s2 + $0x390] sm:$0xff]  ;;  %v731_v9 = vld [vmem:[%s7374_s2 + $0x388] sm:$0xff] }
  0xdb   : > { %2051 = vmatprep.mubr.f32.mxu0 %v7389_v16  ;;  %v546_v10 = vld [vmem:[%s7470_s1 + $0x200] sm:$0xff] }
  0xdd   : > { %v5690_v17 = vpop.permute.xlu1 %1116  ;;  %v5692_v18 = vpop.permute.xlu0 %1111  ;;  %4482 = vmatmul.mubr.msk.f32.gmra.mrb[78].mxu0 %vm1374_vm0, %v521_v12 }
  0xde   : > { %7493 = vst [vmem:[#allocation29_spill] sm:$0xff] %v5690_v17  ;;  %7494 = vst [vmem:[#allocation30_spill] sm:$0xff] %v5692_v18  ;;  %1276 = vperm.xlu1 %4772, %v724_v14   ;;  %1271 = vperm.xlu0 %4771, %v723_v15   ;;  %v530_v14 = vld [vmem:[%s7470_s1 + $0x180] sm:$0xff]  ;;  %v671_v15 = vld [vmem:[%s7374_s2 + $0x1a8] sm:$0xff] }
  0xdf   : > { %2057 = vmatprep.mubr.f32.mxu0 %v7389_v16 }
  0xe1   : > { %v5705_v22 = vpop.permute.xlu1 %811  ;;  %v5707_v25 = vpop.permute.xlu0 %806  ;;  %4483 = vmatmul.mubr.msk.f32.gmra.mrb[80].mxu0 %vm1374_vm0, %v522_v19  ;;  %v670_v19 = vld [vmem:[%s7374_s2 + $0x1a0] sm:$0xff] }
  0xe2   : > { %7495 = vst [vmem:[#allocation31_spill] sm:$0xff] %v5705_v22  ;;  %7496 = vst [vmem:[#allocation32_spill] sm:$0xff] %v5707_v25  ;;  %971 = vperm.xlu1 %4772, %v663_v20   ;;  %966 = vperm.xlu0 %4771, %v662_v21   ;;  %v531_v21 = vld [vmem:[%s7470_s1 + $0x188] sm:$0xff] }
  0xe3   : > { %2063 = vmatprep.mubr.f32.mxu0 %v7389_v16 }
  0xe5   : > { %v5720_v31 = vpop.permute.xlu1 %1126  ;;  %v5722_v32 = vpop.permute.xlu0 %1121  ;;  %4484 = vmatmul.mubr.msk.f32.gmra.mrb[82].mxu0 %vm1374_vm0, %v523_v26 }
  0xe6   : > { %7497 = vst [vmem:[#allocation33_spill] sm:$0xff] %v5720_v31  ;;  %7498 = vst [vmem:[#allocation34_spill] sm:$0xff] %v5722_v32  ;;  %1286 = vperm.xlu1 %4772, %v726_v27   ;;  %1281 = vperm.xlu0 %4771, %v725_v28   ;;  %v734_v27 = vld [vmem:[%s7374_s2 + $0x3a0] sm:$0xff]  ;;  %v733_v28 = vld [vmem:[%s7374_s2 + $0x398] sm:$0xff] }
  0xe7   : > { %2069 = vmatprep.mubr.f32.mxu0 %v7389_v16  ;;  %v545_v31 = vld [vmem:[%s7470_s1 + $0x1f8] sm:$0xff]  ;;  %v2925_v32 = vld [vmem:[%s7376_s4 + $0x48] sm:$0xff] }
  0xe9   : > { %v5735_v38 = vpop.permute.xlu0 %816  ;;  %4485 = vmatmul.mubr.msk.f32.gmra.mrb[84].mxu0 %vm1374_vm0, %v524_v33  ;;  %v5741_v42 = vpop.permute.xlu1 %821  ;;  %v532_v33 = vld [vmem:[%s7470_s1 + $0x190] sm:$0xff] }
  0xea   : > { %7499 = vst [vmem:[#allocation35_spill] sm:$0xff] %v5735_v38  ;;  %981 = vperm.xlu1 %4772, %v665_v36   ;;  %976 = vperm.xlu0 %4771, %v664_v37   ;;  %7500 = vst [vmem:[#allocation36_spill] sm:$0xff] %v5741_v42  ;;  %v673_v37 = vld [vmem:[%s7374_s2 + $0x1b8] sm:$0xff] }
  0xeb   : > { %2075 = vmatprep.mubr.f32.mxu0 %v7389_v16  ;;  %v2923_v42 = vld [vmem:[%s7376_s4 + $0x38] sm:$0xff] }
  0xed   : > { %4486 = vmatmul.mubr.msk.f32.gmra.mrb[86].mxu0 %vm1374_vm0, %v525_v41  ;;  %v5754_v48 = vpop.permute.xlu0 %1131  ;;  %v5763_v53 = vpop.permute.xlu1 %1136  ;;  %v672_v41 = vld [vmem:[%s7374_s2 + $0x1b0] sm:$0xff] }
  0xee   : > { %1296 = vperm.xlu1 %4772, %v728_v43   ;;  %1291 = vperm.xlu0 %4771, %v727_v46   ;;  %7501 = vst [vmem:[#allocation37_spill] sm:$0xff] %v5754_v48  ;;  %7502 = vst [vmem:[#allocation38_spill] sm:$0xff] %v5763_v53  ;;  %v533_v46 = vld [vmem:[%s7470_s1 + $0x198] sm:$0xff] }
  0xef   : > { %2081 = vmatprep.mubr.f32.mxu0 %v7389_v16 }
  0xf1   : > { %4487 = vmatmul.mubr.msk.f32.gmra.mrb[88].mxu0 %vm1374_vm0, %v526_v47  ;;  %v5776_v61 = vpop.permute.xlu0 %826  ;;  %v5782_v63 = vpop.permute.xlu1 %831  ;;  %v736_v47 = vld [vmem:[%s7374_s2 + $0x3b0] sm:$0xff] }
  0xf2   : > { %991 = vperm.xlu1 %4772, %v667_v51   ;;  %986 = vperm.xlu0 %4771, %v666_v52   ;;  %7503 = vst [vmem:[#allocation39_spill] sm:$0xff] %v5776_v61  ;;  %7504 = vst [vmem:[#allocation40_spill] sm:$0xff] %v5782_v63  ;;  %v735_v51 = vld [vmem:[%s7374_s2 + $0x3a8] sm:$0xff] }
  0xf3   : > { %2087 = vmatprep.mubr.f32.mxu0 %v7389_v16 }
  0xf5   : > { %4488 = vmatmul.mubr.msk.f32.gmra.mrb[90].mxu0 %vm1374_vm0, %v527_v56  ;;  %v5795_v7 = vpop.permute.xlu0 %1141  ;;  %v5804_v12 = vpop.permute.xlu1 %1146  ;;  %v534_v56 = vld [vmem:[%s7470_s1 + $0x1a0] sm:$0xff] }
  0xf6   : > { %1306 = vperm.xlu1 %4772, %v730_v57   ;;  %1301 = vperm.xlu0 %4771, %v729_v58   ;;  %7505 = vst [vmem:[#allocation41_spill] sm:$0xff] %v5795_v7  ;;  %7506 = vst [vmem:[#allocation42_spill] sm:$0xff] %v5804_v12  ;;  %v675_v58 = vld [vmem:[%s7374_s2 + $0x1c8] sm:$0xff] }
  0xf7   : > { %2093 = vmatprep.mubr.f32.mxu0 %v7389_v16 }
  0xf9   : > { %4489 = vmatmul.mubr.msk.f32.gmra.mrb[92].mxu0 %vm1374_vm0, %v528_v62  ;;  %v5817_v20 = vpop.permute.xlu0 %836  ;;  %v5823_v26 = vpop.permute.xlu1 %841  ;;  %v674_v62 = vld [vmem:[%s7374_s2 + $0x1c0] sm:$0xff] }
  0xfa   : > { %1001 = vperm.xlu1 %4772, %v669_v2   ;;  %996 = vperm.xlu0 %4771, %v668_v3   ;;  %7507 = vst [vmem:[#allocation43_spill] sm:$0xff] %v5817_v20  ;;  %7508 = vst [vmem:[#allocation44_spill] sm:$0xff] %v5823_v26  ;;  %v535_v2 = vld [vmem:[%s7470_s1 + $0x1a8] sm:$0xff] }
  0xfb   : > { %2099 = vmatprep.mubr.f32.mxu0 %v7389_v16 }
  0xfd   : > { %4490 = vmatmul.mubr.msk.f32.gmra.mrb[94].mxu0 %vm1374_vm0, %v529_v4  ;;  %v5836_v36 = vpop.permute.xlu0 %1151  ;;  %v5845_v43 = vpop.permute.xlu1 %1156  ;;  %v738_v4 = vld [vmem:[%s7374_s2 + $0x3c0] sm:$0xff] }
  0xfe   : > { %1316 = vperm.xlu1 %4772, %v732_v8   ;;  %1311 = vperm.xlu0 %4771, %v731_v9   ;;  %7509 = vst [vmem:[#allocation45_spill] sm:$0xff] %v5836_v36  ;;  %7510 = vst [vmem:[#allocation46_spill] sm:$0xff] %v5845_v43  ;;  %v737_v8 = vld [vmem:[%s7374_s2 + $0x3b8] sm:$0xff]  ;;  %v543_v36 = vld [vmem:[%s7470_s1 + $0x1e8] sm:$0xff] }
  0xff   : > { %2105 = vmatprep.mubr.f32.mxu0 %v7389_v16 }
 0x101   : > { %4491 = vmatmul.mubr.msk.f32.gmra.mrb[96].mxu0 %vm1374_vm0, %v530_v14  ;;  %v5858_v52 = vpop.permute.xlu0 %846  ;;  %v5864_v57 = vpop.permute.xlu1 %851 }
 0x102   : > { %1011 = vperm.xlu1 %4772, %v671_v15   ;;  %1006 = vperm.xlu0 %4771, %v670_v19   ;;  %7511 = vst [vmem:[#allocation47_spill] sm:$0xff] %v5858_v52  ;;  %7512 = vst [vmem:[#allocation48_spill] sm:$0xff] %v5864_v57  ;;  %v536_v19 = vld [vmem:[%s7470_s1 + $0x1b0] sm:$0xff]  ;;  %v2919_v52 = vld [vmem:[%s7376_s4 + $0x18] sm:$0xff] }
 0x103   : > { %2111 = vmatprep.mubr.f32.mxu0 %v7389_v16 }
 0x105   : > { %4492 = vmatmul.mubr.msk.f32.gmra.mrb[98].mxu0 %vm1374_vm0, %v531_v21  ;;  %v5877_v3 = vpop.permute.xlu0 %1161  ;;  %v5888_v14 = vpop.permute.xlu1 %1166  ;;  %v677_v21 = vld [vmem:[%s7374_s2 + $0x1d8] sm:$0xff] }
 0x106   : > { %1326 = vperm.xlu1 %4772, %v734_v27   ;;  %1321 = vperm.xlu0 %4771, %v733_v28   ;;  %7513 = vst [vmem:[#allocation49_spill] sm:$0xff] %v5877_v3  ;;  %7515 = vst [vmem:[#allocation51_spill] sm:$0xff] %v5888_v14  ;;  %v676_v27 = vld [vmem:[%s7374_s2 + $0x1d0] sm:$0xff] }
 0x107   : > { %2117 = vmatprep.mubr.f32.mxu0 %v7389_v16 }
 0x109   : > { %4493 = vmatmul.mubr.msk.f32.gmra.mrb[100].mxu0 %vm1374_vm0, %v532_v33  ;;  %v5905_v33 = vpop.permute.xlu0 %856 }
 0x10a   : > { %1021 = vperm.xlu1 %4772, %v673_v37   ;;  %1016 = vperm.xlu0 %4771, %v672_v41   ;;  %7518 = vst [vmem:[#allocation54_spill] sm:$0xff] %v5905_v33  ;;  %v537_v41 = vld [vmem:[%s7470_s1 + $0x1b8] sm:$0xff]  ;;  %v2917_v33 = vld [vmem:[%s7376_s4 + $0x8] sm:$0xff] }
 0x10b   : > { %2123 = vmatprep.mubr.f32.mxu0 %v7389_v16 }
 0x10d   : > { %4494 = vmatmul.mubr.msk.f32.gmra.mrb[102].mxu0 %vm1374_vm0, %v533_v46  ;;  %v5913_v46 = vpop.permute.xlu1 %861 }
 0x10e   : > { %1336 = vperm.xlu1 %4772, %v736_v47   ;;  %1331 = vperm.xlu0 %4771, %v735_v51   ;;  %7520 = vst [vmem:[#allocation56_spill] sm:$0xff] %v5913_v46  ;;  %v740_v47 = vld [vmem:[%s7374_s2 + $0x3d0] sm:$0xff]  ;;  %v739_v51 = vld [vmem:[%s7374_s2 + $0x3c8] sm:$0xff] }
 0x10f   : > { %2129 = vmatprep.mubr.f32.mxu0 %v7389_v16  ;;  %v743_v46 = vld [vmem:[%s7374_s2 + $0x3e8] sm:$0xff] }
 0x111   : > { %4495 = vmatmul.mubr.msk.f32.gmra.mrb[104].mxu0 %vm1374_vm0, %v534_v56 }
 0x112   : > { %1031 = vperm.xlu1 %4772, %v675_v58   ;;  %1026 = vperm.xlu0 %4771, %v674_v62   ;;  %v538_v62 = vld [vmem:[%s7470_s1 + $0x1c0] sm:$0xff] }
 0x113   : > { %2135 = vmatprep.mubr.f32.mxu0 %v7389_v16 }
 0x114   : > { %v5886_v9 = vpop.f32.mrb[0].mxu0 }
 0x115   : > { %7514 = vst [vmem:[#allocation50_spill] sm:$0xff] %v5886_v9  ;;  %4496 = vmatmul.mubr.msk.f32.gmra.mrb[106].mxu0 %vm1374_vm0, %v535_v2  ;;  %v5891_v15 = vpop.f32.mrb[1].mxu0  ;;  %v5930_v2 = vpop.permute.xlu0 %1171 }
 0x116   : > { %7516 = vst [vmem:[#allocation52_spill] sm:$0xff] %v5891_v15  ;;  %1346 = vperm.xlu1 %4772, %v738_v4   ;;  %1341 = vperm.xlu0 %4771, %v737_v8   ;;  %7523 = vst [vmem:[#allocation59_spill] sm:$0xff] %v5930_v2  ;;  %v679_v4 = vld [vmem:[%s7374_s2 + $0x1e8] sm:$0xff]  ;;  %v678_v8 = vld [vmem:[%s7374_s2 + $0x1e0] sm:$0xff] }
 0x117   : > { %2141 = vmatprep.mubr.f32.mxu0 %v7389_v16  ;;  %v563_v15 = vld [vmem:[%s7470_s1 + $0x288] sm:$0xff] }
 0x118   : > { %v5903_v28 = vpop.f32.mrb[2].mxu0 }
 0x119   : > { %7517 = vst [vmem:[#allocation53_spill] sm:$0xff] %v5903_v28  ;;  %4497 = vmatmul.mubr.msk.f32.gmra.mrb[108].mxu0 %vm1374_vm0, %v536_v19  ;;  %v5908_v37 = vpop.f32.mrb[3].mxu0 }
 0x11a   : > { %7519 = vst [vmem:[#allocation55_spill] sm:$0xff] %v5908_v37  ;;  %1041 = vperm.xlu1 %4772, %v677_v21   ;;  %1036 = vperm.xlu0 %4771, %v676_v27   ;;  %v5941_v21 = vpop.permute.xlu1 %1176  ;;  %v562_v37 = vld [vmem:[%s7470_s1 + $0x280] sm:$0xff] }
 0x11b   : > { %2147 = vmatprep.mubr.f32.mxu0 %v7389_v16  ;;  %7525 = vst [vmem:[#allocation61_spill] sm:$0xff] %v5941_v21  ;;  %v7531_v21 = vmov 0.0  }
 0x11c   : > { %v5922_v56 = vpop.f32.mrb[4].mxu0 }
 0x11d   : > { %7521 = vst [vmem:[#allocation57_spill] sm:$0xff] %v5922_v56  ;;  %4498 = vmatmul.mubr.msk.f32.gmra.mrb[110].mxu0 %vm1374_vm0, %v537_v41  ;;  %v5925_v58 = vpop.f32.mrb[5].mxu0  ;;  %v539_v41 = vld [vmem:[%s7470_s1 + $0x1c8] sm:$0xff] }
 0x11e   : > { %7522 = vst [vmem:[#allocation58_spill] sm:$0xff] %v5925_v58  ;;  %1356 = vperm.xlu1 %4772, %v740_v47   ;;  %1351 = vperm.xlu0 %4771, %v739_v51   ;;  %v742_v47 = vld [vmem:[%s7374_s2 + $0x3e0] sm:$0xff]  ;;  %v741_v51 = vld [vmem:[%s7374_s2 + $0x3d8] sm:$0xff] }
 0x11f   : > { %2153 = vmatprep.mubr.f32.mxu0 %v7389_v16 }
 0x120   : > { %v5939_v19 = vpop.f32.mrb[6].mxu0 }
 0x121   : > { %7524 = vst [vmem:[#allocation60_spill] sm:$0xff] %v5939_v19  ;;  %4499 = vmatmul.mubr.msk.f32.gmra.mrb[112].mxu0 %vm1374_vm0, %v538_v62  ;;  %v5944_v27 = vpop.f32.mrb[7].mxu0  ;;  %v5958_v62 = vpop.permute.xlu0 %866  ;;  %v560_v19 = vld [vmem:[%s7470_s1 + $0x270] sm:$0xff] }
 0x122   : > { %7526 = vst [vmem:[#allocation62_spill] sm:$0xff] %v5944_v27  ;;  %1051 = vperm.xlu1 %4772, %v679_v4   ;;  %1046 = vperm.xlu0 %4771, %v678_v8   ;;  %7528 = vst [vmem:[#allocation64_spill] sm:$0xff] %v5958_v62  ;;  %v540_v8 = vld [vmem:[%s7470_s1 + $0x1d0] sm:$0xff] }
 0x123   : > { %2159 = vmatprep.mubr.f32.mxu0 %v7389_v16  ;;  %v5966_v16 = vpop.permute.xlu1 %871 }
 0x124   : > { %v5956_v13 = vpop.f32.mrb[8].mxu0  ;;  %7530 = vst [vmem:[#allocation66_spill] sm:$0xff] %v5966_v16  ;;  %v5983_v16 = vpop.f32.mrb[0].mxu1 }
 0x125   : > { %7527 = vst [vmem:[#allocation63_spill] sm:$0xff] %v5956_v13  ;;  %4500 = vmatmul.mubr.msk.f32.gmra.mrb[114].mxu0 %vm1374_vm0, %v539_v41  ;;  %v5961_v4 = vpop.f32.mrb[9].mxu0  ;;  %v680_v41 = vld [vmem:[%s7374_s2 + $0x1f0] sm:$0xff]  ;;  %v5985_v2 = vpop.permute.xlu0 %1181 }
 0x126   : > { %7529 = vst [vmem:[#allocation65_spill] sm:$0xff] %v5961_v4  ;;  %1366 = vperm.xlu1 %4772, %v742_v47   ;;  %1361 = vperm.xlu0 %4771, %v741_v51   ;;  %v541_v51 = vld [vmem:[%s7470_s1 + $0x1d8] sm:$0xff]  ;;  %7534 = vst [vmem:[#allocation69_spill] sm:$0xff] %v5985_v2  ;;  %v542_v2 = vld [vmem:[%s7470_s1 + $0x1e0] sm:$0xff] }
 0x127   : > { %2165 = vmatprep.mubr.f32.mxu0 %v7531_v21  ;;  %v5998_v14 = vpop.permute.xlu1 %1186 }
 0x128   : > { %v5975_v62 = vpop.f32.mrb[10].mxu0  ;;  %7536 = vst [vmem:[#allocation71_spill] sm:$0xff] %v5998_v14 }
 0x129   : > { %7532 = vst [vmem:[#allocation67_spill] sm:$0xff] %v5975_v62  ;;  %4501 = vmatmul.mubr.msk.f32.gmra.mrb[116].mxu0 %vm1374_vm0, %v540_v8  ;;  %v5978_v47 = vpop.f32.mrb[11].mxu0  ;;  %v2916_v8 = vld [vmem:[%s7376_s4] sm:$0xff]  ;;  %v6021_v43 = vpop.permute.xlu0 %876 }
 0x12a   : > { %7533 = vst [vmem:[#allocation68_spill] sm:$0xff] %v5978_v47  ;;  %1371 = vperm.xlu1 %4772, %v743_v46   ;;  %1056 = vperm.xlu0 %4771, %v680_v41   ;;  %v5994_v46 = vpop.f32.mrb[1].mxu1  ;;  %7539 = vst [vmem:[#allocation74_spill] sm:$0xff] %v6021_v43  ;;  %v2921_v43 = vld [vmem:[%s7376_s4 + $0x28] sm:$0xff] }
 0x12b   : > { %2171 = vmatprep.mubr.f32.mxu0 %v7531_v21  ;;  %v6006_v3 = vpop.f32.mrb[2].mxu1  ;;  %v6031_v12 = vpop.permute.xlu1 %881 }
 0x12c   : > { %v5996_v41 = vpop.f32.mrb[12].mxu0  ;;  %v6015_v14 = vpop.f32.mrb[3].mxu1  ;;  %7541 = vst [vmem:[#allocation76_spill] sm:$0xff] %v6031_v12  ;;  %v544_v12 = vld [vmem:[%s7470_s1 + $0x1f0] sm:$0xff] }
 0x12d   : > { %7535 = vst [vmem:[#allocation70_spill] sm:$0xff] %v5996_v41  ;;  %4502 = vmatmul.mubr.msk.f32.gmra.mrb[118].mxu0 %vm1374_vm0, %v541_v51  ;;  %v6001_v57 = vpop.f32.mrb[13].mxu0  ;;  %v2918_v51 = vld [vmem:[%s7376_s4 + $0x10] sm:$0xff]  ;;  %v6054_v53 = vpop.permute.xlu0 %1191 }
 0x12e   : > { %7537 = vst [vmem:[#allocation72_spill] sm:$0xff] %v6001_v57  ;;  %2936 = vperm.xlu1 %4772, %v2917_v33   ;;  %2931 = vperm.xlu0 %4771, %v2916_v8   ;;  %v6019_v8 = vpop.f32.mrb[4].mxu1  ;;  %7544 = vst [vmem:[#allocation79_spill] sm:$0xff] %v6054_v53 }
 0x12f   : > { %2177 = vmatprep.mubr.f32.mxu0 %v7531_v21  ;;  %v6029_v20 = vpop.f32.mrb[5].mxu1  ;;  %v6069_v38 = vpop.permute.xlu1 %1196 }
 0x130   : > { %v6017_v33 = vpop.f32.mrb[14].mxu0  ;;  %7546 = vst [vmem:[#allocation81_spill] sm:$0xff] %v6069_v38 }
 0x131   : > { %7538 = vst [vmem:[#allocation73_spill] sm:$0xff] %v6017_v33  ;;  %4503 = vmatmul.mubr.msk.f32.gmra.mrb[120].mxu0 %vm1374_vm0, %v542_v2  ;;  %v6024_v26 = vpop.f32.mrb[15].mxu0  ;;  %v2920_v2 = vld [vmem:[%s7376_s4 + $0x20] sm:$0xff]  ;;  %v6092_v25 = vpop.permute.xlu0 %886 }
 0x132   : > { %7540 = vst [vmem:[#allocation75_spill] sm:$0xff] %v6024_v26  ;;  %2946 = vperm.xlu1 %4772, %v2919_v52   ;;  %2941 = vperm.xlu0 %4771, %v2918_v51   ;;  %v6040_v52 = vpop.f32.mrb[6].mxu1  ;;  %7549 = vst [vmem:[#allocation84_spill] sm:$0xff] %v6092_v25 }
 0x133   : > { %2183 = vmatprep.mubr.f32.mxu0 %v7531_v21  ;;  %v6044_v63 = vpop.f32.mrb[7].mxu1  ;;  %v6100_v18 = vpop.permute.xlu1 %891 }
 0x134   : > { %v6042_v51 = vpop.f32.mrb[16].mxu0  ;;  %v6052_v61 = vpop.f32.mrb[8].mxu1  ;;  %7551 = vst [vmem:[#allocation86_spill] sm:$0xff] %v6100_v18  ;;  %v547_v18 = vld [vmem:[%s7470_s1 + $0x208] sm:$0xff] }
 0x135   : > { %7542 = vst [vmem:[#allocation77_spill] sm:$0xff] %v6042_v51  ;;  %4504 = vmatmul.mubr.msk.f32.gmra.mrb[122].mxu0 %vm1374_vm0, %v543_v36  ;;  %v6047_v7 = vpop.f32.mrb[17].mxu0  ;;  %v2922_v36 = vld [vmem:[%s7376_s4 + $0x30] sm:$0xff]  ;;  %v6121_v11 = vpop.permute.xlu0 %1201 }
 0x136   : > { %7543 = vst [vmem:[#allocation78_spill] sm:$0xff] %v6047_v7  ;;  %2956 = vperm.xlu1 %4772, %v2921_v43   ;;  %2951 = vperm.xlu0 %4771, %v2920_v2   ;;  %v6063_v43 = vpop.f32.mrb[9].mxu1  ;;  %7554 = vst [vmem:[#allocation89_spill] sm:$0xff] %v6121_v11 }
 0x137   : > { %2189 = vmatprep.mubr.f32.mxu0 %v7531_v21  ;;  %v6067_v48 = vpop.f32.mrb[10].mxu1 }
 0x138   : > { %v6065_v2 = vpop.f32.mrb[18].mxu0  ;;  %v6077_v22 = vpop.f32.mrb[11].mxu1 }
 0x139   : > { %7545 = vst [vmem:[#allocation80_spill] sm:$0xff] %v6065_v2  ;;  %4505 = vmatmul.mubr.msk.f32.gmra.mrb[124].mxu0 %vm1374_vm0, %v544_v12  ;;  %v6072_v53 = vpop.f32.mrb[19].mxu0  ;;  %v2924_v12 = vld [vmem:[%s7376_s4 + $0x40] sm:$0xff]  ;;  %v6086_v38 = vpop.f32.mrb[12].mxu1 }
 0x13a   : > { %7547 = vst [vmem:[#allocation82_spill] sm:$0xff] %v6072_v53  ;;  %2966 = vperm.xlu1 %4772, %v2923_v42   ;;  %2961 = vperm.xlu0 %4771, %v2922_v36   ;;  %v6090_v36 = vpop.f32.mrb[13].mxu1 }
 0x13b   : > { %2195 = vmatprep.mubr.f32.mxu0 %v7531_v21  ;;  %v6109_v25 = vpop.f32.mrb[14].mxu1 }
 0x13c   : > { %v6088_v42 = vpop.f32.mrb[20].mxu0 }
 0x13d   : > { %7548 = vst [vmem:[#allocation83_spill] sm:$0xff] %v6088_v42  ;;  %4506 = vmatmul.mubr.msk.f32.gmra.mrb[126].mxu0 %vm1374_vm0, %v545_v31  ;;  %v6095_v17 = vpop.f32.mrb[21].mxu0  ;;  %v2927_v42 = vld [vmem:[%s7376_s4 + $0x58] sm:$0xff]  ;;  %v2926_v31 = vld [vmem:[%s7376_s4 + $0x50] sm:$0xff] }
 0x13e   : > { %7550 = vst [vmem:[#allocation85_spill] sm:$0xff] %v6095_v17  ;;  %2976 = vperm.xlu1 %4772, %v2925_v32   ;;  %2971 = vperm.xlu0 %4771, %v2924_v12   ;;  %v6113_v12 = vpop.f32.mrb[15].mxu1 }
 0x13f   : > { %2201 = vmatprep.mubr.f32.mxu0 %v7531_v21  ;;  %v6130_v53 = vpop.f32.mrb[16].mxu1 }
 0x140   : > { %v6111_v32 = vpop.f32.mrb[22].mxu0 }
 0x141   : > { %7552 = vst [vmem:[#allocation87_spill] sm:$0xff] %v6111_v32  ;;  %4507 = vmatmul.mubr.msk.f32.gmra.mrb[128].mxu0 %vm1374_vm0, %v546_v10  ;;  %v6116_v17 = vpop.f32.mrb[23].mxu0  ;;  %v3405_v32 = vld [vmem:[%s7378_s6] sm:$0xff] }
 0x142   : > { %7553 = vst [vmem:[#allocation88_spill] sm:$0xff] %v6116_v17  ;;  %2986 = vperm.xlu1 %4772, %v2927_v42   ;;  %2981 = vperm.xlu0 %4771, %v2926_v31   ;;  %v2928_v10 = vld [vmem:[%s7376_s4 + $0x60] sm:$0xf]  ;;  %v6134_v31 = vpop.f32.mrb[17].mxu1  ;;  %v6136_v17 = vpop.permute.xlu1 %1206 }
 0x143   : > { %2207 = vmatprep.mubr.f32.mxu0 %v7531_v21  ;;  %7556 = vst [vmem:[#allocation91_spill] sm:$0xff] %v6136_v17  ;;  %v3406_v17 = vld [vmem:[%s7378_s6 + $0x8] sm:$0xff]  ;;  %v6151_v2 = vpop.f32.mrb[18].mxu1 }
 0x144   : > { %v6132_v42 = vpop.f32.mrb[24].mxu0 }
 0x145   : > { %7555 = vst [vmem:[#allocation90_spill] sm:$0xff] %v6132_v42  ;;  %4508 = vmatmul.mubr.msk.f32.gmra.mrb[130].mxu0 %vm1374_vm0, %v547_v18  ;;  %v6139_v11 = vpop.f32.mrb[25].mxu0  ;;  %v3407_v42 = vld [vmem:[%s7378_s6 + $0x10] sm:$0xff] }
 0x146   : > { %7557 = vst [vmem:[#allocation92_spill] sm:$0xff] %v6139_v11  ;;  %3420 = vperm.xlu1 %4772, %v3405_v32   ;;  %2991 = vperm.xlu0 %4771, %v2928_v10   ;;  %v6155_v32 = vpop.f32.mrb[19].mxu1  ;;  %v6157_v10 = vpop.permute.xlu0 %896 }
 0x147   : > { %2213 = vmatprep.mubr.f32.mxu0 %v7531_v21  ;;  %7559 = vst [vmem:[#allocation94_spill] sm:$0xff] %v6157_v10  ;;  %v6165_v7 = vpop.permute.xlu1 %901  ;;  %v6174_v10 = vpop.f32.mrb[20].mxu1 }
 0x148   : > { %v6153_v18 = vpop.f32.mrb[26].mxu0  ;;  %7561 = vst [vmem:[#allocation96_spill] sm:$0xff] %v6165_v7  ;;  %v550_v7 = vld [vmem:[%s7470_s1 + $0x220] sm:$0xff] }
 0x149   : > { %7558 = vst [vmem:[#allocation93_spill] sm:$0xff] %v6153_v18  ;;  %4509 = vmatmul.mubr.msk.f32.gmra.mrb[132].mxu0 %vm1374_vm0, %v548_v5  ;;  %v6160_v11 = vpop.f32.mrb[27].mxu0  ;;  %v3409_v18 = vld [vmem:[%s7378_s6 + $0x20] sm:$0xff]  ;;  %v3408_v5 = vld [vmem:[%s7378_s6 + $0x18] sm:$0xff] }
 0x14a   : > { %7560 = vst [vmem:[#allocation95_spill] sm:$0xff] %v6160_v11  ;;  %3430 = vperm.xlu1 %4772, %v3407_v42   ;;  %3425 = vperm.xlu0 %4771, %v3406_v17   ;;  %v6178_v17 = vpop.f32.mrb[21].mxu1  ;;  %v6186_v6 = vpop.permute.xlu0 %1211 }
 0x14b   : > { %2219 = vmatprep.mubr.f32.mxu0 %v7531_v21  ;;  %7564 = vst [vmem:[#allocation99_spill] sm:$0xff] %v6186_v6  ;;  %v6195_v51 = vpop.f32.mrb[22].mxu1 }
 0x14c   : > { %v6176_v42 = vpop.f32.mrb[28].mxu0 }
 0x14d   : > { %7562 = vst [vmem:[#allocation97_spill] sm:$0xff] %v6176_v42  ;;  %4510 = vmatmul.mubr.msk.f32.gmra.mrb[134].mxu0 %vm1374_vm0, %v549_v0  ;;  %v6181_v11 = vpop.f32.mrb[29].mxu0  ;;  %v3411_v42 = vld [vmem:[%s7378_s6 + $0x30] sm:$0xff]  ;;  %v3410_v0 = vld [vmem:[%s7378_s6 + $0x28] sm:$0xff] }
 0x14e   : > { %7563 = vst [vmem:[#allocation98_spill] sm:$0xff] %v6181_v11  ;;  %3440 = vperm.xlu1 %4772, %v3409_v18   ;;  %3435 = vperm.xlu0 %4771, %v3408_v5   ;;  %v6199_v5 = vpop.f32.mrb[23].mxu1  ;;  %v6201_v11 = vpop.permute.xlu1 %1216 }
 0x14f   : > { %2225 = vmatprep.mubr.f32.mxu0 %v7531_v21  ;;  %7566 = vst [vmem:[#allocation101_spill] sm:$0xff] %v6201_v11  ;;  %v3412_v11 = vld [vmem:[%s7378_s6 + $0x38] sm:$0xff]  ;;  %v6216_v26 = vpop.f32.mrb[24].mxu1 }
 0x150   : > { %v6197_v18 = vpop.f32.mrb[30].mxu0 }
 0x151   : > { %7565 = vst [vmem:[#allocation100_spill] sm:$0xff] %v6197_v18  ;;  %4511 = vmatmul.mubr.msk.f32.gmra.mrb[136].mxu0 %vm1374_vm0, %v550_v7  ;;  %v6204_v6 = vpop.f32.mrb[31].mxu0  ;;  %v3413_v18 = vld [vmem:[%s7378_s6 + $0x40] sm:$0xff] }
 0x152   : > { %7567 = vst [vmem:[#allocation102_spill] sm:$0xff] %v6204_v6  ;;  %3450 = vperm.xlu1 %4772, %v3411_v42   ;;  %3445 = vperm.xlu0 %4771, %v3410_v0   ;;  %v6220_v42 = vpop.f32.mrb[25].mxu1  ;;  %v6222_v0 = vpop.permute.xlu0 %906 }
 0x153   : > { %2231 = vmatprep.mubr.f32.mxu0 %v7531_v21  ;;  %7569 = vst [vmem:[#allocation104_spill] sm:$0xff] %v6222_v0  ;;  %v6230_v33 = vpop.permute.xlu1 %911  ;;  %v6239_v0 = vpop.f32.mrb[26].mxu1 }
 0x154   : > { %v6218_v7 = vpop.f32.mrb[32].mxu0  ;;  %7571 = vst [vmem:[#allocation106_spill] sm:$0xff] %v6230_v33  ;;  %v553_v33 = vld [vmem:[%s7470_s1 + $0x238] sm:$0xff] }
 0x155   : > { %7568 = vst [vmem:[#allocation103_spill] sm:$0xff] %v6218_v7  ;;  %4512 = vmatmul.mubr.msk.f32.gmra.mrb[138].mxu0 %vm1374_vm0, %v551_v1  ;;  %v6225_v6 = vpop.f32.mrb[33].mxu0  ;;  %v3415_v7 = vld [vmem:[%s7378_s6 + $0x50] sm:$0xff]  ;;  %v3414_v1 = vld [vmem:[%s7378_s6 + $0x48] sm:$0xff] }
 0x156   : > { %7570 = vst [vmem:[#allocation105_spill] sm:$0xff] %v6225_v6  ;;  %3460 = vperm.xlu1 %4772, %v3413_v18   ;;  %3455 = vperm.xlu0 %4771, %v3412_v11   ;;  %v6243_v11 = vpop.f32.mrb[27].mxu1  ;;  %v6251_v54 = vpop.permute.xlu0 %1221 }
 0x157   : > { %2237 = vmatprep.mubr.f32.mxu0 %v7531_v21  ;;  %7574 = vst [vmem:[#allocation109_spill] sm:$0xff] %v6251_v54  ;;  %v6260_v57 = vpop.f32.mrb[28].mxu1 }
 0x158   : > { %v6241_v18 = vpop.f32.mrb[34].mxu0 }
 0x159   : > { %7572 = vst [vmem:[#allocation107_spill] sm:$0xff] %v6241_v18  ;;  %4513 = vmatmul.mubr.msk.f32.gmra.mrb[140].mxu0 %vm1374_vm0, %v552_v59  ;;  %v6246_v6 = vpop.f32.mrb[35].mxu0  ;;  %v3417_v18 = vld [vmem:[%s7378_s6 + $0x60] sm:$0xf]  ;;  %v3416_v59 = vld [vmem:[%s7378_s6 + $0x58] sm:$0xff] }
 0x15a   : > { %7573 = vst [vmem:[#allocation108_spill] sm:$0xff] %v6246_v6  ;;  %3470 = vperm.xlu1 %4772, %v3415_v7   ;;  %3465 = vperm.xlu0 %4771, %v3414_v1   ;;  %v6264_v1 = vpop.f32.mrb[29].mxu1  ;;  %v6266_v6 = vpop.permute.xlu1 %1226 }
 0x15b   : > { %2243 = vmatprep.mubr.f32.mxu0 %v7531_v21  ;;  %7576 = vst [vmem:[#allocation111_spill] sm:$0xff] %v6266_v6  ;;  %v3699_v6 = vld [vmem:[%s7380_s8] sm:$0xff]  ;;  %v6281_v41 = vpop.f32.mrb[30].mxu1 }
 0x15c   : > { %v6262_v7 = vpop.f32.mrb[36].mxu0 }
 0x15d   : > { %7575 = vst [vmem:[#allocation110_spill] sm:$0xff] %v6262_v7  ;;  %4514 = vmatmul.mubr.msk.f32.gmra.mrb[142].mxu0 %vm1374_vm0, %v553_v33  ;;  %v6269_v54 = vpop.f32.mrb[37].mxu0  ;;  %v3700_v7 = vld [vmem:[%s7380_s8 + $0x8] sm:$0xff] }
 0x15e   : > { %7577 = vst [vmem:[#allocation112_spill] sm:$0xff] %v6269_v54  ;;  %3480 = vperm.xlu1 %4772, %v3417_v18   ;;  %3475 = vperm.xlu0 %4771, %v3416_v59   ;;  %v6285_v18 = vpop.f32.mrb[31].mxu1  ;;  %v6287_v59 = vpop.permute.xlu0 %916 }
 0x15f   : > { %2249 = vmatprep.mubr.f32.mxu0 %v7531_v21  ;;  %7579 = vst [vmem:[#allocation114_spill] sm:$0xff] %v6287_v59  ;;  %v6295_v47 = vpop.permute.xlu1 %921  ;;  %v6304_v59 = vpop.f32.mrb[32].mxu1 }
 0x160   : > { %v6283_v33 = vpop.f32.mrb[38].mxu0  ;;  %7581 = vst [vmem:[#allocation116_spill] sm:$0xff] %v6295_v47  ;;  %v556_v47 = vld [vmem:[%s7470_s1 + $0x250] sm:$0xff] }
 0x161   : > { %7578 = vst [vmem:[#allocation113_spill] sm:$0xff] %v6283_v33  ;;  %4515 = vmatmul.mubr.msk.f32.gmra.mrb[144].mxu0 %vm1374_vm0, %v554_v60  ;;  %v6290_v54 = vpop.f32.mrb[39].mxu0  ;;  %v3702_v33 = vld [vmem:[%s7380_s8 + $0x18] sm:$0xff]  ;;  %v3701_v60 = vld [vmem:[%s7380_s8 + $0x10] sm:$0xff] }
 0x162   : > { %7580 = vst [vmem:[#allocation115_spill] sm:$0xff] %v6290_v54  ;;  %3719 = vperm.xlu1 %4772, %v3700_v7   ;;  %3714 = vperm.xlu0 %4771, %v3699_v6   ;;  %v6308_v6 = vpop.f32.mrb[33].mxu1  ;;  %v6316_v49 = vpop.permute.xlu0 %1231 }
 0x163   : > { %2255 = vmatprep.mubr.f32.mxu0 %v7531_v21  ;;  %7583 = vst [vmem:[#allocation118_spill] sm:$0xff] %v6308_v6  ;;  %7585 = vst [vmem:[#allocation120_spill] sm:$0xff] %v6316_v49  ;;  %v6325_v62 = vpop.f32.mrb[34].mxu1 }
 0x164   : > { %v6306_v7 = vpop.f32.mrb[40].mxu0  ;;  %7586 = vst [vmem:[#allocation121_spill] sm:$0xff] %v6325_v62 }
 0x165   : > { %7582 = vst [vmem:[#allocation117_spill] sm:$0xff] %v6306_v7  ;;  %4516 = vmatmul.mubr.msk.f32.gmra.mrb[146].mxu0 %vm1374_vm0, %v555_v55  ;;  %v6311_v54 = vpop.f32.mrb[41].mxu0  ;;  %v3704_v7 = vld [vmem:[%s7380_s8 + $0x28] sm:$0xff]  ;;  %v3703_v55 = vld [vmem:[%s7380_s8 + $0x20] sm:$0xff] }
 0x166   : > { %7584 = vst [vmem:[#allocation119_spill] sm:$0xff] %v6311_v54  ;;  %3729 = vperm.xlu1 %4772, %v3702_v33   ;;  %3724 = vperm.xlu0 %4771, %v3701_v60   ;;  %v6329_v60 = vpop.f32.mrb[35].mxu1  ;;  %v6331_v54 = vpop.permute.xlu1 %1236 }
 0x167   : > { %2261 = vmatprep.mubr.f32.mxu0 %v7531_v21  ;;  %7588 = vst [vmem:[#allocation123_spill] sm:$0xff] %v6329_v60  ;;  %7589 = vst [vmem:[#allocation124_spill] sm:$0xff] %v6331_v54  ;;  %v3705_v54 = vld [vmem:[%s7380_s8 + $0x30] sm:$0xff]  ;;  %v6346_v4 = vpop.f32.mrb[36].mxu1 }
 0x168   : > { %v6327_v33 = vpop.f32.mrb[42].mxu0  ;;  %7591 = vst [vmem:[#allocation126_spill] sm:$0xff] %v6346_v4 }
 0x169   : > { %7587 = vst [vmem:[#allocation122_spill] sm:$0xff] %v6327_v33  ;;  %4517 = vmatmul.mubr.msk.f32.gmra.mrb[148].mxu0 %vm1374_vm0, %v556_v47  ;;  %v6334_v49 = vpop.f32.mrb[43].mxu0  ;;  %v3706_v33 = vld [vmem:[%s7380_s8 + $0x38] sm:$0xff] }
 0x16a   : > { %7590 = vst [vmem:[#allocation125_spill] sm:$0xff] %v6334_v49  ;;  %3739 = vperm.xlu1 %4772, %v3704_v7   ;;  %3734 = vperm.xlu0 %4771, %v3703_v55   ;;  %v6350_v7 = vpop.f32.mrb[37].mxu1  ;;  %v6352_v55 = vpop.permute.xlu0 %926 }
 0x16b   : > { %2267 = vmatprep.mubr.f32.mxu0 %v7531_v21  ;;  %7593 = vst [vmem:[#allocation128_spill] sm:$0xff] %v6350_v7  ;;  %7594 = vst [vmem:[#allocation129_spill] sm:$0xff] %v6352_v55  ;;  %v6360_v13 = vpop.permute.xlu1 %931  ;;  %v6369_v55 = vpop.f32.mrb[38].mxu1  ;;  %v573_v7 = vld [vmem:[%s7470_s1 + $0x2d8] sm:$0xff] }
 0x16c   : > { %v6348_v47 = vpop.f32.mrb[44].mxu0  ;;  %7596 = vst [vmem:[#allocation131_spill] sm:$0xff] %v6369_v55 }
 0x16d   : > { %7592 = vst [vmem:[#allocation127_spill] sm:$0xff] %v6348_v47  ;;  %4518 = vmatmul.mubr.msk.f32.gmra.mrb[150].mxu0 %vm1374_vm0, %v557_v44  ;;  %v6355_v49 = vpop.f32.mrb[45].mxu0  ;;  %v3708_v47 = vld [vmem:[%s7380_s8 + $0x48] sm:$0xff]  ;;  %v3707_v44 = vld [vmem:[%s7380_s8 + $0x40] sm:$0xff] }
 0x16e   : > { %7595 = vst [vmem:[#allocation130_spill] sm:$0xff] %v6355_v49  ;;  %3749 = vperm.xlu1 %4772, %v3706_v33   ;;  %3744 = vperm.xlu0 %4771, %v3705_v54   ;;  %v6373_v54 = vpop.f32.mrb[39].mxu1  ;;  %v6381_v27 = vpop.permute.xlu0 %1241 }
 0x16f   : > { %2273 = vmatprep.mubr.f32.mxu0 %v7531_v21  ;;  %7598 = vst [vmem:[#allocation133_spill] sm:$0xff] %v6373_v54  ;;  %7600 = vst [vmem:[#allocation135_spill] sm:$0xff] %v6381_v27  ;;  %v6390_v39 = vpop.f32.mrb[40].mxu1 }
 0x170   : > { %v6371_v33 = vpop.f32.mrb[46].mxu0  ;;  %7601 = vst [vmem:[#allocation136_spill] sm:$0xff] %v6390_v39 }
 0x171   : > { %7597 = vst [vmem:[#allocation132_spill] sm:$0xff] %v6371_v33  ;;  %4519 = vmatmul.mubr.msk.f32.gmra.mrb[152].mxu0 %vm1374_vm0, %v558_v50  ;;  %v6376_v49 = vpop.f32.mrb[47].mxu0  ;;  %v3710_v33 = vld [vmem:[%s7380_s8 + $0x58] sm:$0xff]  ;;  %v3709_v50 = vld [vmem:[%s7380_s8 + $0x50] sm:$0xff] }
 0x172   : > { %7599 = vst [vmem:[#allocation134_spill] sm:$0xff] %v6376_v49  ;;  %3759 = vperm.xlu1 %4772, %v3708_v47   ;;  %3754 = vperm.xlu0 %4771, %v3707_v44   ;;  %v6394_v44 = vpop.f32.mrb[41].mxu1  ;;  %v6396_v49 = vpop.permute.xlu1 %1246 }
 0x173   : > { %2279 = vmatprep.mubr.f32.mxu0 %v7531_v21  ;;  %7603 = vst [vmem:[#allocation138_spill] sm:$0xff] %v6394_v44  ;;  %v6411_v58 = vpop.f32.mrb[42].mxu1 }
 0x174   : > { %v6392_v47 = vpop.f32.mrb[48].mxu0  ;;  %7605 = vst [vmem:[#allocation140_spill] sm:$0xff] %v6411_v58 }
 0x175   : > { %7602 = vst [vmem:[#allocation137_spill] sm:$0xff] %v6392_v47  ;;  %4520 = vmatmul.mubr.msk.f32.gmra.mrb[154].mxu0 %vm1374_vm0, %v559_v45  ;;  %v6399_v27 = vpop.f32.mrb[49].mxu0  ;;  %v3991_v47 = vld [vmem:[%s7382_s10] sm:$0xff] }
 0x176   : > { %7604 = vst [vmem:[#allocation139_spill] sm:$0xff] %v6399_v27  ;;  %3769 = vperm.xlu1 %4772, %v3710_v33   ;;  %3764 = vperm.xlu0 %4771, %v3709_v50   ;;  %v6415_v33 = vpop.f32.mrb[43].mxu1  ;;  %v6417_v50 = vpop.permute.xlu0 %936 }
 0x177   : > { %2285 = vmatprep.mubr.f32.mxu0 %v7531_v21  ;;  %7607 = vst [vmem:[#allocation142_spill] sm:$0xff] %v6415_v33  ;;  %v6425_v56 = vpop.permute.xlu1 %941  ;;  %v6434_v35 = vpop.f32.mrb[44].mxu1 }
 0x178   : > { %v6413_v45 = vpop.f32.mrb[50].mxu0  ;;  %7609 = vst [vmem:[#allocation144_spill] sm:$0xff] %v6434_v35  ;;  %v4271_v35 = vld [vmem:[#allocation2] sm:$0x1] }
 0x179   : > { %7606 = vst [vmem:[#allocation141_spill] sm:$0xff] %v6413_v45  ;;  %4521 = vmatmul.mubr.msk.f32.gmra.mrb[156].mxu0 %vm1374_vm0, %v560_v19  ;;  %v6420_v27 = vpop.f32.mrb[51].mxu0  ;;  %v3993_v45 = vld [vmem:[%s7382_s10 + $0x10] sm:$0xff]  ;;  %v3992_v19 = vld [vmem:[%s7382_s10 + $0x8] sm:$0xff] }
 0x17a   : > { %7608 = vst [vmem:[#allocation143_spill] sm:$0xff] %v6420_v27  ;;  %4006 = vperm.xlu1 %4772, %v3991_v47   ;;  %3774 = vperm.xlu0 %4771, %v3711_v34   ;;  %v6438_v34 = vpop.f32.mrb[45].mxu1  ;;  %v6446_v29 = vpop.permute.xlu0 %1251 }
 0x17b   : > { %2291 = vmatprep.mubr.f32.mxu0 %v7531_v21  ;;  %7611 = vst [vmem:[#allocation146_spill] sm:$0xff] %v6438_v34  ;;  %v6455_v28 = vpop.f32.mrb[46].mxu1 }
 0x17c   : > { %v6436_v47 = vpop.f32.mrb[52].mxu0  ;;  %7613 = vst [vmem:[#allocation148_spill] sm:$0xff] %v6455_v28 }
 0x17d   : > { %7610 = vst [vmem:[#allocation145_spill] sm:$0xff] %v6436_v47  ;;  %4522 = vmatmul.mubr.msk.f32.gmra.mrb[158].mxu0 %vm1374_vm0, %v561_v40  ;;  %v6441_v27 = vpop.f32.mrb[53].mxu0  ;;  %v3995_v47 = vld [vmem:[%s7382_s10 + $0x20] sm:$0xff]  ;;  %v3994_v40 = vld [vmem:[%s7382_s10 + $0x18] sm:$0xff] }
 0x17e   : > { %7612 = vst [vmem:[#allocation147_spill] sm:$0xff] %v6441_v27  ;;  %4016 = vperm.xlu1 %4772, %v3993_v45   ;;  %4011 = vperm.xlu0 %4771, %v3992_v19   ;;  %v6459_v19 = vpop.f32.mrb[47].mxu1  ;;  %v6461_v27 = vpop.permute.xlu1 %1256 }
 0x17f   : > { %2297 = vmatprep.mubr.f32.mxu0 %v7531_v21  ;;  %7615 = vst [vmem:[#allocation150_spill] sm:$0xff] %v6459_v19  ;;  %v6476_v9 = vpop.f32.mrb[48].mxu1 }
 0x180   : > { %v6457_v45 = vpop.f32.mrb[54].mxu0  ;;  %7617 = vst [vmem:[#allocation152_spill] sm:$0xff] %v6476_v9  ;;  %v565_v9 = vld [vmem:[%s7470_s1 + $0x298] sm:$0xff] }
 0x181   : > { %7614 = vst [vmem:[#allocation149_spill] sm:$0xff] %v6457_v45  ;;  %4523 = vmatmul.mubr.msk.f32.gmra.mrb[160].mxu0 %vm1374_vm0, %v562_v37  ;;  %v6464_v30 = vpop.f32.mrb[55].mxu0  ;;  %v3997_v45 = vld [vmem:[%s7382_s10 + $0x30] sm:$0xff] }
 0x182   : > { %7616 = vst [vmem:[#allocation151_spill] sm:$0xff] %v6464_v30  ;;  %4026 = vperm.xlu1 %4772, %v3995_v47   ;;  %4021 = vperm.xlu0 %4771, %v3994_v40   ;;  %v6480_v47 = vpop.f32.mrb[49].mxu1  ;;  %v6482_v40 = vpop.permute.xlu0 %946 }
 0x183   : > { %2303 = vmatprep.mubr.f32.mxu0 %v7531_v21  ;;  %7619 = vst [vmem:[#allocation154_spill] sm:$0xff] %v6480_v47  ;;  %v6490_v19 = vpop.permute.xlu1 %951  ;;  %v6499_v47 = vpop.f32.mrb[50].mxu1 }
 0x184   : > { %v6478_v37 = vpop.f32.mrb[56].mxu0  ;;  %7621 = vst [vmem:[#allocation156_spill] sm:$0xff] %v6499_v47  ;;  %v4003_v47 = vld [vmem:[%s7382_s10 + $0x60] sm:$0xf] }
 0x185   : > { %7618 = vst [vmem:[#allocation153_spill] sm:$0xff] %v6478_v37  ;;  %4524 = vmatmul.mubr.msk.f32.gmra.mrb[162].mxu0 %vm1374_vm0, %v563_v15  ;;  %v6485_v30 = vpop.f32.mrb[57].mxu0  ;;  %v3999_v37 = vld [vmem:[%s7382_s10 + $0x40] sm:$0xff]  ;;  %v3998_v15 = vld [vmem:[%s7382_s10 + $0x38] sm:$0xff] }
 0x186   : > { %7620 = vst [vmem:[#allocation155_spill] sm:$0xff] %v6485_v30  ;;  %4036 = vperm.xlu1 %4772, %v3997_v45   ;;  %4031 = vperm.xlu0 %4771, %v3996_v23   ;;  %v6503_v23 = vpop.f32.mrb[51].mxu1  ;;  %v6511_v28 = vpop.permute.xlu0 %1261 }
 0x187   : > { %2309 = vmatprep.mubr.f32.mxu0 %v7531_v21  ;;  %7623 = vst [vmem:[#allocation158_spill] sm:$0xff] %v6503_v23 }
 0x188   : > { %v6501_v45 = vpop.f32.mrb[58].mxu0 }
 0x189   : > { %7622 = vst [vmem:[#allocation157_spill] sm:$0xff] %v6501_v45  ;;  %4525 = vmatmul.mubr.msk.f32.gmra.mrb[164].mxu0 %vm1374_vm0, %v564_v24  ;;  %v6506_v30 = vpop.f32.mrb[59].mxu0  ;;  %v4001_v45 = vld [vmem:[%s7382_s10 + $0x50] sm:$0xff]  ;;  %v4000_v24 = vld [vmem:[%s7382_s10 + $0x48] sm:$0xff] }
 0x18a   : > { %7624 = vst [vmem:[#allocation159_spill] sm:$0xff] %v6506_v30  ;;  %4046 = vperm.xlu1 %4772, %v3999_v37   ;;  %4041 = vperm.xlu0 %4771, %v3998_v15   ;;  %v6522_v37 = vpop.permute.xlu1 %1266  ;;  %v566_v30 = vld [vmem:[%s7470_s1 + $0x2a0] sm:$0xff] }
 0x18b   : > { %2315 = vmatprep.mubr.f32.mxu0 %v7531_v21 }
 0x18c   : > { %v6520_v23 = vpop.f32.mrb[60].mxu0 }
 0x18d   : > { %7625 = vst [vmem:[#allocation160_spill] sm:$0xff] %v6520_v23  ;;  %4526 = vmatmul.mubr.msk.f32.gmra.mrb[166].mxu0 %vm1374_vm0, %v565_v9  ;;  %v6525_v15 = vpop.f32.mrb[61].mxu0  ;;  %v4002_v23 = vld [vmem:[%s7382_s10 + $0x58] sm:$0xff]  ;;  %v6539_v9 = vpop.permute.xlu0 %956 }
 0x18e   : > { %7626 = vst [vmem:[#allocation161_spill] sm:$0xff] %v6525_v15  ;;  %4056 = vperm.xlu1 %4772, %v4001_v45   ;;  %4051 = vperm.xlu0 %4771, %v4000_v24   ;;  %v567_v24 = vld [vmem:[%s7470_s1 + $0x2a8] sm:$0xff]  ;;  %v6547_v15 = vpop.permute.xlu1 %961 }
 0x18f   : > { %2321 = vmatprep.mubr.f32.mxu0 %v7531_v21 }
 0x190   : > { %v6537_v34 = vpop.f32.mrb[62].mxu0 }
 0x191   : > { %7627 = vst [vmem:[#allocation162_spill] sm:$0xff] %v6537_v34  ;;  %4527 = vmatmul.mubr.msk.f32.gmra.mrb[168].mxu0 %vm1374_vm0, %v566_v30  ;;  %v6542_v45 = vpop.f32.mrb[63].mxu0  ;;  %v568_v30 = vld [vmem:[%s7470_s1 + $0x2b0] sm:$0xff] }
 0x192   : > { %7628 = vst [vmem:[#allocation163_spill] sm:$0xff] %v6542_v45  ;;  %4066 = vperm.xlu1 %4772, %v4003_v47   ;;  %4061 = vperm.xlu0 %4771, %v4002_v23   ;;  %v6559_v47 = vpop.permute.xlu0 %1271  ;;  %v6563_v45 = vpop.permute.xlu1 %1276 }
 0x193   : > { %2327 = vmatprep.mubr.f32.mxu0 %v7531_v21 }
 0x194   : > { %v6550_v33 = vpop.f32.mrb[64].mxu0 }
 0x195   : > { %7629 = vst [vmem:[#allocation164_spill] sm:$0xff] %v6550_v33  ;;  %4528 = vmatmul.mubr.msk.f32.gmra.mrb[170].mxu0 %vm1374_vm0, %v567_v24  ;;  %v6553_v34 = vpop.f32.mrb[65].mxu0 }
 0x196   : > { %7630 = vst [vmem:[#allocation165_spill] sm:$0xff] %v6553_v34  ;;  %4274 = vperm.xlu0 %4771, %v4271_v35   ;;  %2333 = vmatprep.mubr.f32.mxu0 %v7531_v21  ;;  %v569_v35 = vld [vmem:[%s7470_s1 + $0x2b8] sm:$0xff]  ;;  %v6574_v34 = vpop.permute.xlu0 %966 }
 0x198   : > { %v6561_v23 = vpop.f32.mrb[66].mxu0 }
 0x199   : > { %7631 = vst [vmem:[#allocation166_spill] sm:$0xff] %v6561_v23  ;;  %4529 = vmatmul.mubr.msk.f32.gmra.mrb[172].mxu0 %vm1374_vm0, %v568_v30  ;;  %v6566_v33 = vpop.f32.mrb[67].mxu0  ;;  %v570_v30 = vld [vmem:[%s7470_s1 + $0x2c0] sm:$0xff] }
 0x19a   : > { %7632 = vst [vmem:[#allocation167_spill] sm:$0xff] %v6566_v33  ;;  %2339 = vmatprep.mubr.f32.mxu0 %v7531_v21  ;;  %v6583_v33 = vpop.permute.xlu1 %971 }
 0x19c   : > { %v6572_v24 = vpop.f32.mrb[68].mxu0 }
 0x19d   : > { %7633 = vst [vmem:[#allocation168_spill] sm:$0xff] %v6572_v24  ;;  %4530 = vmatmul.mubr.msk.f32.gmra.mrb[174].mxu0 %vm1374_vm0, %v569_v35  ;;  %v6577_v58 = vpop.f32.mrb[69].mxu0  ;;  %v571_v35 = vld [vmem:[%s7470_s1 + $0x2c8] sm:$0xff] }
 0x19e   : > { %7634 = vst [vmem:[#allocation169_spill] sm:$0xff] %v6577_v58  ;;  %2345 = vmatprep.mubr.f32.mxu0 %v7531_v21  ;;  %v6594_v58 = vpop.permute.xlu0 %1281  ;;  %v6598_v39 = vpop.permute.xlu1 %1286 }
 0x1a0   : > { %v6585_v23 = vpop.f32.mrb[70].mxu0 }
 0x1a1   : > { %7635 = vst [vmem:[#allocation170_spill] sm:$0xff] %v6585_v23  ;;  %4531 = vmatmul.mubr.msk.f32.gmra.mrb[176].mxu0 %vm1374_vm0, %v570_v30  ;;  %v6588_v44 = vpop.f32.mrb[71].mxu0  ;;  %v572_v30 = vld [vmem:[%s7470_s1 + $0x2d0] sm:$0xff] }
 0x1a2   : > { %7636 = vst [vmem:[#allocation171_spill] sm:$0xff] %v6588_v44  ;;  %2351 = vmatprep.mubr.f32.mxu0 %v7531_v21  ;;  %v2420_v44 = vadd.f32 %v5983_v16, %v6396_v49  ;;  %v6609_v55 = vpop.permute.xlu0 %976  ;;  %v6619_v4 = vpop.permute.xlu1 %981 }
 0x1a4   : > { %v6596_v24 = vpop.f32.mrb[72].mxu0 }
 0x1a5   : > { %7637 = vst [vmem:[#allocation172_spill] sm:$0xff] %v6596_v24  ;;  %4532 = vmatmul.mubr.msk.f32.gmra.mrb[178].mxu0 %vm1374_vm0, %v571_v35  ;;  %v6601_v54 = vpop.f32.mrb[73].mxu0  ;;  %v2422_v35 = vadd.f32 %v5994_v46, %v6396_v49  ;;  %v2428_v46 = vadd.f32 %v6015_v14, %v6446_v29 }
 0x1a6   : > { %7638 = vst [vmem:[#allocation173_spill] sm:$0xff] %v6601_v54  ;;  %2357 = vmatprep.mubr.f32.mxu0 %v7531_v21 }
 0x1a8   : > { %v2041_v23 = vpop.f32.mrb[74].mxu0 }
 0x1a9   : > { %v2042_v24 = vadd.f32 %v2041_v23, %v6360_v13  ;;  %4533 = vmatmul.mubr.msk.f32.gmra.mrb[180].mxu0 %vm1374_vm0, %v572_v30  ;;  %v2043_v54 = vpop.f32.mrb[75].mxu0  ;;  %v2426_v23 = vadd.f32 %v6006_v3, %v6446_v29  ;;  %v2434_v29 = vadd.f32 %v6029_v20, %v6461_v27  ;;  %v2440_v20 = vadd.f32 %v6044_v63, %v6511_v28  ;;  %v576_v63 = vld [vmem:[%s7470_s1 + $0x2f0] sm:$0xff] }
 0x1aa   : > { %2363 = vmatprep.mubr.f32.mxu0 %v7531_v21  ;;  %v2044_v60 = vadd.f32 %v2043_v54, %v6360_v13  ;;  %v574_v13 = vld [vmem:[%s7470_s1 + $0x2e0] sm:$0xff]  ;;  %v6636_v54 = vpop.permute.xlu0 %1291 }
 0x1ab   : > { %v6621_v16 = vmul.f32 %v2420_v44, %v2042_v24  ;;  %v2432_v44 = vadd.f32 %v6019_v8, %v6461_v27  ;;  %v2438_v8 = vadd.f32 %v6040_v52, %v6511_v28 }
 0x1ac   : > { %v2047_v30 = vpop.f32.mrb[76].mxu0  ;;  %v6626_v62 = vmul.f32 %v2422_v35, %v2044_v60 }
 0x1ad   : > { %v2048_v49 = vadd.f32 %v2047_v30, %v6417_v50  ;;  %4534 = vmatmul.mubr.msk.f32.gmra.mrb[182].mxu0 %vm1374_vm0, %v573_v7  ;;  %v2049_v6 = vpop.f32.mrb[77].mxu0  ;;  %v6641_v7 = vpop.permute.xlu1 %1296 }
 0x1ae   : > { %7639 = vst [vmem:[#allocation174_spill] sm:$0xff] %v6626_v62  ;;  %2369 = vmatprep.mubr.f32.mxu0 %v7531_v21  ;;  %v2050_v60 = vadd.f32 %v2049_v6, %v6417_v50  ;;  %v575_v6 = vld [vmem:[%s7470_s1 + $0x2e8] sm:$0xff] }
 0x1af   : > { %v2650_v3 = vmul.f32 %v2426_v23, %v2048_v49  ;;  %v6656_v49 = vpop.permute.xlu0 %986 }
 0x1b0   : > { %v2053_v24 = vpop.f32.mrb[78].mxu0  ;;  %v2651_v35 = vmul.f32 %v2428_v46, %v2050_v60 }
 0x1b1   : > { %v2054_v14 = vadd.f32 %v2053_v24, %v6425_v56  ;;  %4535 = vmatmul.mubr.msk.f32.gmra.mrb[184].mxu0 %vm1374_vm0, %v574_v13  ;;  %v2055_v30 = vpop.f32.mrb[79].mxu0  ;;  %v2776_v46 = vmax.f32 %v2650_v3, 0.0  ;;  %v6666_v28 = vpop.permute.xlu1 %991 }
 0x1b2   : > { %2375 = vmatprep.mubr.f32.mxu0 %v7531_v21  ;;  %v2056_v23 = vadd.f32 %v2055_v30, %v6425_v56  ;;  %v2777_v62 = vmax.f32 %v2651_v35, 0.0  ;;  %v2446_v35 = vadd.f32 %v6063_v43, %v6522_v37 }
 0x1b3   : > { %v2652_v50 = vmul.f32 %v2432_v44, %v2054_v14  ;;  %v2444_v44 = vadd.f32 %v6052_v61, %v6522_v37 }
 0x1b4   : > { %v2059_v27 = vpop.f32.mrb[80].mxu0  ;;  %v2653_v60 = vmul.f32 %v2434_v29, %v2056_v23 }
 0x1b5   : > { %v2778_v13 = vmax.f32 %v2652_v50, 0.0  ;;  %v2060_v24 = vadd.f32 %v2059_v27, %v6482_v40  ;;  %4536 = vmatmul.mubr.msk.f32.gmra.mrb[186].mxu0 %vm1374_vm0, %v575_v6  ;;  %v2061_v52 = vpop.f32.mrb[81].mxu0  ;;  %v6681_v27 = vpop.permute.xlu0 %1301 }
 0x1b6   : > { %2381 = vmatprep.mubr.f32.mxu0 %v7531_v21  ;;  %v2779_v3 = vmax.f32 %v2653_v60, 0.0  ;;  %v2062_v14 = vadd.f32 %v2061_v52, %v6482_v40  ;;  %v2450_v40 = vadd.f32 %v6067_v48, %v6559_v47  ;;  %v2456_v48 = vadd.f32 %v6086_v38, %v6563_v45 }
 0x1b7   : > { %v6668_v56 = vpack.c.bf16 %v2778_v13, %v2776_v46  ;;  %v2654_v29 = vmul.f32 %v2438_v8, %v2060_v24  ;;  %v577_v8 = vld [vmem:[%s7470_s1 + $0x2f8] sm:$0xff]  ;;  %v6688_v46 = vpop.permute.xlu1 %1306 }
 0x1b8   : > { %v2065_v30 = vpop.f32.mrb[82].mxu0  ;;  %v2655_v61 = vmul.f32 %v2440_v20, %v2062_v14  ;;  %v6675_v50 = vpack.c.bf16 %v2779_v3, %v2777_v62  ;;  %v2452_v20 = vadd.f32 %v6077_v22, %v6559_v47  ;;  %v578_v22 = vld [vmem:[%s7470_s1 + $0x300] sm:$0xff] }
 0x1b9   : > { %v2066_v6 = vadd.f32 %v2065_v30, %v6490_v19  ;;  %4537 = vmatmul.mubr.msk.f32.gmra.mrb[188].mxu0 %vm1374_vm0, %v576_v63  ;;  %v2067_v23 = vpop.f32.mrb[83].mxu0  ;;  %v2780_v13 = vmax.f32 %v2654_v29, 0.0  ;;  %v6701_v30 = vpop.permute.xlu0 %996 }
 0x1ba   : > { %2387 = vmatprep.mubr.f32.mxu0 %v7531_v21  ;;  %v2068_v37 = vadd.f32 %v2067_v23, %v6490_v19  ;;  %v2781_v63 = vmax.f32 %v2655_v61, 0.0 }
 0x1bb   : > { %v2656_v43 = vmul.f32 %v2444_v44, %v2066_v6 }
 0x1bc   : > { %v2071_v62 = vpop.f32.mrb[84].mxu0  ;;  %v2657_v24 = vmul.f32 %v2446_v35, %v2068_v37  ;;  %v2458_v35 = vadd.f32 %v6090_v36, %v6563_v45 }
 0x1bd   : > { %v2782_v60 = vmax.f32 %v2656_v43, 0.0  ;;  %v2072_v52 = vadd.f32 %v2071_v62, %v6539_v9  ;;  %4538 = vmatmul.mubr.msk.f32.gmra.mrb[190].mxu0 %vm1374_vm0, %v577_v8  ;;  %v2073_v44 = vpop.f32.mrb[85].mxu0  ;;  %v6713_v8 = vpop.permute.xlu1 %1001  ;;  %v2464_v43 = vadd.f32 %v6113_v12, %v6594_v58 }
 0x1be   : > { %2393 = vmatprep.mubr.f32.mxu0 %v7531_v21  ;;  %v2783_v47 = vmax.f32 %v2657_v24, 0.0  ;;  %v2074_v29 = vadd.f32 %v2073_v44, %v6539_v9  ;;  %v579_v9 = vld [vmem:[%s7470_s1 + $0x308] sm:$0xff]  ;;  %v2468_v24 = vadd.f32 %v6130_v53, %v6598_v39  ;;  %v2470_v53 = vadd.f32 %v6134_v31, %v6598_v39 }
 0x1bf   : > { %v6698_v19 = vpack.c.bf16 %v2782_v60, %v2780_v13  ;;  %v2658_v3 = vmul.f32 %v2450_v40, %v2072_v52  ;;  %v2462_v40 = vadd.f32 %v6109_v25, %v6594_v58  ;;  %v580_v25 = vld [vmem:[%s7470_s1 + $0x310] sm:$0xff]  ;;  %v6728_v58 = vpop.permute.xlu0 %1311  ;;  %v2476_v31 = vadd.f32 %v6155_v32, %v6636_v54 }
 0x1c0   : > { %v2077_v14 = vpop.f32.mrb[86].mxu0  ;;  %v2659_v38 = vmul.f32 %v2452_v20, %v2074_v29  ;;  %v6707_v6 = vpack.c.bf16 %v2783_v47, %v2781_v63 }
 0x1c1   : > { %v2078_v61 = vadd.f32 %v2077_v14, %v6547_v15  ;;  %4539 = vmatmul.mubr.msk.f32.gmra.mrb[192].mxu0 %vm1374_vm0, %v578_v22  ;;  %v2079_v23 = vpop.f32.mrb[87].mxu0  ;;  %v2784_v20 = vmax.f32 %v2658_v3, 0.0  ;;  %v6733_v47 = vpop.permute.xlu1 %1316 }
 0x1c2   : > { %2399 = vmatprep.mubr.f32.mxu0 %v7531_v21  ;;  %v2080_v45 = vadd.f32 %v2079_v23, %v6547_v15  ;;  %v2785_v52 = vmax.f32 %v2659_v38, 0.0  ;;  %v2474_v38 = vadd.f32 %v6151_v2, %v6636_v54 }
 0x1c3   : > { %v2660_v36 = vmul.f32 %v2456_v48, %v2078_v61 }
 0x1c4   : > { %v2083_v37 = vpop.f32.mrb[88].mxu0  ;;  %v2661_v13 = vmul.f32 %v2458_v35, %v2080_v45 }
 0x1c5   : > { %v2786_v62 = vmax.f32 %v2660_v36, 0.0  ;;  %v2084_v60 = vadd.f32 %v2083_v37, %v6574_v34  ;;  %4540 = vmatmul.mubr.msk.f32.gmra.mrb[194].mxu0 %vm1374_vm0, %v579_v9  ;;  %v2085_v63 = vpop.f32.mrb[89].mxu0  ;;  %v6750_v9 = vpop.permute.xlu0 %1006 }
 0x1c6   : > { %2405 = vmatprep.mubr.f32.mxu0 %v7531_v21  ;;  %v2787_v15 = vmax.f32 %v2661_v13, 0.0  ;;  %v2086_v44 = vadd.f32 %v2085_v63, %v6574_v34  ;;  %v581_v34 = vld [vmem:[%s7470_s1 + $0x318] sm:$0xff]  ;;  %s4844_s1 = scalar_lea.vmem %s4843_s17, 64 }
 0x1c7   : > { %v6730_v12 = vpack.c.bf16 %v2786_v62, %v2784_v20  ;;  %v2662_v48 = vmul.f32 %v2462_v40, %v2084_v60  ;;  %v6756_v20 = vpop.permute.xlu1 %1011  ;;  %v2482_v60 = vadd.f32 %v6178_v17, %v6641_v7  ;;  %p4846_p3 = scmp.lt.s32.totalorder %s4844_s1, %s4838_s26 }
 0x1c8   : > { %v2089_v22 = vpop.f32.mrb[90].mxu0  ;;  %v2663_v3 = vmul.f32 %v2464_v43, %v2086_v44  ;;  %v6739_v14 = vpack.c.bf16 %v2787_v15, %v2785_v52  ;;  %v2480_v43 = vadd.f32 %v6174_v10, %v6641_v7  ;;  %v2486_v15 = vadd.f32 %v6195_v51, %v6681_v27 }
 0x1c9   : > { %v2090_v29 = vadd.f32 %v2089_v22, %v6583_v33  ;;  %4541 = vmatmul.mubr.msk.f32.gmra.mrb[196].mxu0 %vm1374_vm0, %v580_v25  ;;  %v2091_v35 = vpop.f32.mrb[91].mxu0  ;;  %v2788_v40 = vmax.f32 %v2662_v48, 0.0  ;;  %v1322_v25 = vpop.permute.xlu0 %1321  ;;  %p4847_p4 = por %p4846_p3, %p4845_p2 }
 0x1ca   : > { %2411 = vmatprep.mubr.f32.mxu0 %v7531_v21  ;;  %v2092_v39 = vadd.f32 %v2091_v35, %v6583_v33  ;;  %v2789_v2 = vmax.f32 %v2663_v3, 0.0  ;;  %v2492_v35 = vadd.f32 %v6216_v26, %v6688_v46 }
 0x1cb   : > { %v2664_v61 = vmul.f32 %v2468_v24, %v2090_v29  ;;  %p4848_p5 = pnand %p4847_p4, %p4841_p1 }
 0x1cc   : > { %v2095_v23 = vpop.f32.mrb[92].mxu0  ;;  %v2665_v45 = vmul.f32 %v2470_v53, %v2092_v39  ;;  %v6771_v53 = vpop.permute.xlu1 %1326 }
 0x1cd   : > { %v2790_v36 = vmax.f32 %v2664_v61, 0.0  ;;  %v2096_v21 = vadd.f32 %v2095_v23, %v6609_v55  ;;  %4542 = vmatmul.mubr.msk.f32.gmra.mrb[198].mxu0 %vm1374_vm0, %v581_v34  ;;  %v2097_v37 = vpop.f32.mrb[93].mxu0 }
 0x1ce   : > { %v2791_v32 = vmax.f32 %v2665_v45, 0.0  ;;  %v2098_v62 = vadd.f32 %v2097_v37, %v6609_v55  ;;  %v2488_v55 = vadd.f32 %v6199_v5, %v6681_v27  ;;  %v6779_v27 = vpop.permute.xlu0 %1016 }
 0x1cf   : > { %v6758_v33 = vpack.c.bf16 %v2790_v36, %v2788_v40  ;;  %v2666_v54 = vmul.f32 %v2474_v38, %v2096_v21  ;;  %v2498_v21 = vadd.f32 %v6239_v0, %v6728_v58 }
 0x1d0   : > { %v2101_v13 = vpop.f32.mrb[94].mxu0  ;;  %v2667_v24 = vmul.f32 %v2476_v31, %v2098_v62  ;;  %v6764_v63 = vpack.c.bf16 %v2791_v32, %v2789_v2  ;;  %v2494_v31 = vadd.f32 %v6220_v42, %v6688_v46  ;;  %v6786_v45 = vpop.permute.xlu1 %1021  ;;  %v2500_v2 = vadd.f32 %v6243_v11, %v6728_v58 }
 0x1d1   : > { %v2102_v52 = vadd.f32 %v2101_v13, %v6619_v4  ;;  %v2103_v10 = vpop.f32.mrb[95].mxu0  ;;  %v2792_v17 = vmax.f32 %v2666_v54, 0.0  ;;  %v2504_v11 = vadd.f32 %v6260_v57, %v6733_v47 }
 0x1d2   : > { %v2104_v44 = vadd.f32 %v2103_v10, %v6619_v4  ;;  %v2793_v34 = vmax.f32 %v2667_v24, 0.0 }
 0x1d3   : > { %v2668_v48 = vmul.f32 %v2480_v43, %v2102_v52 }
 0x1d4   : > { %v2107_v22 = vpop.f32.mrb[96].mxu0  ;;  %v2669_v3 = vmul.f32 %v2482_v60, %v2104_v44  ;;  %v1332_v60 = vpop.permute.xlu0 %1331 }
 0x1d5   : > { %v2794_v7 = vmax.f32 %v2668_v48, 0.0  ;;  %v2108_v29 = vadd.f32 %v2107_v22, %v6656_v49  ;;  %v2109_v38 = vpop.f32.mrb[97].mxu0  ;;  %v2506_v22 = vadd.f32 %v6264_v1, %v6733_v47 }
 0x1d6   : > { %v2795_v61 = vmax.f32 %v2669_v3, 0.0  ;;  %v2110_v39 = vadd.f32 %v2109_v38, %v6656_v49  ;;  %v2510_v3 = vadd.f32 %v6281_v41, %v1322_v25 }
 0x1d7   : > { %v6776_v51 = vpack.c.bf16 %v2794_v7, %v2792_v17  ;;  %v2670_v4 = vmul.f32 %v2486_v15, %v2108_v29 }
 0x1d8   : > { %v2113_v5 = vpop.f32.mrb[98].mxu0  ;;  %v2671_v23 = vmul.f32 %v2488_v55, %v2110_v39  ;;  %v6784_v36 = vpack.c.bf16 %v2795_v61, %v2793_v34  ;;  %v1027_v29 = vpop.permute.xlu0 %1026  ;;  %v2512_v61 = vadd.f32 %v6285_v18, %v1322_v25 }
 0x1d9   : > { %v2114_v40 = vadd.f32 %v2113_v5, %v6666_v28  ;;  %v2115_v26 = vpop.f32.mrb[99].mxu0  ;;  %v2796_v32 = vmax.f32 %v2670_v4, 0.0 }
 0x1da   : > { %v2116_v49 = vadd.f32 %v2115_v26, %v6666_v28  ;;  %v2797_v62 = vmax.f32 %v2671_v23, 0.0  ;;  %v1337_v28 = vpop.permute.xlu1 %1336  ;;  %v2516_v23 = vadd.f32 %v6304_v59, %v6771_v53 }
 0x1db   : > { %v2672_v43 = vmul.f32 %v2492_v35, %v2114_v40 }
 0x1dc   : > { %v2119_v37 = vpop.f32.mrb[100].mxu0  ;;  %v2673_v46 = vmul.f32 %v2494_v31, %v2116_v49  ;;  %v1342_v25 = vpop.permute.xlu0 %1341 }
 0x1dd   : > { %v2798_v42 = vmax.f32 %v2672_v43, 0.0  ;;  %v2120_v54 = vadd.f32 %v2119_v37, %v6701_v30  ;;  %v2121_v13 = vpop.f32.mrb[101].mxu0  ;;  %v7640_v43 = vld [vmem:[#allocation118_spill] sm:$0xff] }
 0x1de   : > { %v2799_v52 = vmax.f32 %v2673_v46, 0.0  ;;  %v2122_v0 = vadd.f32 %v2121_v13, %v6701_v30  ;;  %v6808_v5 = vpop.permute.xlu1 %1031  ;;  %v2518_v49 = vadd.f32 %v7640_v43, %v6771_v53 }
 0x1df   : > { %v6794_v24 = vpack.c.bf16 %v2798_v42, %v2796_v32  ;;  %v2674_v10 = vmul.f32 %v2498_v21, %v2120_v54  ;;  %v7641_v32 = vld [vmem:[#allocation121_spill] sm:$0xff] }
 0x1e0   : > { %v2125_v15 = vpop.f32.mrb[102].mxu0  ;;  %v2675_v58 = vmul.f32 %v2500_v2, %v2122_v0  ;;  %v6800_v44 = vpack.c.bf16 %v2799_v52, %v2797_v62  ;;  %v2522_v42 = vadd.f32 %v7641_v32, %v1332_v60  ;;  %v7642_v52 = vld [vmem:[#allocation123_spill] sm:$0xff] }
 0x1e1   : > { %v2126_v48 = vadd.f32 %v2125_v15, %v6713_v8  ;;  %v2127_v55 = vpop.f32.mrb[103].mxu0  ;;  %v2800_v35 = vmax.f32 %v2674_v10, 0.0  ;;  %v2524_v10 = vadd.f32 %v7642_v52, %v1332_v60  ;;  %v7644_v60 = vld [vmem:[#allocation128_spill] sm:$0xff]  ;;  %v7648_v52 = vld [vmem:[#allocation138_spill] sm:$0xff] }
 0x1e2   : > { %v2128_v7 = vadd.f32 %v2127_v55, %v6713_v8  ;;  %v2801_v4 = vmax.f32 %v2675_v58, 0.0  ;;  %v1347_v46 = vpop.permute.xlu1 %1346  ;;  %v1037_v55 = vpop.permute.xlu0 %1036 }
 0x1e3   : > { %v2676_v17 = vmul.f32 %v2504_v11, %v2126_v48 }
 0x1e4   : > { %v2131_v30 = vpop.f32.mrb[104].mxu0  ;;  %v2677_v38 = vmul.f32 %v2506_v22, %v2128_v7  ;;  %v7643_v22 = vld [vmem:[#allocation126_spill] sm:$0xff] }
 0x1e5   : > { %v2802_v34 = vmax.f32 %v2676_v17, 0.0  ;;  %v2132_v57 = vadd.f32 %v2131_v30, %v6750_v9  ;;  %v2133_v39 = vpop.f32.mrb[105].mxu0  ;;  %v2528_v17 = vadd.f32 %v7643_v22, %v1337_v28 }
 0x1e6   : > { %v2803_v1 = vmax.f32 %v2677_v38, 0.0  ;;  %v2134_v8 = vadd.f32 %v2133_v39, %v6750_v9  ;;  %v2530_v38 = vadd.f32 %v7644_v60, %v1337_v28  ;;  %v1352_v43 = vpop.permute.xlu0 %1351 }
 0x1e7   : > { %v6810_v31 = vpack.c.bf16 %v2802_v34, %v2800_v35  ;;  %v2678_v47 = vmul.f32 %v2510_v3, %v2132_v57  ;;  %v1042_v34 = vpop.permute.xlu1 %1041 }
 0x1e8   : > { %v2137_v41 = vpop.f32.mrb[106].mxu0  ;;  %v2679_v40 = vmul.f32 %v2512_v61, %v2134_v8  ;;  %v6816_v21 = vpack.c.bf16 %v2803_v1, %v2801_v4  ;;  %v7645_v4 = vld [vmem:[#allocation131_spill] sm:$0xff] }
 0x1e9   : > { %v2138_v26 = vadd.f32 %v2137_v41, %v6756_v20  ;;  %v2139_v18 = vpop.f32.mrb[107].mxu0  ;;  %v2804_v54 = vmax.f32 %v2678_v47, 0.0  ;;  %v2534_v39 = vadd.f32 %v7645_v4, %v1342_v25 }
 0x1ea   : > { %v2140_v37 = vadd.f32 %v2139_v18, %v6756_v20  ;;  %v2805_v0 = vmax.f32 %v2679_v40, 0.0 }
 0x1eb   : > { %v2680_v2 = vmul.f32 %v2516_v23, %v2138_v26  ;;  %v7646_v23 = vld [vmem:[#allocation133_spill] sm:$0xff] }
 0x1ec   : > { %v2143_v9 = vpop.f32.mrb[108].mxu0  ;;  %v2681_v59 = vmul.f32 %v2518_v49, %v2140_v37  ;;  %v2536_v40 = vadd.f32 %v7646_v23, %v1342_v25  ;;  %v2542_v25 = vadd.f32 %v7648_v52, %v1347_v46 }
 0x1ed   : > { %v2806_v62 = vmax.f32 %v2680_v2, 0.0  ;;  %v2144_v13 = vadd.f32 %v2143_v9, %v6779_v27  ;;  %v2145_v15 = vpop.f32.mrb[109].mxu0 }
 0x1ee   : > { %v2807_v58 = vmax.f32 %v2681_v59, 0.0  ;;  %v2146_v48 = vadd.f32 %v2145_v15, %v6779_v27  ;;  %v7649_v15 = vld [vmem:[#allocation140_spill] sm:$0xff] }
 0x1ef   : > { %v6824_v11 = vpack.c.bf16 %v2806_v62, %v2804_v54  ;;  %v2682_v53 = vmul.f32 %v2522_v42, %v2144_v13  ;;  %v1357_v42 = vpop.permute.xlu1 %1356 }
 0x1f0   : > { %v2149_v20 = vpop.f32.mrb[110].mxu0  ;;  %v2683_v7 = vmul.f32 %v2524_v10, %v2146_v48  ;;  %v6829_v30 = vpack.c.bf16 %v2807_v58, %v2805_v0  ;;  %v2546_v58 = vadd.f32 %v7649_v15, %v1352_v43  ;;  %v1047_v48 = vpop.permute.xlu0 %1046 }
 0x1f1   : > { %v2150_v3 = vadd.f32 %v2149_v20, %v6786_v45  ;;  %v2151_v35 = vpop.f32.mrb[111].mxu0  ;;  %v2808_v27 = vmax.f32 %v2682_v53, 0.0 }
 0x1f2   : > { %v2152_v61 = vadd.f32 %v2151_v35, %v6786_v45  ;;  %v2809_v26 = vmax.f32 %v2683_v7, 0.0  ;;  %v7647_v45 = vld [vmem:[#allocation136_spill] sm:$0xff]  ;;  %v7650_v7 = vld [vmem:[#allocation142_spill] sm:$0xff] }
 0x1f3   : > { %v2684_v57 = vmul.f32 %v2528_v17, %v2150_v3  ;;  %v2540_v9 = vadd.f32 %v7647_v45, %v1347_v46  ;;  %v2548_v3 = vadd.f32 %v7650_v7, %v1352_v43 }
 0x1f4   : > { %v2155_v1 = vpop.f32.mrb[112].mxu0  ;;  %v2685_v8 = vmul.f32 %v2530_v38, %v2152_v61  ;;  %v1052_v38 = vpop.permute.xlu1 %1051 }
 0x1f5   : > { %v2810_v47 = vmax.f32 %v2684_v57, 0.0  ;;  %v2156_v41 = vadd.f32 %v2155_v1, %v1027_v29  ;;  %v2157_v18 = vpop.f32.mrb[113].mxu0  ;;  %v1362_v23 = vpop.permute.xlu0 %1361 }
 0x1f6   : > { %v2811_v2 = vmax.f32 %v2685_v8, 0.0  ;;  %v2158_v28 = vadd.f32 %v2157_v18, %v1027_v29 }
 0x1f7   : > { %v6835_v49 = vpack.c.bf16 %v2810_v47, %v2808_v27  ;;  %v2686_v37 = vmul.f32 %v2534_v39, %v2156_v41 }
 0x1f8   : > { %v2161_v32 = vpop.f32.mrb[114].mxu0  ;;  %v2687_v54 = vmul.f32 %v2536_v40, %v2158_v28  ;;  %v6839_v59 = vpack.c.bf16 %v2811_v2, %v2809_v26  ;;  %v7652_v40 = vld [vmem:[#allocation146_spill] sm:$0xff]  ;;  %v7653_v2 = vld [vmem:[#allocation148_spill] sm:$0xff] }
 0x1f9   : > { %v2162_v62 = vadd.f32 %v2161_v32, %v6808_v5  ;;  %v2163_v13 = vpop.f32.mrb[115].mxu0  ;;  %v2812_v29 = vmax.f32 %v2686_v37, 0.0  ;;  %v2554_v26 = vadd.f32 %v7652_v40, %v1357_v42  ;;  %v2558_v37 = vadd.f32 %v7653_v2, %v1362_v23  ;;  %v1367_v32 = vpop.permute.xlu1 %1366 }
 0x1fa   : > { %v2164_v0 = vadd.f32 %v2163_v13, %v6808_v5  ;;  %v2813_v35 = vmax.f32 %v2687_v54, 0.0  ;;  %v7651_v5 = vld [vmem:[#allocation144_spill] sm:$0xff] }
 0x1fb   : > { %v2688_v10 = vmul.f32 %v2540_v9, %v2162_v62  ;;  %v2552_v1 = vadd.f32 %v7651_v5, %v1357_v42  ;;  %v7654_v62 = vld [vmem:[#allocation150_spill] sm:$0xff] }
 0x1fc   : > { %v2167_v53 = vpop.f32.mrb[116].mxu0  ;;  %v2689_v22 = vmul.f32 %v2542_v25, %v2164_v0  ;;  %v2560_v13 = vadd.f32 %v7654_v62, %v1362_v23 }
 0x1fd   : > { %v2814_v20 = vmax.f32 %v2688_v10, 0.0  ;;  %v2168_v17 = vadd.f32 %v2167_v53, %v1037_v55  ;;  %v2169_v60 = vpop.f32.mrb[117].mxu0  ;;  %v7655_v53 = vld [vmem:[#allocation152_spill] sm:$0xff]  ;;  %v1372_v7 = vpop.permute.xlu1 %1371 }
 0x1fe   : > { %v2815_v61 = vmax.f32 %v2689_v22, 0.0  ;;  %v2170_v4 = vadd.f32 %v2169_v60, %v1037_v55 }
 0x1ff   : > { %v6845_v57 = vpack.c.bf16 %v2814_v20, %v2812_v29  ;;  %v2690_v46 = vmul.f32 %v2546_v58, %v2168_v17 }
 0x200   : > { %v2173_v39 = vpop.f32.mrb[118].mxu0  ;;  %v2691_v27 = vmul.f32 %v2548_v3, %v2170_v4  ;;  %v6848_v8 = vpack.c.bf16 %v2815_v61, %v2813_v35  ;;  %v7656_v3 = vld [vmem:[#allocation154_spill] sm:$0xff]  ;;  %v7657_v4 = vld [vmem:[#allocation156_spill] sm:$0xff] }
 0x201   : > { %v2174_v47 = vadd.f32 %v2173_v39, %v1042_v34  ;;  %v2175_v41 = vpop.f32.mrb[119].mxu0  ;;  %v2816_v45 = vmax.f32 %v2690_v46, 0.0  ;;  %v2566_v35 = vadd.f32 %v7656_v3, %v1367_v32  ;;  %v1057_v46 = vpop.permute.xlu0 %1056  ;;  %v2570_v39 = vadd.f32 %v7657_v4, %v1372_v7  ;;  %v7666_v3 = vld [vmem:[#allocation55_spill] sm:$0xff] }
 0x202   : > { %v2176_v43 = vadd.f32 %v2175_v41, %v1042_v34  ;;  %v2817_v52 = vmax.f32 %v2691_v27, 0.0  ;;  %v2564_v34 = vadd.f32 %v7655_v53, %v1367_v32  ;;  %v7658_v41 = vld [vmem:[#allocation158_spill] sm:$0xff]  ;;  %v7664_v53 = vld [vmem:[#allocation53_spill] sm:$0xff] }
 0x203   : > { %v2692_v18 = vmul.f32 %v2552_v1, %v2174_v47  ;;  %v2572_v23 = vadd.f32 %v7658_v41, %v1372_v7  ;;  %v7660_v32 = vld [vmem:[#allocation50_spill] sm:$0xff] }
 0x204   : > { %v2179_v28 = vpop.f32.mrb[120].mxu0  ;;  %v2693_v55 = vmul.f32 %v2554_v26, %v2176_v43 }
 0x205   : > { %v2818_v9 = vmax.f32 %v2692_v18, 0.0  ;;  %v2180_v54 = vadd.f32 %v2179_v28, %v1047_v48  ;;  %v2181_v25 = vpop.f32.mrb[121].mxu0 }
 0x206   : > { %v2819_v0 = vmax.f32 %v2693_v55, 0.0  ;;  %v2182_v58 = vadd.f32 %v2181_v25, %v1047_v48  ;;  %v7661_v55 = vld [vmem:[#allocation7_spill] sm:$0xff] }
 0x207   : > { %v6853_v10 = vpack.c.bf16 %v2818_v9, %v2816_v45  ;;  %v2694_v15 = vmul.f32 %v2558_v37, %v2180_v54 }
 0x208   : > { %v2185_v42 = vpop.f32.mrb[122].mxu0  ;;  %v2695_v29 = vmul.f32 %v2560_v13, %v2182_v58  ;;  %v6856_v22 = vpack.c.bf16 %v2819_v0, %v2817_v52  ;;  %v7662_v52 = vld [vmem:[#allocation52_spill] sm:$0xff] }
 0x209   : > { %v2186_v20 = vadd.f32 %v2185_v42, %v1052_v38  ;;  %v2187_v17 = vpop.f32.mrb[123].mxu0  ;;  %v2820_v1 = vmax.f32 %v2694_v15, 0.0  ;;  %v7663_v42 = vld [vmem:[#allocation10_spill] sm:$0xff] }
 0x20a   : > { %v2188_v61 = vadd.f32 %v2187_v17, %v1052_v38  ;;  %v2821_v40 = vmax.f32 %v2695_v29, 0.0  ;;  %v7659_v38 = vld [vmem:[#allocation8_spill] sm:$0xff] }
 0x20b   : > { %v2696_v60 = vmul.f32 %v2564_v34, %v2186_v20  ;;  %v1820_v45 = vadd.f32 %v7660_v32, %v7659_v38  ;;  %v1822_v25 = vadd.f32 %v7662_v52, %v7659_v38  ;;  %v1826_v34 = vadd.f32 %v7664_v53, %v7663_v42  ;;  %v7665_v20 = vld [vmem:[#allocation9_spill] sm:$0xff]  ;;  %v7672_v52 = vld [vmem:[#allocation60_spill] sm:$0xff]  ;;  %v7674_v53 = vld [vmem:[#allocation62_spill] sm:$0xff] }
 0x20c   : > { %v2191_v5 = vpop.f32.mrb[124].mxu0  ;;  %v2697_v48 = vmul.f32 %v2566_v35, %v2188_v61  ;;  %v1828_v35 = vadd.f32 %v7666_v3, %v7663_v42  ;;  %v4775_v42 = vld [vmem:[%s7375_s3 + $0x4] ss:$16 sps:$4 sm:$0xff]  }
 0x20d   : > { %v2822_v27 = vmax.f32 %v2696_v60, 0.0  ;;  %v2192_v47 = vadd.f32 %v2191_v5, %v1057_v46  ;;  %v2193_v26 = vpop.f32.mrb[125].mxu0  ;;  %v7668_v5 = vld [vmem:[#allocation57_spill] sm:$0xff]  ;;  %3182 = vmatprep.mubr.bf16.mxu1 %v4775_v42  ;;  %v7675_v3 = vld [vmem:[#allocation16_spill] sm:$0xff] }
 0x20e   : > { %v2823_v43 = vmax.f32 %v2697_v48, 0.0  ;;  %v2194_v37 = vadd.f32 %v2193_v26, %v1057_v46  ;;  %v7683_v42 = vld [vmem:[#allocation20_spill] sm:$0xff] }
 0x20f   : > { %v6861_v18 = vpack.c.bf16 %v2822_v27, %v2820_v1  ;;  %v6863_v2 = vmul.f32 %v2570_v39, %v2192_v47  ;;  %v7667_v39 = vld [vmem:[#allocation12_spill] sm:$0xff]  ;;  %v7669_v47 = vld [vmem:[#allocation14_spill] sm:$0xff] }
 0x210   : > { %v2197_v28 = vpop.f32.mrb[126].mxu0  ;;  %v6867_v9 = vmul.f32 %v2572_v23, %v2194_v37  ;;  %v6870_v62 = vpack.c.bf16 %v2823_v43, %v2821_v40  ;;  %v1832_v1 = vadd.f32 %v7668_v5, %v7667_v39  ;;  %v7670_v40 = vld [vmem:[#allocation58_spill] sm:$0xff] }
 0x211   : > { %v2198_v54 = vadd.f32 %v2197_v28, %v7661_v55  ;;  %v2199_v13 = vpop.f32.mrb[127].mxu0  ;;  %v1834_v26 = vadd.f32 %v7670_v40, %v7667_v39 }
 0x212   : > { %v2200_v15 = vadd.f32 %v2199_v13, %v7661_v55  ;;  %v7671_v13 = vld [vmem:[#allocation11_spill] sm:$0xff] }
 0x213   : > { %v2574_v0 = vmul.f32 %v2198_v54, %v1820_v45 }
 0x214   : > { %v2203_v58 = vpop.f32.mrb[128].mxu0  ;;  %v2575_v29 = vmul.f32 %v2200_v15, %v1822_v25  ;;  %v1838_v25 = vadd.f32 %v7672_v52, %v7671_v13  ;;  %v7682_v52 = vld [vmem:[#allocation68_spill] sm:$0xff] }
 0x215   : > { %v2204_v17 = vadd.f32 %v2203_v58, %v7665_v20  ;;  %v2205_v7 = vpop.f32.mrb[129].mxu0  ;;  %v2700_v27 = vmax.f32 %v2574_v0, 0.0  ;;  %v7673_v0 = vld [vmem:[#allocation13_spill] sm:$0xff] }
 0x216   : > { %v2206_v60 = vadd.f32 %v2205_v7, %v7665_v20  ;;  %v2701_v43 = vmax.f32 %v2575_v29, 0.0 }
 0x217   : > { %v2576_v61 = vmul.f32 %v2204_v17, %v1826_v34  ;;  %v1840_v34 = vadd.f32 %v7674_v53, %v7671_v13  ;;  %v7684_v53 = vld [vmem:[#allocation70_spill] sm:$0xff] }
 0x218   : > { %v2577_v46 = vmul.f32 %v2206_v60, %v1828_v35  ;;  %v2209_v4 = vpop.f32.mrb[130].mxu0  ;;  %v7676_v35 = vld [vmem:[#allocation63_spill] sm:$0xff] }
 0x219   : > { %v2702_v48 = vmax.f32 %v2576_v61, 0.0  ;;  %v2210_v41 = vadd.f32 %v2209_v4, %v7669_v47  ;;  %v2211_v23 = vpop.f32.mrb[131].mxu0  ;;  %v1844_v60 = vadd.f32 %v7676_v35, %v7675_v3  ;;  %v7677_v4 = vld [vmem:[#allocation18_spill] sm:$0xff]  ;;  %v7686_v35 = vld [vmem:[#allocation72_spill] sm:$0xff] }
 0x21a   : > { %v2703_v37 = vmax.f32 %v2577_v46, 0.0  ;;  %v2212_v28 = vadd.f32 %v2211_v23, %v7669_v47 }
 0x21b   : > { %v2826_v38 = vpack.c.bf16 %v2702_v48, %v2700_v27  ;;  %v2578_v32 = vmul.f32 %v2210_v41, %v1832_v1  ;;  %v7678_v1 = vld [vmem:[#allocation65_spill] sm:$0xff] }
 0x21c   : > { %v2579_v45 = vmul.f32 %v2212_v28, %v1834_v26  ;;  %v2215_v55 = vpop.f32.mrb[132].mxu0  ;;  %v2827_v54 = vpack.c.bf16 %v2703_v37, %v2701_v43  ;;  %v1846_v27 = vadd.f32 %v7678_v1, %v7675_v3  ;;  %v7679_v28 = vld [vmem:[#allocation15_spill] sm:$0xff] }
 0x21d   : > { %v2216_v15 = vadd.f32 %v2215_v55, %v7673_v0  ;;  %v2217_v58 = vpop.f32.mrb[133].mxu0  ;;  %v2704_v61 = vmax.f32 %v2578_v32, 0.0  ;;  %v7681_v32 = vld [vmem:[#allocation17_spill] sm:$0xff] }
 0x21e   : > { %v2218_v29 = vadd.f32 %v2217_v58, %v7673_v0  ;;  %3150 = vmatprep.subr.bf16.mxu1 %v2827_v54  ;;  %v2705_v48 = vmax.f32 %v2579_v45, 0.0 }
 0x21f   : > { %v2580_v20 = vmul.f32 %v2216_v15, %v1838_v25  ;;  %3151 = vmatpush1.bf16.msra.mxu1 %v2826_v38  ;;  %v7680_v38 = vld [vmem:[#allocation67_spill] sm:$0xff]  ;;  %v1852_v25 = vadd.f32 %v7682_v52, %v7679_v28  ;;  %v7692_v52 = vld [vmem:[#allocation77_spill] sm:$0xff] }
 0x220   : > { %v2581_v17 = vmul.f32 %v2218_v29, %v1840_v34  ;;  %v2221_v7 = vpop.f32.mrb[134].mxu0  ;;  %v1850_v55 = vadd.f32 %v7680_v38, %v7679_v28  ;;  %v1856_v34 = vadd.f32 %v7684_v53, %v7683_v42  ;;  %v7690_v28 = vld [vmem:[#allocation75_spill] sm:$0xff]  ;;  %v7694_v53 = vld [vmem:[#allocation78_spill] sm:$0xff] }
 0x221   : > { %v2706_v46 = vmax.f32 %v2580_v20, 0.0  ;;  %v2222_v39 = vadd.f32 %v2221_v7, %v7677_v4  ;;  %v2223_v5 = vpop.f32.mrb[135].mxu0 }
 0x222   : > { %v2707_v47 = vmax.f32 %v2581_v17, 0.0  ;;  %v2224_v41 = vadd.f32 %v2223_v5, %v7677_v4  ;;  %v7685_v17 = vld [vmem:[#allocation22_spill] sm:$0xff] }
 0x223   : > { %v2828_v23 = vpack.c.bf16 %v2706_v46, %v2704_v61  ;;  %v2582_v40 = vmul.f32 %v2222_v39, %v1844_v60  ;;  %v1858_v60 = vadd.f32 %v7686_v35, %v7683_v42 }
 0x224   : > { %v2583_v26 = vmul.f32 %v2224_v41, %v1846_v27  ;;  %v2227_v43 = vpop.f32.mrb[136].mxu0  ;;  %v2829_v37 = vpack.c.bf16 %v2707_v47, %v2705_v48  ;;  %v7687_v47 = vld [vmem:[#allocation19_spill] sm:$0xff]  ;;  %v7688_v41 = vld [vmem:[#allocation73_spill] sm:$0xff] }
 0x225   : > { %v2228_v54 = vadd.f32 %v2227_v43, %v7681_v32  ;;  %v2229_v13 = vpop.f32.mrb[137].mxu0  ;;  %v2708_v29 = vmax.f32 %v2582_v40, 0.0  ;;  %v7689_v40 = vld [vmem:[#allocation21_spill] sm:$0xff]  ;;  %v1864_v38 = vadd.f32 %v7690_v28, %v7687_v47  ;;  %v7700_v28 = vld [vmem:[#allocation83_spill] sm:$0xff] }
 0x226   : > { %v2230_v0 = vadd.f32 %v2229_v13, %v7681_v32  ;;  %3152 = vmatprep.subr.bf16.mxu1 %v2829_v37  ;;  %v2709_v61 = vmax.f32 %v2583_v26, 0.0  ;;  %v7691_v13 = vld [vmem:[#allocation24_spill] sm:$0xff] }
 0x227   : > { %v2584_v45 = vmul.f32 %v2228_v54, %v1850_v55  ;;  %3153 = vmatpush1.bf16.msra.mxu1 %v2828_v23  ;;  %v1862_v23 = vadd.f32 %v7688_v41, %v7687_v47  ;;  %v7698_v47 = vld [vmem:[#allocation82_spill] sm:$0xff] }
 0x228   : > { %v2585_v15 = vmul.f32 %v2230_v0, %v1852_v25  ;;  %v2233_v58 = vpop.f32.mrb[138].mxu0  ;;  %v1868_v25 = vadd.f32 %v7692_v52, %v7691_v13  ;;  %v7702_v52 = vld [vmem:[#allocation85_spill] sm:$0xff] }
 0x229   : > { %v2710_v20 = vmax.f32 %v2584_v45, 0.0  ;;  %v2234_v7 = vadd.f32 %v2233_v58, %v7685_v17  ;;  %v2235_v3 = vpop.f32.mrb[139].mxu0 }
 0x22a   : > { %v2711_v46 = vmax.f32 %v2585_v15, 0.0  ;;  %v2236_v4 = vadd.f32 %v2235_v3, %v7685_v17  ;;  %v7693_v15 = vld [vmem:[#allocation26_spill] sm:$0xff] }
 0x22b   : > { %v2830_v39 = vpack.c.bf16 %v2710_v20, %v2708_v29  ;;  %v2586_v5 = vmul.f32 %v2234_v7, %v1856_v34  ;;  %v1870_v34 = vadd.f32 %v7694_v53, %v7691_v13 }
 0x22c   : > { %v2587_v1 = vmul.f32 %v2236_v4, %v1858_v60  ;;  %v2239_v27 = vpop.f32.mrb[140].mxu0  ;;  %v2831_v48 = vpack.c.bf16 %v2711_v46, %v2709_v61  ;;  %v7695_v46 = vld [vmem:[#allocation23_spill] sm:$0xff]  ;;  %v7696_v4 = vld [vmem:[#allocation80_spill] sm:$0xff] }
 0x22d   : > { %v2240_v43 = vadd.f32 %v2239_v27, %v7689_v40  ;;  %v2241_v37 = vpop.f32.mrb[141].mxu0  ;;  %v2712_v0 = vmax.f32 %v2586_v5, 0.0  ;;  %v7697_v5 = vld [vmem:[#allocation25_spill] sm:$0xff]  ;;  %v1876_v41 = vadd.f32 %v7698_v47, %v7695_v46  ;;  %v7708_v47 = vld [vmem:[#allocation90_spill] sm:$0xff] }
 0x22e   : > { %v2242_v55 = vadd.f32 %v2241_v37, %v7689_v40  ;;  %3154 = vmatprep.subr.bf16.mxu1 %v2831_v48  ;;  %v2713_v29 = vmax.f32 %v2587_v1, 0.0  ;;  %v7699_v37 = vld [vmem:[#allocation28_spill] sm:$0xff] }
 0x22f   : > { %v2588_v26 = vmul.f32 %v2240_v43, %v1862_v23  ;;  %3155 = vmatpush1.bf16.msra.mxu1 %v2830_v39  ;;  %v1874_v39 = vadd.f32 %v7696_v4, %v7695_v46  ;;  %v7706_v46 = vld [vmem:[#allocation88_spill] sm:$0xff] }
 0x230   : > { %v2589_v32 = vmul.f32 %v2242_v55, %v1864_v38  ;;  %v2245_v54 = vpop.f32.mrb[142].mxu0  ;;  %v1880_v38 = vadd.f32 %v7700_v28, %v7699_v37  ;;  %v7710_v28 = vld [vmem:[#allocation92_spill] sm:$0xff] }
 0x231   : > { %v2714_v45 = vmax.f32 %v2588_v26, 0.0  ;;  %v2246_v58 = vadd.f32 %v2245_v54, %v7693_v15  ;;  %v2247_v42 = vpop.f32.mrb[143].mxu0 }
 0x232   : > { %v2715_v20 = vmax.f32 %v2589_v32, 0.0  ;;  %v2248_v17 = vadd.f32 %v2247_v42, %v7693_v15  ;;  %v7701_v32 = vld [vmem:[#allocation30_spill] sm:$0xff] }
 0x233   : > { %v2832_v7 = vpack.c.bf16 %v2714_v45, %v2712_v0  ;;  %v2590_v3 = vmul.f32 %v2246_v58, %v1868_v25  ;;  %v1882_v25 = vadd.f32 %v7702_v52, %v7699_v37 }
 0x234   : > { %v2591_v35 = vmul.f32 %v2248_v17, %v1870_v34  ;;  %v2251_v60 = vpop.f32.mrb[144].mxu0  ;;  %v2833_v61 = vpack.c.bf16 %v2715_v20, %v2713_v29  ;;  %v7703_v20 = vld [vmem:[#allocation27_spill] sm:$0xff] }
 0x235   : > { %v2252_v27 = vadd.f32 %v2251_v60, %v7697_v5  ;;  %v2253_v48 = vpop.f32.mrb[145].mxu0  ;;  %v2716_v55 = vmax.f32 %v2590_v3, 0.0  ;;  %v7704_v17 = vld [vmem:[#allocation87_spill] sm:$0xff]  ;;  %v7705_v3 = vld [vmem:[#allocation29_spill] sm:$0xff]  ;;  %v1888_v4 = vadd.f32 %v7706_v46, %v7703_v20 }
 0x236   : > { %v2254_v23 = vadd.f32 %v2253_v48, %v7697_v5  ;;  %3156 = vmatprep.subr.bf16.mxu1 %v2833_v61  ;;  %v2717_v0 = vmax.f32 %v2591_v35, 0.0  ;;  %v7707_v48 = vld [vmem:[#allocation32_spill] sm:$0xff]  ;;  %v7716_v46 = vld [vmem:[#allocation97_spill] sm:$0xff] }
 0x237   : > { %v2592_v1 = vmul.f32 %v2252_v27, %v1874_v39  ;;  %3157 = vmatpush1.bf16.msra.mxu1 %v2832_v7  ;;  %v1886_v7 = vadd.f32 %v7704_v17, %v7703_v20  ;;  %v7714_v20 = vld [vmem:[#allocation95_spill] sm:$0xff] }
 0x238   : > { %v2593_v40 = vmul.f32 %v2254_v23, %v1876_v41  ;;  %v2257_v43 = vpop.f32.mrb[146].mxu0  ;;  %v1892_v41 = vadd.f32 %v7708_v47, %v7707_v48  ;;  %v7718_v47 = vld [vmem:[#allocation98_spill] sm:$0xff] }
 0x239   : > { %v2718_v26 = vmax.f32 %v2592_v1, 0.0  ;;  %v2258_v54 = vadd.f32 %v2257_v43, %v7701_v32  ;;  %v2259_v13 = vpop.f32.mrb[147].mxu0 }
 0x23a   : > { %v2719_v45 = vmax.f32 %v2593_v40, 0.0  ;;  %v2260_v15 = vadd.f32 %v2259_v13, %v7701_v32  ;;  %v7709_v40 = vld [vmem:[#allocation34_spill] sm:$0xff] }
 0x23b   : > { %v2834_v58 = vpack.c.bf16 %v2718_v26, %v2716_v55  ;;  %v2594_v42 = vmul.f32 %v2258_v54, %v1880_v38  ;;  %v1894_v38 = vadd.f32 %v7710_v28, %v7707_v48 }
 0x23c   : > { %v2595_v53 = vmul.f32 %v2260_v15, %v1882_v25  ;;  %v2263_v34 = vpop.f32.mrb[148].mxu0  ;;  %v2835_v29 = vpack.c.bf16 %v2719_v45, %v2717_v0  ;;  %v7711_v45 = vld [vmem:[#allocation31_spill] sm:$0xff]  ;;  %v7712_v15 = vld [vmem:[#allocation93_spill] sm:$0xff] }
 0x23d   : > { %v2264_v60 = vadd.f32 %v2263_v34, %v7705_v3  ;;  %v2265_v61 = vpop.f32.mrb[149].mxu0  ;;  %v2720_v23 = vmax.f32 %v2594_v42, 0.0  ;;  %v7713_v42 = vld [vmem:[#allocation33_spill] sm:$0xff]  ;;  %v1900_v17 = vadd.f32 %v7714_v20, %v7711_v45  ;;  %v7724_v20 = vld [vmem:[#allocation103_spill] sm:$0xff] }
 0x23e   : > { %v2266_v39 = vadd.f32 %v2265_v61, %v7705_v3  ;;  %3158 = vmatprep.subr.bf16.mxu1 %v2835_v29  ;;  %v2721_v55 = vmax.f32 %v2595_v53, 0.0  ;;  %v7715_v61 = vld [vmem:[#allocation35_spill] sm:$0xff] }
 0x23f   : > { %v2596_v35 = vmul.f32 %v2264_v60, %v1886_v7  ;;  %3159 = vmatpush1.bf16.msra.mxu1 %v2834_v58  ;;  %v1898_v58 = vadd.f32 %v7712_v15, %v7711_v45  ;;  %v7722_v45 = vld [vmem:[#allocation102_spill] sm:$0xff] }
 0x240   : > { %v2597_v5 = vmul.f32 %v2266_v39, %v1888_v4  ;;  %v2269_v27 = vpop.f32.mrb[150].mxu0  ;;  %v1904_v4 = vadd.f32 %v7716_v46, %v7715_v61  ;;  %v7726_v46 = vld [vmem:[#allocation105_spill] sm:$0xff] }
 0x241   : > { %v2722_v1 = vmax.f32 %v2596_v35, 0.0  ;;  %v2270_v43 = vadd.f32 %v2269_v27, %v7709_v40  ;;  %v2271_v37 = vpop.f32.mrb[151].mxu0 }
 0x242   : > { %v2723_v26 = vmax.f32 %v2597_v5, 0.0  ;;  %v2272_v32 = vadd.f32 %v2271_v37, %v7709_v40  ;;  %v7717_v5 = vld [vmem:[#allocation37_spill] sm:$0xff] }
 0x243   : > { %v2836_v54 = vpack.c.bf16 %v2722_v1, %v2720_v23  ;;  %v2598_v13 = vmul.f32 %v2270_v43, %v1892_v41  ;;  %v1906_v41 = vadd.f32 %v7718_v47, %v7715_v61 }
 0x244   : > { %v2599_v52 = vmul.f32 %v2272_v32, %v1894_v38  ;;  %v2275_v25 = vpop.f32.mrb[152].mxu0  ;;  %v2837_v0 = vpack.c.bf16 %v2723_v26, %v2721_v55  ;;  %v7719_v26 = vld [vmem:[#allocation36_spill] sm:$0xff] }
 0x245   : > { %v2276_v34 = vadd.f32 %v2275_v25, %v7713_v42  ;;  %v2277_v29 = vpop.f32.mrb[153].mxu0  ;;  %v2724_v39 = vmax.f32 %v2598_v13, 0.0  ;;  %v7720_v32 = vld [vmem:[#allocation100_spill] sm:$0xff]  ;;  %v7721_v13 = vld [vmem:[#allocation38_spill] sm:$0xff]  ;;  %v1912_v15 = vadd.f32 %v7722_v45, %v7719_v26 }
 0x246   : > { %v2278_v7 = vadd.f32 %v2277_v29, %v7713_v42  ;;  %3160 = vmatprep.subr.bf16.mxu1 %v2837_v0  ;;  %v2725_v23 = vmax.f32 %v2599_v52, 0.0  ;;  %v7723_v29 = vld [vmem:[#allocation39_spill] sm:$0xff]  ;;  %v7732_v45 = vld [vmem:[#allocation110_spill] sm:$0xff] }
 0x247   : > { %v2600_v53 = vmul.f32 %v2276_v34, %v1898_v58  ;;  %3161 = vmatpush1.bf16.msra.mxu1 %v2836_v54  ;;  %v1910_v54 = vadd.f32 %v7720_v32, %v7719_v26  ;;  %v7730_v26 = vld [vmem:[#allocation108_spill] sm:$0xff] }
 0x248   : > { %v2601_v3 = vmul.f32 %v2278_v7, %v1900_v17  ;;  %v2281_v60 = vpop.f32.mrb[154].mxu0  ;;  %v1916_v17 = vadd.f32 %v7724_v20, %v7723_v29  ;;  %v7734_v20 = vld [vmem:[#allocation112_spill] sm:$0xff] }
 0x249   : > { %v2726_v35 = vmax.f32 %v2600_v53, 0.0  ;;  %v2282_v27 = vadd.f32 %v2281_v60, %v7717_v5  ;;  %v2283_v48 = vpop.f32.mrb[155].mxu0 }
 0x24a   : > { %v2727_v1 = vmax.f32 %v2601_v3, 0.0  ;;  %v2284_v40 = vadd.f32 %v2283_v48, %v7717_v5  ;;  %v7725_v3 = vld [vmem:[#allocation41_spill] sm:$0xff] }
 0x24b   : > { %v2838_v43 = vpack.c.bf16 %v2726_v35, %v2724_v39  ;;  %v2602_v37 = vmul.f32 %v2282_v27, %v1904_v4  ;;  %v1918_v4 = vadd.f32 %v7726_v46, %v7723_v29 }
 0x24c   : > { %v2603_v28 = vmul.f32 %v2284_v40, %v1906_v41  ;;  %v2287_v38 = vpop.f32.mrb[156].mxu0  ;;  %v2839_v55 = vpack.c.bf16 %v2727_v1, %v2725_v23  ;;  %v7727_v1 = vld [vmem:[#allocation40_spill] sm:$0xff]  ;;  %v7728_v40 = vld [vmem:[#allocation107_spill] sm:$0xff] }
 0x24d   : > { %v2288_v25 = vadd.f32 %v2287_v38, %v7721_v13  ;;  %v2289_v0 = vpop.f32.mrb[157].mxu0  ;;  %v2728_v7 = vmax.f32 %v2602_v37, 0.0  ;;  %v7729_v37 = vld [vmem:[#allocation42_spill] sm:$0xff]  ;;  %v1924_v32 = vadd.f32 %v7730_v26, %v7727_v1  ;;  %v7740_v26 = vld [vmem:[#allocation117_spill] sm:$0xff] }
 0x24e   : > { %v2290_v58 = vadd.f32 %v2289_v0, %v7721_v13  ;;  %3162 = vmatprep.subr.bf16.mxu1 %v2839_v55  ;;  %v2729_v39 = vmax.f32 %v2603_v28, 0.0  ;;  %v7731_v0 = vld [vmem:[#allocation43_spill] sm:$0xff] }
 0x24f   : > { %v2604_v52 = vmul.f32 %v2288_v25, %v1910_v54  ;;  %3163 = vmatpush1.bf16.msra.mxu1 %v2838_v43  ;;  %v1922_v43 = vadd.f32 %v7728_v40, %v7727_v1  ;;  %v7738_v1 = vld [vmem:[#allocation115_spill] sm:$0xff] }
 0x250   : > { %v2605_v42 = vmul.f32 %v2290_v58, %v1912_v15  ;;  %v2293_v34 = vpop.f32.mrb[158].mxu0  ;;  %v1928_v15 = vadd.f32 %v7732_v45, %v7731_v0  ;;  %v7742_v45 = vld [vmem:[#allocation119_spill] sm:$0xff] }
 0x251   : > { %v2730_v53 = vmax.f32 %v2604_v52, 0.0  ;;  %v2294_v60 = vadd.f32 %v2293_v34, %v7725_v3  ;;  %v2295_v61 = vpop.f32.mrb[159].mxu0 }
 0x252   : > { %v2731_v35 = vmax.f32 %v2605_v42, 0.0  ;;  %v2296_v5 = vadd.f32 %v2295_v61, %v7725_v3  ;;  %v7733_v42 = vld [vmem:[#allocation45_spill] sm:$0xff] }
 0x253   : > { %v2840_v27 = vpack.c.bf16 %v2730_v53, %v2728_v7  ;;  %v2606_v48 = vmul.f32 %v2294_v60, %v1916_v17  ;;  %v1930_v17 = vadd.f32 %v7734_v20, %v7731_v0 }
 0x254   : > { %v2607_v47 = vmul.f32 %v2296_v5, %v1918_v4  ;;  %v2299_v41 = vpop.f32.mrb[160].mxu0  ;;  %v2841_v23 = vpack.c.bf16 %v2731_v35, %v2729_v39  ;;  %v7735_v35 = vld [vmem:[#allocation44_spill] sm:$0xff]  ;;  %v7736_v5 = vld [vmem:[#allocation113_spill] sm:$0xff] }
 0x255   : > { %v2300_v38 = vadd.f32 %v2299_v41, %v7729_v37  ;;  %v2301_v55 = vpop.f32.mrb[161].mxu0  ;;  %v2732_v58 = vmax.f32 %v2606_v48, 0.0  ;;  %v7737_v48 = vld [vmem:[#allocation46_spill] sm:$0xff]  ;;  %v1936_v40 = vadd.f32 %v7738_v1, %v7735_v35  ;;  %v7748_v1 = vld [vmem:[#allocation127_spill] sm:$0xff] }
 0x256   : > { %v2302_v54 = vadd.f32 %v2301_v55, %v7729_v37  ;;  %3164 = vmatprep.subr.bf16.mxu1 %v2841_v23  ;;  %v2733_v7 = vmax.f32 %v2607_v47, 0.0  ;;  %v7739_v55 = vld [vmem:[#allocation47_spill] sm:$0xff] }
 0x257   : > { %v2608_v28 = vmul.f32 %v2300_v38, %v1922_v43  ;;  %3165 = vmatpush1.bf16.msra.mxu1 %v2840_v27  ;;  %v1934_v27 = vadd.f32 %v7736_v5, %v7735_v35  ;;  %v7746_v35 = vld [vmem:[#allocation125_spill] sm:$0xff] }
 0x258   : > { %v2609_v13 = vmul.f32 %v2302_v54, %v1924_v32  ;;  %v2305_v25 = vpop.f32.mrb[162].mxu0  ;;  %v1940_v32 = vadd.f32 %v7740_v26, %v7739_v55  ;;  %v7750_v26 = vld [vmem:[#allocation130_spill] sm:$0xff] }
 0x259   : > { %v2734_v52 = vmax.f32 %v2608_v28, 0.0  ;;  %v2306_v34 = vadd.f32 %v2305_v25, %v7733_v42  ;;  %v2307_v29 = vpop.f32.mrb[163].mxu0 }
 0x25a   : > { %v2735_v53 = vmax.f32 %v2609_v13, 0.0  ;;  %v2308_v3 = vadd.f32 %v2307_v29, %v7733_v42  ;;  %v7741_v13 = vld [vmem:[#allocation49_spill] sm:$0xff] }
 0x25b   : > { %v2842_v60 = vpack.c.bf16 %v2734_v52, %v2732_v58  ;;  %v2610_v61 = vmul.f32 %v2306_v34, %v1928_v15  ;;  %v1942_v15 = vadd.f32 %v7742_v45, %v7739_v55 }
 0x25c   : > { %v2611_v46 = vmul.f32 %v2308_v3, %v1930_v17  ;;  %v2311_v4 = vpop.f32.mrb[164].mxu0  ;;  %v2843_v39 = vpack.c.bf16 %v2735_v53, %v2733_v7  ;;  %v7743_v53 = vld [vmem:[#allocation48_spill] sm:$0xff]  ;;  %v7744_v3 = vld [vmem:[#allocation122_spill] sm:$0xff] }
 0x25d   : > { %v2312_v41 = vadd.f32 %v2311_v4, %v7737_v48  ;;  %v2313_v23 = vpop.f32.mrb[165].mxu0  ;;  %v2736_v54 = vmax.f32 %v2610_v61, 0.0  ;;  %v7745_v61 = vld [vmem:[#allocation51_spill] sm:$0xff]  ;;  %v1948_v5 = vadd.f32 %v7746_v35, %v7743_v53  ;;  %v7756_v35 = vld [vmem:[#allocation137_spill] sm:$0xff] }
 0x25e   : > { %v2314_v43 = vadd.f32 %v2313_v23, %v7737_v48  ;;  %3166 = vmatprep.subr.bf16.mxu1 %v2843_v39  ;;  %v2737_v58 = vmax.f32 %v2611_v46, 0.0  ;;  %v7747_v23 = vld [vmem:[#allocation54_spill] sm:$0xff] }
 0x25f   : > { %v2612_v47 = vmul.f32 %v2312_v41, %v1934_v27  ;;  %3167 = vmatpush1.bf16.msra.mxu1 %v2842_v60  ;;  %v1946_v60 = vadd.f32 %v7744_v3, %v7743_v53  ;;  %v7754_v53 = vld [vmem:[#allocation134_spill] sm:$0xff] }
 0x260   : > { %v2613_v37 = vmul.f32 %v2314_v43, %v1936_v40  ;;  %v2317_v38 = vpop.f32.mrb[166].mxu0  ;;  %v1952_v40 = vadd.f32 %v7748_v1, %v7747_v23  ;;  %v7758_v1 = vld [vmem:[#allocation139_spill] sm:$0xff] }
 0x261   : > { %v2738_v28 = vmax.f32 %v2612_v47, 0.0  ;;  %v2318_v25 = vadd.f32 %v2317_v38, %v7741_v13  ;;  %v2319_v0 = vpop.f32.mrb[167].mxu0 }
 0x262   : > { %v2739_v52 = vmax.f32 %v2613_v37, 0.0  ;;  %v2320_v42 = vadd.f32 %v2319_v0, %v7741_v13  ;;  %v7749_v37 = vld [vmem:[#allocation59_spill] sm:$0xff] }
 0x263   : > { %v2844_v34 = vpack.c.bf16 %v2738_v28, %v2736_v54  ;;  %v2614_v29 = vmul.f32 %v2318_v25, %v1940_v32  ;;  %v1954_v32 = vadd.f32 %v7750_v26, %v7747_v23 }
 0x264   : > { %v2615_v20 = vmul.f32 %v2320_v42, %v1942_v15  ;;  %v2323_v17 = vpop.f32.mrb[168].mxu0  ;;  %v2845_v7 = vpack.c.bf16 %v2739_v52, %v2737_v58  ;;  %v7751_v52 = vld [vmem:[#allocation56_spill] sm:$0xff] }
 0x265   : > { %v2324_v4 = vadd.f32 %v2323_v17, %v7745_v61  ;;  %v2325_v39 = vpop.f32.mrb[169].mxu0  ;;  %v2740_v43 = vmax.f32 %v2614_v29, 0.0  ;;  %v7752_v42 = vld [vmem:[#allocation132_spill] sm:$0xff]  ;;  %v7753_v29 = vld [vmem:[#allocation61_spill] sm:$0xff]  ;;  %v1960_v3 = vadd.f32 %v7754_v53, %v7751_v52 }
 0x266   : > { %v2326_v27 = vadd.f32 %v2325_v39, %v7745_v61  ;;  %3168 = vmatprep.subr.bf16.mxu1 %v2845_v7  ;;  %v2741_v54 = vmax.f32 %v2615_v20, 0.0  ;;  %v7755_v39 = vld [vmem:[#allocation64_spill] sm:$0xff]  ;;  %v7764_v53 = vld [vmem:[#allocation145_spill] sm:$0xff] }
 0x267   : > { %v2616_v46 = vmul.f32 %v2324_v4, %v1946_v60  ;;  %3169 = vmatpush1.bf16.msra.mxu1 %v2844_v34  ;;  %v1958_v34 = vadd.f32 %v7752_v42, %v7751_v52  ;;  %v7762_v52 = vld [vmem:[#allocation143_spill] sm:$0xff] }
 0x268   : > { %v2617_v48 = vmul.f32 %v2326_v27, %v1948_v5  ;;  %v2329_v41 = vpop.f32.mrb[170].mxu0  ;;  %v1964_v5 = vadd.f32 %v7756_v35, %v7755_v39  ;;  %v7766_v35 = vld [vmem:[#allocation147_spill] sm:$0xff] }
 0x269   : > { %v2742_v47 = vmax.f32 %v2616_v46, 0.0  ;;  %v2330_v38 = vadd.f32 %v2329_v41, %v7749_v37  ;;  %v2331_v55 = vpop.f32.mrb[171].mxu0 }
 0x26a   : > { %v2743_v28 = vmax.f32 %v2617_v48, 0.0  ;;  %v2332_v13 = vadd.f32 %v2331_v55, %v7749_v37  ;;  %v7757_v48 = vld [vmem:[#allocation69_spill] sm:$0xff] }
 0x26b   : > { %v2846_v25 = vpack.c.bf16 %v2742_v47, %v2740_v43  ;;  %v2618_v0 = vmul.f32 %v2330_v38, %v1952_v40  ;;  %v1966_v40 = vadd.f32 %v7758_v1, %v7755_v39 }
 0x26c   : > { %v2619_v45 = vmul.f32 %v2332_v13, %v1954_v32  ;;  %v2335_v15 = vpop.f32.mrb[172].mxu0  ;;  %v2847_v58 = vpack.c.bf16 %v2743_v28, %v2741_v54  ;;  %v7759_v28 = vld [vmem:[#allocation66_spill] sm:$0xff]  ;;  %v7760_v13 = vld [vmem:[#allocation141_spill] sm:$0xff] }
 0x26d   : > { %v2336_v17 = vadd.f32 %v2335_v15, %v7753_v29  ;;  %v2337_v7 = vpop.f32.mrb[173].mxu0  ;;  %v2744_v27 = vmax.f32 %v2618_v0, 0.0  ;;  %v7761_v0 = vld [vmem:[#allocation71_spill] sm:$0xff]  ;;  %v1972_v42 = vadd.f32 %v7762_v52, %v7759_v28  ;;  %v7772_v52 = vld [vmem:[#allocation153_spill] sm:$0xff] }
 0x26e   : > { %v2338_v60 = vadd.f32 %v2337_v7, %v7753_v29  ;;  %3170 = vmatprep.subr.bf16.mxu1 %v2847_v58  ;;  %v2745_v43 = vmax.f32 %v2619_v45, 0.0  ;;  %v7763_v7 = vld [vmem:[#allocation74_spill] sm:$0xff] }
 0x26f   : > { %v2620_v20 = vmul.f32 %v2336_v17, %v1958_v34  ;;  %3171 = vmatpush1.bf16.msra.mxu1 %v2846_v25  ;;  %v1970_v25 = vadd.f32 %v7760_v13, %v7759_v28  ;;  %v7770_v28 = vld [vmem:[#allocation151_spill] sm:$0xff] }
 0x270   : > { %v2621_v61 = vmul.f32 %v2338_v60, %v1960_v3  ;;  %v2341_v4 = vpop.f32.mrb[174].mxu0  ;;  %v1976_v3 = vadd.f32 %v7764_v53, %v7763_v7  ;;  %v7774_v53 = vld [vmem:[#allocation155_spill] sm:$0xff] }
 0x271   : > { %v2746_v46 = vmax.f32 %v2620_v20, 0.0  ;;  %v2342_v41 = vadd.f32 %v2341_v4, %v7757_v48  ;;  %v2343_v23 = vpop.f32.mrb[175].mxu0 }
 0x272   : > { %v2747_v47 = vmax.f32 %v2621_v61, 0.0  ;;  %v2344_v37 = vadd.f32 %v2343_v23, %v7757_v48  ;;  %v7765_v61 = vld [vmem:[#allocation79_spill] sm:$0xff] }
 0x273   : > { %v2848_v38 = vpack.c.bf16 %v2746_v46, %v2744_v27  ;;  %v2622_v55 = vmul.f32 %v2342_v41, %v1964_v5  ;;  %v1978_v5 = vadd.f32 %v7766_v35, %v7763_v7 }
 0x274   : > { %v2623_v26 = vmul.f32 %v2344_v37, %v1966_v40  ;;  %v2347_v32 = vpop.f32.mrb[176].mxu0  ;;  %v2849_v54 = vpack.c.bf16 %v2747_v47, %v2745_v43  ;;  %v7767_v47 = vld [vmem:[#allocation76_spill] sm:$0xff]  ;;  %v7768_v37 = vld [vmem:[#allocation149_spill] sm:$0xff] }
 0x275   : > { %v2348_v15 = vadd.f32 %v2347_v32, %v7761_v0  ;;  %v2349_v58 = vpop.f32.mrb[177].mxu0  ;;  %v2748_v60 = vmax.f32 %v2622_v55, 0.0  ;;  %v7769_v55 = vld [vmem:[#allocation81_spill] sm:$0xff]  ;;  %v1984_v13 = vadd.f32 %v7770_v28, %v7767_v47  ;;  %v7780_v28 = vld [vmem:[#allocation160_spill] sm:$0xff] }
 0x276   : > { %v2350_v34 = vadd.f32 %v2349_v58, %v7761_v0  ;;  %3172 = vmatprep.subr.bf16.mxu1 %v2849_v54  ;;  %v2749_v27 = vmax.f32 %v2623_v26, 0.0  ;;  %v7771_v58 = vld [vmem:[#allocation84_spill] sm:$0xff] }
 0x277   : > { %v2624_v45 = vmul.f32 %v2348_v15, %v1970_v25  ;;  %3173 = vmatpush1.bf16.msra.mxu1 %v2848_v38  ;;  %v1982_v38 = vadd.f32 %v7768_v37, %v7767_v47  ;;  %v7778_v47 = vld [vmem:[#allocation159_spill] sm:$0xff] }
 0x278   : > { %v2625_v29 = vmul.f32 %v2350_v34, %v1972_v42  ;;  %v2353_v17 = vpop.f32.mrb[178].mxu0  ;;  %v1988_v42 = vadd.f32 %v7772_v52, %v7771_v58  ;;  %v7782_v52 = vld [vmem:[#allocation161_spill] sm:$0xff] }
 0x279   : > { %v2750_v20 = vmax.f32 %v2624_v45, 0.0  ;;  %v2354_v4 = vadd.f32 %v2353_v17, %v7765_v61  ;;  %v2355_v39 = vpop.f32.mrb[179].mxu0 }
 0x27a   : > { %v2751_v46 = vmax.f32 %v2625_v29, 0.0  ;;  %v2356_v48 = vadd.f32 %v2355_v39, %v7765_v61  ;;  %v7773_v29 = vld [vmem:[#allocation89_spill] sm:$0xff] }
 0x27b   : > { %v2850_v41 = vpack.c.bf16 %v2750_v20, %v2748_v60  ;;  %v2626_v23 = vmul.f32 %v2354_v4, %v1976_v3  ;;  %v1990_v3 = vadd.f32 %v7774_v53, %v7771_v58 }
 0x27c   : > { %v2627_v1 = vmul.f32 %v2356_v48, %v1978_v5  ;;  %v2359_v40 = vpop.f32.mrb[180].mxu0  ;;  %v2851_v43 = vpack.c.bf16 %v2751_v46, %v2749_v27  ;;  %v7775_v46 = vld [vmem:[#allocation86_spill] sm:$0xff]  ;;  %v7776_v48 = vld [vmem:[#allocation157_spill] sm:$0xff] }
 0x27d   : > { %v2360_v32 = vadd.f32 %v2359_v40, %v7769_v55  ;;  %v2361_v54 = vpop.f32.mrb[181].mxu0  ;;  %v2752_v34 = vmax.f32 %v2626_v23, 0.0  ;;  %v7777_v23 = vld [vmem:[#allocation91_spill] sm:$0xff]  ;;  %v1996_v37 = vadd.f32 %v7778_v47, %v7775_v46  ;;  %v7788_v47 = vld [vmem:[#allocation164_spill] sm:$0xff] }
 0x27e   : > { %v2362_v25 = vadd.f32 %v2361_v54, %v7769_v55  ;;  %3174 = vmatprep.subr.bf16.mxu1 %v2851_v43  ;;  %v2753_v60 = vmax.f32 %v2627_v1, 0.0  ;;  %v7779_v54 = vld [vmem:[#allocation94_spill] sm:$0xff] }
 0x27f   : > { %v2628_v26 = vmul.f32 %v2360_v32, %v1982_v38  ;;  %3175 = vmatpush1.bf16.msra.mxu1 %v2850_v41  ;;  %v1994_v41 = vadd.f32 %v7776_v48, %v7775_v46  ;;  %v7786_v46 = vld [vmem:[#allocation163_spill] sm:$0xff] }
 0x280   : > { %v2629_v0 = vmul.f32 %v2362_v25, %v1984_v13  ;;  %v2365_v15 = vpop.f32.mrb[182].mxu0  ;;  %v2000_v13 = vadd.f32 %v7780_v28, %v7779_v54  ;;  %v7790_v28 = vld [vmem:[#allocation165_spill] sm:$0xff] }
 0x281   : > { %v2754_v45 = vmax.f32 %v2628_v26, 0.0  ;;  %v2366_v17 = vadd.f32 %v2365_v15, %v7773_v29  ;;  %v2367_v7 = vpop.f32.mrb[183].mxu0 }
 0x282   : > { %v2755_v20 = vmax.f32 %v2629_v0, 0.0  ;;  %v2368_v61 = vadd.f32 %v2367_v7, %v7773_v29  ;;  %v7781_v0 = vld [vmem:[#allocation99_spill] sm:$0xff] }
 0x283   : > { %v2852_v4 = vpack.c.bf16 %v2754_v45, %v2752_v34  ;;  %v2630_v39 = vmul.f32 %v2366_v17, %v1988_v42  ;;  %v2002_v42 = vadd.f32 %v7782_v52, %v7779_v54 }
 0x284   : > { %v2631_v35 = vmul.f32 %v2368_v61, %v1990_v3  ;;  %v2371_v5 = vpop.f32.mrb[184].mxu0  ;;  %v2853_v27 = vpack.c.bf16 %v2755_v20, %v2753_v60  ;;  %v7783_v20 = vld [vmem:[#allocation96_spill] sm:$0xff]  ;;  %v7784_v61 = vld [vmem:[#allocation162_spill] sm:$0xff] }
 0x285   : > { %v2372_v40 = vadd.f32 %v2371_v5, %v7777_v23  ;;  %v2373_v43 = vpop.f32.mrb[185].mxu0  ;;  %v2756_v25 = vmax.f32 %v2630_v39, 0.0  ;;  %v7785_v39 = vld [vmem:[#allocation101_spill] sm:$0xff]  ;;  %v2008_v48 = vadd.f32 %v7786_v46, %v7783_v20 }
 0x286   : > { %v2374_v38 = vadd.f32 %v2373_v43, %v7777_v23  ;;  %3176 = vmatprep.subr.bf16.mxu1 %v2853_v27  ;;  %v2757_v34 = vmax.f32 %v2631_v35, 0.0  ;;  %v7787_v43 = vld [vmem:[#allocation104_spill] sm:$0xff] }
 0x287   : > { %v2632_v1 = vmul.f32 %v2372_v40, %v1994_v41  ;;  %3177 = vmatpush1.bf16.msra.mxu1 %v2852_v4  ;;  %v2006_v4 = vadd.f32 %v7784_v61, %v7783_v20  ;;  %v7794_v20 = vld [vmem:[#allocation167_spill] sm:$0xff] }
 0x288   : > { %v2633_v55 = vmul.f32 %v2374_v38, %v1996_v37  ;;  %v2377_v32 = vpop.f32.mrb[186].mxu0  ;;  %v2012_v37 = vadd.f32 %v7788_v47, %v7787_v43 }
 0x289   : > { %v2758_v26 = vmax.f32 %v2632_v1, 0.0  ;;  %v2378_v15 = vadd.f32 %v2377_v32, %v7781_v0  ;;  %v2379_v58 = vpop.f32.mrb[187].mxu0 }
 0x28a   : > { %v2759_v45 = vmax.f32 %v2633_v55, 0.0  ;;  %v2380_v29 = vadd.f32 %v2379_v58, %v7781_v0  ;;  %v7789_v55 = vld [vmem:[#allocation109_spill] sm:$0xff] }
 0x28b   : > { %v2854_v17 = vpack.c.bf16 %v2758_v26, %v2756_v25  ;;  %v2634_v7 = vmul.f32 %v2378_v15, %v2000_v13  ;;  %v2014_v13 = vadd.f32 %v7790_v28, %v7787_v43  ;;  %v7797_v43 = vld [vmem:[#allocation120_spill] sm:$0xff] }
 0x28c   : > { %v2635_v53 = vmul.f32 %v2380_v29, %v2002_v42  ;;  %v2383_v3 = vpop.f32.mrb[188].mxu0  ;;  %v2855_v60 = vpack.c.bf16 %v2759_v45, %v2757_v34  ;;  %v7791_v45 = vld [vmem:[#allocation106_spill] sm:$0xff] }
 0x28d   : > { %v2384_v5 = vadd.f32 %v2383_v3, %v7785_v39  ;;  %v2385_v27 = vpop.f32.mrb[189].mxu0  ;;  %v2760_v38 = vmax.f32 %v2634_v7, 0.0  ;;  %v7792_v29 = vld [vmem:[#allocation166_spill] sm:$0xff]  ;;  %v7793_v7 = vld [vmem:[#allocation111_spill] sm:$0xff]  ;;  %v2020_v61 = vadd.f32 %v7794_v20, %v7791_v45 }
 0x28e   : > { %v2386_v41 = vadd.f32 %v2385_v27, %v7785_v39  ;;  %3178 = vmatprep.subr.bf16.mxu1 %v2855_v60  ;;  %v2761_v25 = vmax.f32 %v2635_v53, 0.0  ;;  %v4773_v53 = vld [vmem:[%s7375_s3] ss:$16 sps:$4 sm:$0xff]   ;;  %v4779_v20 = vld [vmem:[%s7375_s3 + $0x44] ss:$16 sps:$4 sm:$0xff]  }
 0x28f   : > { %v2636_v35 = vmul.f32 %v2384_v5, %v2006_v4  ;;  %3179 = vmatpush1.bf16.msra.mxu1 %v2854_v17  ;;  %v2018_v17 = vadd.f32 %v7792_v29, %v7791_v45  ;;  %v4776_v5 = vld [vmem:[%s7375_s3 + $0x24] ss:$16 sps:$4 sm:$0xff]  }
 0x290   : > { %v2637_v23 = vmul.f32 %v2386_v41, %v2008_v48  ;;  %v2389_v40 = vpop.f32.mrb[190].mxu0  ;;  %v7795_v48 = vld [vmem:[#allocation114_spill] sm:$0xff]  ;;  %v7796_v41 = vld [vmem:[#allocation168_spill] sm:$0xff] }
 0x291   : > { %v2762_v1 = vmax.f32 %v2636_v35, 0.0  ;;  %v2390_v32 = vadd.f32 %v2389_v40, %v7789_v55  ;;  %v2391_v54 = vpop.f32.mrb[191].mxu0  ;;  %v2024_v35 = vadd.f32 %v7796_v41, %v7795_v48 }
 0x292   : > { %v2763_v26 = vmax.f32 %v2637_v23, 0.0  ;;  %v2392_v0 = vadd.f32 %v2391_v54, %v7789_v55 }
 0x293   : > { %v2856_v15 = vpack.c.bf16 %v2762_v1, %v2760_v38  ;;  %v2638_v58 = vmul.f32 %v2390_v32, %v2012_v37  ;;  %v7798_v38 = vld [vmem:[#allocation169_spill] sm:$0xff] }
 0x294   : > { %v2639_v52 = vmul.f32 %v2392_v0, %v2014_v13  ;;  %v2395_v42 = vpop.f32.mrb[192].mxu0  ;;  %v2857_v34 = vpack.c.bf16 %v2763_v26, %v2761_v25  ;;  %v2026_v1 = vadd.f32 %v7798_v38, %v7795_v48  ;;  %v7805_v48 = vld [vmem:[#allocation135_spill] sm:$0xff] }
 0x295   : > { %v2396_v3 = vadd.f32 %v2395_v42, %v7793_v7  ;;  %v2397_v60 = vpop.f32.mrb[193].mxu0  ;;  %v2764_v23 = vmax.f32 %v2638_v58, 0.0  ;;  %v7800_v58 = vld [vmem:[#allocation170_spill] sm:$0xff] }
 0x296   : > { %v2398_v4 = vadd.f32 %v2397_v60, %v7793_v7  ;;  %3180 = vmatprep.subr.bf16.mxu1 %v2857_v34  ;;  %v2765_v55 = vmax.f32 %v2639_v52, 0.0  ;;  %v7801_v34 = vld [vmem:[#allocation124_spill] sm:$0xff] }
 0x297   : > { %v2640_v39 = vmul.f32 %v2396_v3, %v2018_v17  ;;  %3181 = vmatpush1.bf16.msra.mxu1 %v2856_v15  ;;  %v7799_v15 = vld [vmem:[#allocation116_spill] sm:$0xff]  ;;  %v7802_v17 = vld [vmem:[#allocation171_spill] sm:$0xff] }
 0x298   : > { %v2641_v27 = vmul.f32 %v2398_v4, %v2020_v61  ;;  %v2401_v46 = vpop.f32.mrb[194].mxu0  ;;  %v2030_v42 = vadd.f32 %v7800_v58, %v7799_v15  ;;  %v2032_v7 = vadd.f32 %v7802_v17, %v7799_v15  ;;  %v4778_v3 = vld [vmem:[%s7375_s3 + $0x20] ss:$16 sps:$4 sm:$0xff]   ;;  %v4782_v58 = vld [vmem:[%s7375_s3 + $0x64] ss:$16 sps:$4 sm:$0xff]  }
 0x299   : > { %v2766_v40 = vmax.f32 %v2640_v39, 0.0  ;;  %v2402_v47 = vadd.f32 %v2401_v46, %v7797_v43  ;;  %v2403_v37 = vpop.f32.mrb[195].mxu0  ;;  %v7804_v39 = vld [vmem:[#allocation172_spill] sm:$0xff] }
 0x29a   : > { %v2767_v32 = vmax.f32 %v2641_v27, 0.0  ;;  %v2404_v54 = vadd.f32 %v2403_v37, %v7797_v43  ;;  %3183 = vmatmul.mubr.bf16.vlgmr.msra.gmra.mrb[52].mxu1 %v4773_v53  ;;  %v7803_v53 = vld [vmem:[#allocation129_spill] sm:$0xff] }
 0x29b   : > { %v2858_v28 = vpack.c.bf16 %v2766_v40, %v2764_v23  ;;  %v2642_v13 = vmul.f32 %v2402_v47, %v2024_v35  ;;  %3192 = vmatprep.mubr.bf16.mxu1 %v4776_v5  ;;  %v2036_v5 = vadd.f32 %v7804_v39, %v7803_v53  ;;  %v7806_v23 = vld [vmem:[#allocation173_spill] sm:$0xff] }
 0x29c   : > { %v2643_v25 = vmul.f32 %v2404_v54, %v2026_v1  ;;  %v2407_v26 = vpop.f32.mrb[196].mxu0  ;;  %v2859_v0 = vpack.c.bf16 %v2767_v32, %v2765_v55  ;;  %v2038_v40 = vadd.f32 %v7806_v23, %v7803_v53  ;;  %v2774_v54 = vmax.f32 %v6621_v16, 0.0  ;;  %v4784_v16 = vld [vmem:[%s7375_s3 + $0x60] ss:$16 sps:$4 sm:$0xff]  }
 0x29d   : > { %v2408_v45 = vadd.f32 %v2407_v26, %v7801_v34  ;;  %v2409_v29 = vpop.f32.mrb[197].mxu0  ;;  %v2768_v27 = vmax.f32 %v2642_v13, 0.0  ;;  %v7807_v13 = vld [vmem:[#allocation174_spill] sm:$0xff] }
 0x29e   : > { %v2410_v52 = vadd.f32 %v2409_v29, %v7801_v34  ;;  %3251 = vmatprep.subr.bf16.mxu1 %v2859_v0  ;;  %v2769_v43 = vmax.f32 %v2643_v25, 0.0  ;;  %v2775_v26 = vmax.f32 %v7807_v13, 0.0  ;;  %v4781_v25 = vld [vmem:[%s7375_s3 + $0x40] ss:$16 sps:$4 sm:$0xff]   ;;  %v4785_v34 = vld [vmem:[%s7375_s3 + $0x84] ss:$16 sps:$4 sm:$0xff]   ;;  %v2932_v29 = vpop.permute.xlu0 %2931 }
 0x29f   : > { %v2644_v60 = vmul.f32 %v2408_v45, %v2030_v42  ;;  %3252 = vmatpush1.bf16.msra.mxu1 %v2858_v28  ;;  %v7808_v45 = vmov 0  }
 0x2a0   : > { %v2645_v61 = vmul.f32 %v2410_v52, %v2032_v7  ;;  %v2413_v4 = vpop.f32.mrb[198].mxu0 }
 0x2a1   : > { %v2770_v46 = vmax.f32 %v2644_v60, 0.0  ;;  %v2414_v41 = vadd.f32 %v2413_v4, %v7805_v48  ;;  %v2415_v35 = vpop.f32.mrb[199].mxu0 }
 0x2a2   : > { %v2771_v47 = vmax.f32 %v2645_v61, 0.0  ;;  %v2416_v37 = vadd.f32 %v2415_v35, %v7805_v48  ;;  %3193 = vmatmul.mubr.bf16.gmra.mrb[56].mxu1 %v4778_v3  ;;  %v2937_v3 = vpop.permute.xlu1 %2936 }
 0x2a3   : > { %v2860_v38 = vpack.c.bf16 %v2770_v46, %v2768_v27  ;;  %v2646_v1 = vmul.f32 %v2414_v41, %v2036_v5  ;;  %3202 = vmatprep.mubr.bf16.mxu1 %v4779_v20  ;;  %v2942_v41 = vpop.permute.xlu0 %2941 }
 0x2a4   : > { %v2647_v55 = vmul.f32 %v2416_v37, %v2038_v40  ;;  %v2861_v32 = vpack.c.bf16 %v2771_v47, %v2769_v43 }
 0x2a5   : > { %v2772_v28 = vmax.f32 %v2646_v1, 0.0 }
 0x2a6   : > { %v2773_v0 = vmax.f32 %v2647_v55, 0.0  ;;  %3253 = vmatprep.subr.bf16.mxu1 %v2861_v32  ;;  %v2947_v47 = vpop.permute.xlu1 %2946 }
 0x2a7   : > { %v2862_v15 = vpack.c.bf16 %v2774_v54, %v2772_v28  ;;  %3254 = vmatpush1.bf16.msra.mxu1 %v2860_v38 }
 0x2a8   : > { %v2863_v42 = vpack.c.bf16 %v2775_v26, %v2773_v0 }
 0x2aa   : > { %3255 = vmatprep.subr.bf16.mxu1 %v2863_v42  ;;  %3203 = vmatmul.mubr.bf16.gmra.mrb[60].mxu1 %v4781_v25  ;;  %v2952_v25 = vpop.permute.xlu0 %2951 }
 0x2ab   : > { %3256 = vmatpush1.bf16.msra.mxu1 %v2862_v15  ;;  %3212 = vmatprep.mubr.bf16.mxu1 %v4782_v58 }
 0x2ac   : > { %3257 = vmatprep.subr.bf16.mxu1 %v6675_v50  ;;  %v4787_v50 = vld [vmem:[%s7375_s3 + $0x80] ss:$16 sps:$4 sm:$0xff]  }
 0x2af   : > { %3258 = vmatpush1.bf16.msra.mxu1 %v6668_v56  ;;  %v4788_v56 = vld [vmem:[%s7375_s3 + $0xa4] ss:$16 sps:$4 sm:$0xff]  }
 0x2b0   : > { %3259 = vmatprep.subr.bf16.mxu1 %v6707_v6  ;;  %v4790_v6 = vld [vmem:[%s7375_s3 + $0xa0] ss:$16 sps:$4 sm:$0xff]  }
 0x2b2   : > { %3213 = vmatmul.mubr.bf16.gmra.mrb[64].mxu1 %v4784_v16 }
 0x2b3   : > { %3260 = vmatpush1.bf16.msra.mxu1 %v6698_v19  ;;  %3222 = vmatprep.mubr.bf16.mxu1 %v4785_v34  ;;  %v2914_v19 = vld [vmem:[%s7375_s3 + $0xc0] sm:$0x33]  ;;  %v2957_v34 = vpop.permute.xlu1 %2956 }
 0x2b4   : > { %3261 = vmatprep.subr.bf16.mxu1 %v6739_v14  ;;  %v4593_v14 = vcombine.low %v2914_v19, %v2914_v19 }
 0x2b7   : > { %3262 = vmatpush1.bf16.msra.mxu1 %v6730_v12  ;;  %v4594_v12 = vcombine.high %v2914_v19, %v2914_v19 }
 0x2b8   : > { %3263 = vmatprep.subr.bf16.mxu1 %v6764_v63  ;;  %v2824_v63 = vmax.f32 %v6863_v2, 0.0  ;;  %v4810_v2 = vld [vmem:[%s7375_s3 + $0xa8] ss:$16 sps:$4 sm:$0xff]  }
 0x2ba   : > { %3223 = vmatmul.mubr.bf16.gmra.mrb[68].mxu1 %v4787_v50 }
 0x2bb   : > { %3264 = vmatpush1.bf16.msra.mxu1 %v6758_v33  ;;  %3232 = vmatprep.mubr.bf16.mxu1 %v4788_v56  ;;  %v4795_v33 = vld [vmem:[%s7375_s3 + $0xc] ss:$16 sps:$4 sm:$0xff]  }
 0x2bc   : > { %3265 = vmatprep.subr.bf16.mxu1 %v6784_v36  ;;  %v2888_v36 = vpack.c.bf16 %v2824_v63, %v2824_v63 }
 0x2bf   : > { %3266 = vmatpush1.bf16.msra.mxu1 %v6776_v51  ;;  %v2825_v51 = vmax.f32 %v6867_v9, 0.0 }
 0x2c0   : > { %3267 = vmatprep.subr.bf16.mxu1 %v6800_v44  ;;  %v3145_v44 = vsel %vm3143_vm2, %v2888_v36, 0 }
 0x2c2   : > { %3233 = vmatmul.mubr.bf16.gmra.mrb[72].mxu1 %v4790_v6 }
 0x2c3   : > { %3268 = vmatpush1.bf16.msra.mxu1 %v6794_v24  ;;  %3242 = vmatprep.mubr.bf16.mxu1 %v4594_v12  ;;  %v2889_v24 = vpack.c.bf16 %v2825_v51, %v2825_v51 }
 0x2c4   : > { %3269 = vmatprep.subr.bf16.mxu1 %v6816_v21  ;;  %v4796_v21 = vld [vmem:[%s7375_s3 + $0x2c] ss:$16 sps:$4 sm:$0xff]  }
 0x2c7   : > { %3270 = vmatpush1.bf16.msra.mxu1 %v6810_v31  ;;  %v4793_v31 = vld [vmem:[%s7375_s3 + $0x8] ss:$16 sps:$4 sm:$0xff]  }
 0x2c8   : > { %3271 = vmatprep.subr.bf16.mxu1 %v6829_v30  ;;  %v4799_v30 = vld [vmem:[%s7375_s3 + $0x4c] ss:$16 sps:$4 sm:$0xff]  }
 0x2ca   : > { %3243 = vmatmul.mubr.bf16.gmra.mrb[76].mxu1 %v4593_v14 }
 0x2cb   : > { %3272 = vmatpush1.bf16.msra.mxu1 %v6824_v11  ;;  %4598 = vmatprep.mubr.msk.bf16.mxu1 %vm3121_vm1, %v4795_v33  ;;  %v4798_v11 = vld [vmem:[%s7375_s3 + $0x28] ss:$16 sps:$4 sm:$0xff]  }
 0x2cc   : > { %3273 = vmatprep.subr.bf16.mxu1 %v6839_v59  ;;  %v4802_v59 = vld [vmem:[%s7375_s3 + $0x6c] ss:$16 sps:$4 sm:$0xff]  }
 0x2cf   : > { %3274 = vmatpush1.bf16.msra.mxu1 %v6835_v49  ;;  %v4801_v49 = vld [vmem:[%s7375_s3 + $0x48] ss:$16 sps:$4 sm:$0xff]  }
 0x2d0   : > { %3275 = vmatprep.subr.bf16.mxu1 %v6848_v8  ;;  %v4805_v8 = vld [vmem:[%s7375_s3 + $0x8c] ss:$16 sps:$4 sm:$0xff]  }
 0x2d3   : > { %3276 = vmatpush1.bf16.msra.mxu1 %v6845_v57  ;;  %v4804_v57 = vld [vmem:[%s7375_s3 + $0x68] ss:$16 sps:$4 sm:$0xff]  }
 0x2d4   : > { %3277 = vmatprep.subr.bf16.mxu1 %v6856_v22  ;;  %v4808_v22 = vld [vmem:[%s7375_s3 + $0xac] ss:$16 sps:$4 sm:$0xff]  }
 0x2d7   : > { %3278 = vmatpush1.bf16.msra.mxu1 %v6853_v10  ;;  %v4807_v10 = vld [vmem:[%s7375_s3 + $0x88] ss:$16 sps:$4 sm:$0xff]  }
 0x2d8   : > { %3279 = vmatprep.subr.bf16.mxu1 %v6870_v62 }
 0x2db   : > { %3280 = vmatpush1.bf16.msra.mxu1 %v6861_v18  ;;  %v2915_v18 = vld [vmem:[%s7375_s3 + $0xc8] sm:$0x33] }
 0x2dc   : > { %4597 = vmatprep.subr.msk.bf16.mxu1 %vm3143_vm2, %v2889_v24  ;;  %v4596_v9 = vcombine.high %v2915_v18, %v2915_v18  ;;  %v4595_v62 = vcombine.low %v2915_v18, %v2915_v18  ;;  %v2962_v24 = vpop.permute.xlu0 %2961 }
 0x2df   : > { %3282 = vmatpush1.bf16.msra.mxu1 %v3145_v44 }
 0x2e2   : > { %3284 = vmatmul.mubr.bf16.vlgmr.msra.gmra.mrb[52].mxu1 %v4793_v31 }
 0x2e3   : > { %4599 = vmatprep.mubr.msk.bf16.mxu1 %vm3121_vm1, %v4796_v21 }
 0x2ea   : > { %3294 = vmatmul.mubr.bf16.gmra.mrb[56].mxu1 %v4798_v11 }
 0x2eb   : > { %4600 = vmatprep.mubr.msk.bf16.mxu1 %vm3121_vm1, %v4799_v30  ;;  %v2967_v30 = vpop.permute.xlu1 %2966 }
 0x2f2   : > { %3304 = vmatmul.mubr.bf16.gmra.mrb[60].mxu1 %v4801_v49 }
 0x2f3   : > { %4601 = vmatprep.mubr.msk.bf16.mxu1 %vm3121_vm1, %v4802_v59 }
 0x2fa   : > { %3314 = vmatmul.mubr.bf16.gmra.mrb[64].mxu1 %v4804_v57 }
 0x2fb   : > { %4602 = vmatprep.mubr.msk.bf16.mxu1 %vm3121_vm1, %v4805_v8 }
 0x302   : > { %3324 = vmatmul.mubr.bf16.gmra.mrb[68].mxu1 %v4807_v10 }
 0x303   : > { %4603 = vmatprep.mubr.msk.bf16.mxu1 %vm3121_vm1, %v4808_v22 }
 0x30a   : > { %3334 = vmatmul.mubr.bf16.gmra.mrb[72].mxu1 %v4810_v2 }
 0x30b   : > { %4604 = vmatprep.mubr.msk.bf16.mxu1 %vm3121_vm1, %v4596_v9 }
 0x312   : > { %3344 = vmatmul.mubr.bf16.gmra.mrb[76].mxu1 %v4595_v62 }
 0x313   : > { %3577 = vmatprep.mubr.bf16.mxu1 %v7808_v45 }
 0x3b5   : > { %v3285_v17 = vpop.f32.mrb[52].mxu1 }
 0x3b6   : > { %v4673_v7 = vadd.f32 %v3285_v17, %v2932_v29  ;;  %v3287_v52 = vpop.f32.mrb[53].mxu1 }
 0x3b7   : > { %v4674_v60 = vadd.f32 %v3287_v52, %v2932_v29  ;;  %v3289_v20 = vpop.f32.mrb[54].mxu1  ;;  %v2972_v29 = vpop.permute.xlu0 %2971 }
 0x3b8   : > { %v4675_v61 = vadd.f32 %v3289_v20, %v2937_v3  ;;  %v3291_v4 = vpop.f32.mrb[55].mxu1  ;;  %v3352_v39 = vmax.f32 %v4673_v7, 0.0 }
 0x3b9   : > { %v4676_v53 = vadd.f32 %v3291_v4, %v2937_v3  ;;  %v3353_v27 = vmax.f32 %v4674_v60, 0.0  ;;  %v2977_v60 = vpop.permute.xlu1 %2976 }
 0x3ba   : > { %v3354_v5 = vmax.f32 %v4675_v61, 0.0 }
 0x3bb   : > { %v3355_v46 = vmax.f32 %v4676_v53, 0.0 }
 0x3bc   : > { %v3378_v48 = vpack.c.bf16 %v3354_v5, %v3352_v39 }
 0x3bd   : > { %v3379_v35 = vpack.c.bf16 %v3355_v46, %v3353_v27  ;;  %v3295_v23 = vpop.f32.mrb[56].mxu1 }
 0x3be   : > { %v4677_v40 = vadd.f32 %v3295_v23, %v2942_v41  ;;  %v3297_v43 = vpop.f32.mrb[57].mxu1 }
 0x3bf   : > { %v4678_v37 = vadd.f32 %v3297_v43, %v2942_v41  ;;  %v3299_v38 = vpop.f32.mrb[58].mxu1  ;;  %3545 = vmatprep.subr.bf16.mxu1 %v3379_v35  ;;  %v2982_v35 = vpop.permute.xlu0 %2981 }
 0x3c0   : > { %v4679_v1 = vadd.f32 %v3299_v38, %v2947_v47  ;;  %v3301_v55 = vpop.f32.mrb[59].mxu1  ;;  %3546 = vmatpush1.bf16.msra.mxu1 %v3378_v48  ;;  %v3356_v54 = vmax.f32 %v4677_v40, 0.0 }
 0x3c1   : > { %v4680_v32 = vadd.f32 %v3301_v55, %v2947_v47  ;;  %v3357_v13 = vmax.f32 %v4678_v37, 0.0  ;;  %v2987_v37 = vpop.permute.xlu1 %2986 }
 0x3c2   : > { %v3358_v28 = vmax.f32 %v4679_v1, 0.0 }
 0x3c3   : > { %v3359_v26 = vmax.f32 %v4680_v32, 0.0 }
 0x3c4   : > { %v3380_v0 = vpack.c.bf16 %v3358_v28, %v3356_v54 }
 0x3c5   : > { %v3381_v15 = vpack.c.bf16 %v3359_v26, %v3357_v13  ;;  %v3305_v58 = vpop.f32.mrb[60].mxu1 }
 0x3c6   : > { %v4681_v42 = vadd.f32 %v3305_v58, %v2952_v25  ;;  %v3307_v16 = vpop.f32.mrb[61].mxu1 }
 0x3c7   : > { %v4682_v50 = vadd.f32 %v3307_v16, %v2952_v25  ;;  %v3309_v56 = vpop.f32.mrb[62].mxu1  ;;  %3547 = vmatprep.subr.bf16.mxu1 %v3381_v15  ;;  %v2992_v15 = vpop.permute.xlu0 %2991 }
 0x3c8   : > { %v4683_v19 = vadd.f32 %v3309_v56, %v2957_v34  ;;  %v3311_v6 = vpop.f32.mrb[63].mxu1  ;;  %3548 = vmatpush1.bf16.msra.mxu1 %v3380_v0  ;;  %v3360_v14 = vmax.f32 %v4681_v42, 0.0 }
 0x3c9   : > { %v4684_v12 = vadd.f32 %v3311_v6, %v2957_v34  ;;  %v3361_v63 = vmax.f32 %v4682_v50, 0.0 }
 0x3ca   : > { %v3362_v33 = vmax.f32 %v4683_v19, 0.0 }
 0x3cb   : > { %v3363_v51 = vmax.f32 %v4684_v12, 0.0 }
 0x3cc   : > { %v3382_v36 = vpack.c.bf16 %v3362_v33, %v3360_v14 }
 0x3cd   : > { %v3383_v44 = vpack.c.bf16 %v3363_v51, %v3361_v63  ;;  %v3315_v31 = vpop.f32.mrb[64].mxu1  ;;  %v4813_v51 = vld [vmem:[%s7377_s5] sm:$0xff]  }
 0x3ce   : > { %v4685_v21 = vadd.f32 %v3315_v31, %v2962_v24  ;;  %v3317_v11 = vpop.f32.mrb[65].mxu1  ;;  %v4817_v31 = vld [vmem:[%s7377_s5 + $0x20] sm:$0xff]  }
 0x3cf   : > { %v4686_v49 = vadd.f32 %v3317_v11, %v2962_v24  ;;  %v3319_v59 = vpop.f32.mrb[66].mxu1  ;;  %3549 = vmatprep.subr.bf16.mxu1 %v3383_v44  ;;  %v4815_v24 = vld [vmem:[%s7377_s5 + $0x10] sm:$0xff]   ;;  %v4816_v44 = vld [vmem:[%s7377_s5 + $0x18] sm:$0xff]  }
 0x3d0   : > { %v4687_v57 = vadd.f32 %v3319_v59, %v2967_v30  ;;  %v3321_v8 = vpop.f32.mrb[67].mxu1  ;;  %3550 = vmatpush1.bf16.msra.mxu1 %v3382_v36  ;;  %v3364_v22 = vmax.f32 %v4685_v21, 0.0  ;;  %v4814_v36 = vld [vmem:[%s7377_s5 + $0x8] sm:$0xff]   ;;  %v4819_v11 = vld [vmem:[%s7377_s5 + $0x30] ss:$0 sps:$4 sm:$0x33]  }
 0x3d1   : > { %v4688_v10 = vadd.f32 %v3321_v8, %v2967_v30  ;;  %v3365_v2 = vmax.f32 %v4686_v49, 0.0  ;;  %v4818_v21 = vld [vmem:[%s7377_s5 + $0x28] sm:$0xff]   ;;  %v3421_v30 = vpop.permute.xlu1 %3420  ;;  %v3426_v8 = vpop.permute.xlu0 %3425 }
 0x3d2   : > { %v3366_v18 = vmax.f32 %v4687_v57, 0.0 }
 0x3d3   : > { %v3367_v9 = vmax.f32 %v4688_v10, 0.0 }
 0x3d4   : > { %v3384_v62 = vpack.c.bf16 %v3366_v18, %v3364_v22 }
 0x3d5   : > { %v3385_v17 = vpack.c.bf16 %v3367_v9, %v3365_v2  ;;  %v3325_v7 = vpop.f32.mrb[68].mxu1 }
 0x3d6   : > { %v4689_v52 = vadd.f32 %v3325_v7, %v2972_v29  ;;  %v3327_v3 = vpop.f32.mrb[69].mxu1 }
 0x3d7   : > { %v4690_v20 = vadd.f32 %v3327_v3, %v2972_v29  ;;  %v3329_v61 = vpop.f32.mrb[70].mxu1  ;;  %3551 = vmatprep.subr.bf16.mxu1 %v3385_v17  ;;  %v3431_v3 = vpop.permute.xlu1 %3430 }
 0x3d8   : > { %v4691_v4 = vadd.f32 %v3329_v61, %v2977_v60  ;;  %v3331_v53 = vpop.f32.mrb[71].mxu1  ;;  %3552 = vmatpush1.bf16.msra.mxu1 %v3384_v62  ;;  %v3368_v5 = vmax.f32 %v4689_v52, 0.0 }
 0x3d9   : > { %v4692_v39 = vadd.f32 %v3331_v53, %v2977_v60  ;;  %v3369_v46 = vmax.f32 %v4690_v20, 0.0  ;;  %v3436_v53 = vpop.permute.xlu0 %3435 }
 0x3da   : > { %v3370_v27 = vmax.f32 %v4691_v4, 0.0 }
 0x3db   : > { %v3371_v48 = vmax.f32 %v4692_v39, 0.0 }
 0x3dc   : > { %v3386_v41 = vpack.c.bf16 %v3370_v27, %v3368_v5 }
 0x3dd   : > { %v3387_v23 = vpack.c.bf16 %v3371_v48, %v3369_v46  ;;  %v3335_v40 = vpop.f32.mrb[72].mxu1 }
 0x3de   : > { %v4693_v43 = vadd.f32 %v3335_v40, %v2982_v35  ;;  %v3337_v47 = vpop.f32.mrb[73].mxu1 }
 0x3df   : > { %v4694_v38 = vadd.f32 %v3337_v47, %v2982_v35  ;;  %v3339_v1 = vpop.f32.mrb[74].mxu1  ;;  %3553 = vmatprep.subr.bf16.mxu1 %v3387_v23  ;;  %v3441_v47 = vpop.permute.xlu1 %3440 }
 0x3e0   : > { %v4695_v55 = vadd.f32 %v3339_v1, %v2987_v37  ;;  %v3341_v32 = vpop.f32.mrb[75].mxu1  ;;  %3554 = vmatpush1.bf16.msra.mxu1 %v3386_v41  ;;  %v3372_v28 = vmax.f32 %v4693_v43, 0.0 }
 0x3e1   : > { %v4696_v54 = vadd.f32 %v3341_v32, %v2987_v37  ;;  %v3373_v26 = vmax.f32 %v4694_v38, 0.0  ;;  %v3446_v32 = vpop.permute.xlu0 %3445 }
 0x3e2   : > { %v3374_v13 = vmax.f32 %v4695_v55, 0.0 }
 0x3e3   : > { %v3375_v0 = vmax.f32 %v4696_v54, 0.0 }
 0x3e4   : > { %v3388_v25 = vpack.c.bf16 %v3374_v13, %v3372_v28 }
 0x3e5   : > { %v3389_v58 = vpack.c.bf16 %v3375_v0, %v3373_v26  ;;  %v3345_v42 = vpop.f32.mrb[76].mxu1 }
 0x3e6   : > { %v4697_v16 = vadd.f32 %v3345_v42, %v2992_v15  ;;  %v3347_v34 = vpop.f32.mrb[77].mxu1 }
 0x3e7   : > { %v4698_v50 = vadd.f32 %v3347_v34, %v2992_v15  ;;  %v3349_v56 = vpop.f32.mrb[78].mxu1  ;;  %3555 = vmatprep.subr.bf16.mxu1 %v3389_v58  ;;  %v3451_v34 = vpop.permute.xlu1 %3450 }
 0x3e8   : > { %v3376_v19 = vmax.f32 %v4697_v16, 0.0  ;;  %v3350_v6 = vpop.f32.mrb[79].mxu1  ;;  %3556 = vmatpush1.bf16.msra.mxu1 %v3388_v25 }
 0x3e9   : > { %v3377_v12 = vmax.f32 %v4698_v50, 0.0 }
 0x3ea   : > { %v3390_v14 = vpack.c.bf16 %v3376_v19, %v3376_v19 }
 0x3eb   : > { %v3391_v33 = vpack.c.bf16 %v3377_v12, %v3377_v12  ;;  %v3456_v12 = vpop.permute.xlu0 %3455 }
 0x3ec   : > { %v3540_v63 = vsel %vm3538_vm3, %v3390_v14, 0 }
 0x3ed   : > { %4612 = vmatprep.subr.msk.bf16.mxu1 %vm3538_vm3, %v3391_v33 }
 0x3ee   : > { %3558 = vmatpush1.bf16.msra.mxu1 %v3540_v63 }
 0x3f1   : > { %4613 = vmatmul.mubr.msk.bf16.vlgmr.msra.gmra.mrb[80].mxu1 %vm3516_vm4, %v4813_v51 }
 0x3f2   : > { %3587 = vmatprep.mubr.bf16.mxu1 %v7808_v45 }
 0x3f9   : > { %4614 = vmatmul.mubr.msk.bf16.gmra.mrb[84].mxu1 %vm3516_vm4, %v4814_v36 }
 0x3fa   : > { %3597 = vmatprep.mubr.bf16.mxu1 %v7808_v45 }
 0x401   : > { %4615 = vmatmul.mubr.msk.bf16.gmra.mrb[88].mxu1 %vm3516_vm4, %v4815_v24 }
 0x402   : > { %3607 = vmatprep.mubr.bf16.mxu1 %v7808_v45 }
 0x409   : > { %4616 = vmatmul.mubr.msk.bf16.gmra.mrb[92].mxu1 %vm3516_vm4, %v4816_v44 }
 0x40a   : > { %3617 = vmatprep.mubr.bf16.mxu1 %v7808_v45 }
 0x411   : > { %4617 = vmatmul.mubr.msk.bf16.gmra.mrb[96].mxu1 %vm3516_vm4, %v4817_v31 }
 0x412   : > { %3627 = vmatprep.mubr.bf16.mxu1 %v7808_v45 }
 0x419   : > { %4618 = vmatmul.mubr.msk.bf16.gmra.mrb[100].mxu1 %vm3516_vm4, %v4818_v21 }
 0x41a   : > { %3637 = vmatprep.mubr.bf16.mxu1 %v7808_v45 }
 0x421   : > { %4619 = vmatmul.mubr.msk.bf16.gmra.mrb[104].mxu1 %vm3516_vm4, %v4819_v11 }
 0x422   : > { %3869 = vmatprep.mubr.bf16.mxu1 %v7808_v45 }
 0x4c4   : > { %v3579_v49 = vpop.f32.mrb[80].mxu1 }
 0x4c5   : > { %v3580_v59 = vadd.f32 %v3579_v49, %v3421_v30  ;;  %v3581_v57 = vpop.f32.mrb[81].mxu1 }
 0x4c6   : > { %v3582_v10 = vadd.f32 %v3581_v57, %v3421_v30  ;;  %v3583_v22 = vpop.f32.mrb[82].mxu1  ;;  %v3461_v30 = vpop.permute.xlu1 %3460 }
 0x4c7   : > { %v3584_v18 = vadd.f32 %v3583_v22, %v3426_v8  ;;  %v3585_v2 = vpop.f32.mrb[83].mxu1  ;;  %v3646_v62 = vmax.f32 %v3580_v59, 0.0 }
 0x4c8   : > { %v3586_v9 = vadd.f32 %v3585_v2, %v3426_v8  ;;  %v3647_v17 = vmax.f32 %v3582_v10, 0.0  ;;  %v3466_v10 = vpop.permute.xlu0 %3465 }
 0x4c9   : > { %v3648_v29 = vmax.f32 %v3584_v18, 0.0 }
 0x4ca   : > { %v3649_v7 = vmax.f32 %v3586_v9, 0.0 }
 0x4cb   : > { %v3672_v52 = vpack.c.bf16 %v3648_v29, %v3646_v62 }
 0x4cc   : > { %v3673_v60 = vpack.c.bf16 %v3649_v7, %v3647_v17  ;;  %v3589_v20 = vpop.f32.mrb[84].mxu1 }
 0x4cd   : > { %v3590_v61 = vadd.f32 %v3589_v20, %v3431_v3  ;;  %v3591_v4 = vpop.f32.mrb[85].mxu1 }
 0x4ce   : > { %v3592_v39 = vadd.f32 %v3591_v4, %v3431_v3  ;;  %v3593_v5 = vpop.f32.mrb[86].mxu1  ;;  %3837 = vmatprep.subr.bf16.mxu1 %v3673_v60  ;;  %v3471_v60 = vpop.permute.xlu1 %3470 }
 0x4cf   : > { %v3594_v27 = vadd.f32 %v3593_v5, %v3436_v53  ;;  %v3595_v46 = vpop.f32.mrb[87].mxu1  ;;  %3838 = vmatpush1.bf16.msra.mxu1 %v3672_v52  ;;  %v3650_v41 = vmax.f32 %v3590_v61, 0.0 }
 0x4d0   : > { %v3596_v48 = vadd.f32 %v3595_v46, %v3436_v53  ;;  %v3651_v23 = vmax.f32 %v3592_v39, 0.0  ;;  %v3476_v39 = vpop.permute.xlu0 %3475 }
 0x4d1   : > { %v3652_v35 = vmax.f32 %v3594_v27, 0.0 }
 0x4d2   : > { %v3653_v40 = vmax.f32 %v3596_v48, 0.0 }
 0x4d3   : > { %v3674_v43 = vpack.c.bf16 %v3652_v35, %v3650_v41 }
 0x4d4   : > { %v3675_v37 = vpack.c.bf16 %v3653_v40, %v3651_v23  ;;  %v3599_v38 = vpop.f32.mrb[88].mxu1 }
 0x4d5   : > { %v3600_v1 = vadd.f32 %v3599_v38, %v3441_v47  ;;  %v3601_v55 = vpop.f32.mrb[89].mxu1 }
 0x4d6   : > { %v3602_v54 = vadd.f32 %v3601_v55, %v3441_v47  ;;  %v3603_v28 = vpop.f32.mrb[90].mxu1  ;;  %3839 = vmatprep.subr.bf16.mxu1 %v3675_v37  ;;  %v3481_v37 = vpop.permute.xlu1 %3480 }
 0x4d7   : > { %v3604_v13 = vadd.f32 %v3603_v28, %v3446_v32  ;;  %v3605_v26 = vpop.f32.mrb[91].mxu1  ;;  %3840 = vmatpush1.bf16.msra.mxu1 %v3674_v43  ;;  %v3654_v25 = vmax.f32 %v3600_v1, 0.0 }
 0x4d8   : > { %v3606_v0 = vadd.f32 %v3605_v26, %v3446_v32  ;;  %v3655_v58 = vmax.f32 %v3602_v54, 0.0 }
 0x4d9   : > { %v3656_v15 = vmax.f32 %v3604_v13, 0.0 }
 0x4da   : > { %v3657_v42 = vmax.f32 %v3606_v0, 0.0 }
 0x4db   : > { %v3676_v16 = vpack.c.bf16 %v3656_v15, %v3654_v25 }
 0x4dc   : > { %v3677_v50 = vpack.c.bf16 %v3657_v42, %v3655_v58  ;;  %v3609_v56 = vpop.f32.mrb[92].mxu1  ;;  %v4820_v42 = vld [vmem:[%s7379_s7] sm:$0xff]  }
 0x4dd   : > { %v3610_v19 = vadd.f32 %v3609_v56, %v3451_v34  ;;  %v3611_v6 = vpop.f32.mrb[93].mxu1  ;;  %v4824_v56 = vld [vmem:[%s7379_s7 + $0x20] sm:$0xff]  }
 0x4de   : > { %v3612_v14 = vadd.f32 %v3611_v6, %v3451_v34  ;;  %v3613_v33 = vpop.f32.mrb[94].mxu1  ;;  %3841 = vmatprep.subr.bf16.mxu1 %v3677_v50  ;;  %v4822_v34 = vld [vmem:[%s7379_s7 + $0x10] sm:$0xff]   ;;  %v4823_v50 = vld [vmem:[%s7379_s7 + $0x18] sm:$0xff]  }
 0x4df   : > { %v3614_v63 = vadd.f32 %v3613_v33, %v3456_v12  ;;  %v3615_v51 = vpop.f32.mrb[95].mxu1  ;;  %3842 = vmatpush1.bf16.msra.mxu1 %v3676_v16  ;;  %v3658_v24 = vmax.f32 %v3610_v19, 0.0  ;;  %v4821_v16 = vld [vmem:[%s7379_s7 + $0x8] sm:$0xff]   ;;  %v4826_v6 = vld [vmem:[%s7379_s7 + $0x30] ss:$0 sps:$4 sm:$0x33]  }
 0x4e0   : > { %v3616_v36 = vadd.f32 %v3615_v51, %v3456_v12  ;;  %v3659_v31 = vmax.f32 %v3612_v14, 0.0  ;;  %v4825_v19 = vld [vmem:[%s7379_s7 + $0x28] sm:$0xff]   ;;  %v3715_v12 = vpop.permute.xlu0 %3714  ;;  %v3720_v51 = vpop.permute.xlu1 %3719 }
 0x4e1   : > { %v3660_v44 = vmax.f32 %v3614_v63, 0.0 }
 0x4e2   : > { %v3661_v21 = vmax.f32 %v3616_v36, 0.0 }
 0x4e3   : > { %v3678_v11 = vpack.c.bf16 %v3660_v44, %v3658_v24 }
 0x4e4   : > { %v3679_v49 = vpack.c.bf16 %v3661_v21, %v3659_v31  ;;  %v3619_v59 = vpop.f32.mrb[96].mxu1 }
 0x4e5   : > { %v3620_v57 = vadd.f32 %v3619_v59, %v3461_v30  ;;  %v3621_v8 = vpop.f32.mrb[97].mxu1 }
 0x4e6   : > { %v3622_v22 = vadd.f32 %v3621_v8, %v3461_v30  ;;  %v3623_v18 = vpop.f32.mrb[98].mxu1  ;;  %3843 = vmatprep.subr.bf16.mxu1 %v3679_v49  ;;  %v3725_v8 = vpop.permute.xlu0 %3724 }
 0x4e7   : > { %v3624_v2 = vadd.f32 %v3623_v18, %v3466_v10  ;;  %v3625_v9 = vpop.f32.mrb[99].mxu1  ;;  %3844 = vmatpush1.bf16.msra.mxu1 %v3678_v11  ;;  %v3662_v29 = vmax.f32 %v3620_v57, 0.0 }
 0x4e8   : > { %v3626_v62 = vadd.f32 %v3625_v9, %v3466_v10  ;;  %v3663_v7 = vmax.f32 %v3622_v22, 0.0  ;;  %v3730_v9 = vpop.permute.xlu1 %3729 }
 0x4e9   : > { %v3664_v17 = vmax.f32 %v3624_v2, 0.0 }
 0x4ea   : > { %v3665_v52 = vmax.f32 %v3626_v62, 0.0 }
 0x4eb   : > { %v3680_v3 = vpack.c.bf16 %v3664_v17, %v3662_v29 }
 0x4ec   : > { %v3681_v20 = vpack.c.bf16 %v3665_v52, %v3663_v7  ;;  %v3629_v61 = vpop.f32.mrb[100].mxu1 }
 0x4ed   : > { %v3630_v4 = vadd.f32 %v3629_v61, %v3471_v60  ;;  %v3631_v53 = vpop.f32.mrb[101].mxu1 }
 0x4ee   : > { %v3632_v5 = vadd.f32 %v3631_v53, %v3471_v60  ;;  %v3633_v27 = vpop.f32.mrb[102].mxu1  ;;  %3845 = vmatprep.subr.bf16.mxu1 %v3681_v20  ;;  %v3735_v53 = vpop.permute.xlu0 %3734 }
 0x4ef   : > { %v3634_v46 = vadd.f32 %v3633_v27, %v3476_v39  ;;  %v3635_v48 = vpop.f32.mrb[103].mxu1  ;;  %3846 = vmatpush1.bf16.msra.mxu1 %v3680_v3  ;;  %v3666_v35 = vmax.f32 %v3630_v4, 0.0 }
 0x4f0   : > { %v3636_v41 = vadd.f32 %v3635_v48, %v3476_v39  ;;  %v3667_v40 = vmax.f32 %v3632_v5, 0.0  ;;  %v3740_v48 = vpop.permute.xlu1 %3739 }
 0x4f1   : > { %v3668_v23 = vmax.f32 %v3634_v46, 0.0 }
 0x4f2   : > { %v3669_v43 = vmax.f32 %v3636_v41, 0.0 }
 0x4f3   : > { %v3682_v47 = vpack.c.bf16 %v3668_v23, %v3666_v35 }
 0x4f4   : > { %v3683_v38 = vpack.c.bf16 %v3669_v43, %v3667_v40  ;;  %v3639_v1 = vpop.f32.mrb[104].mxu1 }
 0x4f5   : > { %v3640_v55 = vadd.f32 %v3639_v1, %v3481_v37  ;;  %v3641_v32 = vpop.f32.mrb[105].mxu1 }
 0x4f6   : > { %v3642_v54 = vadd.f32 %v3641_v32, %v3481_v37  ;;  %v3643_v28 = vpop.f32.mrb[106].mxu1  ;;  %3847 = vmatprep.subr.bf16.mxu1 %v3683_v38  ;;  %v3745_v32 = vpop.permute.xlu0 %3744 }
 0x4f7   : > { %v3670_v13 = vmax.f32 %v3640_v55, 0.0  ;;  %v3644_v26 = vpop.f32.mrb[107].mxu1  ;;  %3848 = vmatpush1.bf16.msra.mxu1 %v3682_v47 }
 0x4f8   : > { %v3671_v0 = vmax.f32 %v3642_v54, 0.0 }
 0x4f9   : > { %v3684_v25 = vpack.c.bf16 %v3670_v13, %v3670_v13 }
 0x4fa   : > { %v3685_v15 = vpack.c.bf16 %v3671_v0, %v3671_v0  ;;  %v3750_v0 = vpop.permute.xlu1 %3749 }
 0x4fb   : > { %v3832_v58 = vsel %vm3538_vm3, %v3684_v25, 0 }
 0x4fc   : > { %4627 = vmatprep.subr.msk.bf16.mxu1 %vm3538_vm3, %v3685_v15 }
 0x4fd   : > { %3850 = vmatpush1.bf16.msra.mxu1 %v3832_v58 }
 0x500   : > { %4628 = vmatmul.mubr.msk.bf16.vlgmr.msra.gmra.mrb[108].mxu1 %vm3516_vm4, %v4820_v42 }
 0x501   : > { %3879 = vmatprep.mubr.bf16.mxu1 %v7808_v45 }
 0x508   : > { %4629 = vmatmul.mubr.msk.bf16.gmra.mrb[112].mxu1 %vm3516_vm4, %v4821_v16 }
 0x509   : > { %3889 = vmatprep.mubr.bf16.mxu1 %v7808_v45 }
 0x510   : > { %4630 = vmatmul.mubr.msk.bf16.gmra.mrb[116].mxu1 %vm3516_vm4, %v4822_v34 }
 0x511   : > { %3899 = vmatprep.mubr.bf16.mxu1 %v7808_v45 }
 0x518   : > { %4631 = vmatmul.mubr.msk.bf16.gmra.mrb[120].mxu1 %vm3516_vm4, %v4823_v50 }
 0x519   : > { %3909 = vmatprep.mubr.bf16.mxu1 %v7808_v45 }
 0x520   : > { %4632 = vmatmul.mubr.msk.bf16.gmra.mrb[124].mxu1 %vm3516_vm4, %v4824_v56 }
 0x521   : > { %3919 = vmatprep.mubr.bf16.mxu1 %v7808_v45 }
 0x528   : > { %4633 = vmatmul.mubr.msk.bf16.gmra.mrb[128].mxu1 %vm3516_vm4, %v4825_v19 }
 0x529   : > { %3929 = vmatprep.mubr.bf16.mxu1 %v7808_v45 }
 0x530   : > { %4634 = vmatmul.mubr.msk.bf16.gmra.mrb[132].mxu1 %vm3516_vm4, %v4826_v6 }
 0x531   : > { %4161 = vmatprep.mubr.bf16.mxu1 %v7808_v45 }
 0x5d3   : > { %v3871_v14 = vpop.f32.mrb[108].mxu1 }
 0x5d4   : > { %v3872_v33 = vadd.f32 %v3871_v14, %v3715_v12  ;;  %v3873_v63 = vpop.f32.mrb[109].mxu1 }
 0x5d5   : > { %v3874_v36 = vadd.f32 %v3873_v63, %v3715_v12  ;;  %v3875_v24 = vpop.f32.mrb[110].mxu1  ;;  %v3755_v12 = vpop.permute.xlu0 %3754 }
 0x5d6   : > { %v3876_v44 = vadd.f32 %v3875_v24, %v3720_v51  ;;  %v3877_v31 = vpop.f32.mrb[111].mxu1  ;;  %v3938_v11 = vmax.f32 %v3872_v33, 0.0 }
 0x5d7   : > { %v3878_v21 = vadd.f32 %v3877_v31, %v3720_v51  ;;  %v3939_v49 = vmax.f32 %v3874_v36, 0.0  ;;  %v3760_v36 = vpop.permute.xlu1 %3759 }
 0x5d8   : > { %v3940_v30 = vmax.f32 %v3876_v44, 0.0 }
 0x5d9   : > { %v3941_v59 = vmax.f32 %v3878_v21, 0.0 }
 0x5da   : > { %v3964_v57 = vpack.c.bf16 %v3940_v30, %v3938_v11 }
 0x5db   : > { %v3965_v10 = vpack.c.bf16 %v3941_v59, %v3939_v49  ;;  %v3881_v22 = vpop.f32.mrb[112].mxu1 }
 0x5dc   : > { %v3882_v18 = vadd.f32 %v3881_v22, %v3725_v8  ;;  %v3883_v2 = vpop.f32.mrb[113].mxu1 }
 0x5dd   : > { %v3884_v62 = vadd.f32 %v3883_v2, %v3725_v8  ;;  %v3885_v29 = vpop.f32.mrb[114].mxu1  ;;  %4129 = vmatprep.subr.bf16.mxu1 %v3965_v10  ;;  %v3765_v10 = vpop.permute.xlu0 %3764 }
 0x5de   : > { %v3886_v17 = vadd.f32 %v3885_v29, %v3730_v9  ;;  %v3887_v7 = vpop.f32.mrb[115].mxu1  ;;  %4130 = vmatpush1.bf16.msra.mxu1 %v3964_v57  ;;  %v3942_v3 = vmax.f32 %v3882_v18, 0.0 }
 0x5df   : > { %v3888_v52 = vadd.f32 %v3887_v7, %v3730_v9  ;;  %v3943_v20 = vmax.f32 %v3884_v62, 0.0  ;;  %v3770_v62 = vpop.permute.xlu1 %3769 }
 0x5e0   : > { %v3944_v60 = vmax.f32 %v3886_v17, 0.0 }
 0x5e1   : > { %v3945_v61 = vmax.f32 %v3888_v52, 0.0 }
 0x5e2   : > { %v3966_v4 = vpack.c.bf16 %v3944_v60, %v3942_v3 }
 0x5e3   : > { %v3967_v39 = vpack.c.bf16 %v3945_v61, %v3943_v20  ;;  %v3891_v5 = vpop.f32.mrb[116].mxu1 }
 0x5e4   : > { %v3892_v27 = vadd.f32 %v3891_v5, %v3735_v53  ;;  %v3893_v46 = vpop.f32.mrb[117].mxu1 }
 0x5e5   : > { %v3894_v41 = vadd.f32 %v3893_v46, %v3735_v53  ;;  %v3895_v35 = vpop.f32.mrb[118].mxu1  ;;  %4131 = vmatprep.subr.bf16.mxu1 %v3967_v39  ;;  %v3775_v39 = vpop.permute.xlu0 %3774 }
 0x5e6   : > { %v3896_v23 = vadd.f32 %v3895_v35, %v3740_v48  ;;  %v3897_v40 = vpop.f32.mrb[119].mxu1  ;;  %4132 = vmatpush1.bf16.msra.mxu1 %v3966_v4  ;;  %v3946_v47 = vmax.f32 %v3892_v27, 0.0 }
 0x5e7   : > { %v3898_v43 = vadd.f32 %v3897_v40, %v3740_v48  ;;  %v3947_v38 = vmax.f32 %v3894_v41, 0.0 }
 0x5e8   : > { %v3948_v37 = vmax.f32 %v3896_v23, 0.0 }
 0x5e9   : > { %v3949_v1 = vmax.f32 %v3898_v43, 0.0 }
 0x5ea   : > { %v3968_v55 = vpack.c.bf16 %v3948_v37, %v3946_v47 }
 0x5eb   : > { %v3969_v54 = vpack.c.bf16 %v3949_v1, %v3947_v38  ;;  %v3901_v28 = vpop.f32.mrb[120].mxu1  ;;  %v4827_v1 = vld [vmem:[%s7381_s9] sm:$0xff]  }
 0x5ec   : > { %v3902_v13 = vadd.f32 %v3901_v28, %v3745_v32  ;;  %v3903_v26 = vpop.f32.mrb[121].mxu1  ;;  %v4831_v28 = vld [vmem:[%s7381_s9 + $0x20] sm:$0xff]  }
 0x5ed   : > { %v3904_v25 = vadd.f32 %v3903_v26, %v3745_v32  ;;  %v3905_v15 = vpop.f32.mrb[122].mxu1  ;;  %4133 = vmatprep.subr.bf16.mxu1 %v3969_v54  ;;  %v4829_v32 = vld [vmem:[%s7381_s9 + $0x10] sm:$0xff]   ;;  %v4830_v54 = vld [vmem:[%s7381_s9 + $0x18] sm:$0xff]  }
 0x5ee   : > { %v3906_v58 = vadd.f32 %v3905_v15, %v3750_v0  ;;  %v3907_v42 = vpop.f32.mrb[123].mxu1  ;;  %4134 = vmatpush1.bf16.msra.mxu1 %v3968_v55  ;;  %v3950_v34 = vmax.f32 %v3902_v13, 0.0  ;;  %v4828_v55 = vld [vmem:[%s7381_s9 + $0x8] sm:$0xff]   ;;  %v4833_v26 = vld [vmem:[%s7381_s9 + $0x30] ss:$0 sps:$4 sm:$0x33]  }
 0x5ef   : > { %v3908_v16 = vadd.f32 %v3907_v42, %v3750_v0  ;;  %v3951_v56 = vmax.f32 %v3904_v25, 0.0  ;;  %v4832_v13 = vld [vmem:[%s7381_s9 + $0x28] sm:$0xff]   ;;  %v4007_v0 = vpop.permute.xlu1 %4006  ;;  %v4012_v42 = vpop.permute.xlu0 %4011 }
 0x5f0   : > { %v3952_v50 = vmax.f32 %v3906_v58, 0.0 }
 0x5f1   : > { %v3953_v19 = vmax.f32 %v3908_v16, 0.0 }
 0x5f2   : > { %v3970_v6 = vpack.c.bf16 %v3952_v50, %v3950_v34 }
 0x5f3   : > { %v3971_v14 = vpack.c.bf16 %v3953_v19, %v3951_v56  ;;  %v3911_v33 = vpop.f32.mrb[124].mxu1 }
 0x5f4   : > { %v3912_v63 = vadd.f32 %v3911_v33, %v3755_v12  ;;  %v3913_v51 = vpop.f32.mrb[125].mxu1 }
 0x5f5   : > { %v3914_v24 = vadd.f32 %v3913_v51, %v3755_v12  ;;  %v3915_v44 = vpop.f32.mrb[126].mxu1  ;;  %4135 = vmatprep.subr.bf16.mxu1 %v3971_v14  ;;  %v4017_v51 = vpop.permute.xlu1 %4016 }
 0x5f6   : > { %v3916_v31 = vadd.f32 %v3915_v44, %v3760_v36  ;;  %v3917_v21 = vpop.f32.mrb[127].mxu1  ;;  %4136 = vmatpush1.bf16.msra.mxu1 %v3970_v6  ;;  %v3954_v30 = vmax.f32 %v3912_v63, 0.0 }
 0x5f7   : > { %v3918_v11 = vadd.f32 %v3917_v21, %v3760_v36  ;;  %v3955_v59 = vmax.f32 %v3914_v24, 0.0 }
 0x5f8   : > { %v3956_v49 = vmax.f32 %v3916_v31, 0.0  ;;  %v4022_v31 = vpop.permute.xlu0 %4021 }
 0x5f9   : > { %v3957_v57 = vmax.f32 %v3918_v11, 0.0 }
 0x5fa   : > { %v3972_v8 = vpack.c.bf16 %v3956_v49, %v3954_v30 }
 0x5fb   : > { %v3973_v22 = vpack.c.bf16 %v3957_v57, %v3955_v59  ;;  %v3921_v18 = vpop.f32.mrb[128].mxu1 }
 0x5fc   : > { %v3922_v2 = vadd.f32 %v3921_v18, %v3765_v10  ;;  %v3923_v9 = vpop.f32.mrb[129].mxu1 }
 0x5fd   : > { %v3924_v29 = vadd.f32 %v3923_v9, %v3765_v10  ;;  %v3925_v17 = vpop.f32.mrb[130].mxu1  ;;  %4137 = vmatprep.subr.bf16.mxu1 %v3973_v22 }
 0x5fe   : > { %v3926_v7 = vadd.f32 %v3925_v17, %v3770_v62  ;;  %v3927_v52 = vpop.f32.mrb[131].mxu1  ;;  %4138 = vmatpush1.bf16.msra.mxu1 %v3972_v8  ;;  %v3958_v60 = vmax.f32 %v3922_v2, 0.0  ;;  %v4027_v2 = vpop.permute.xlu1 %4026 }
 0x5ff   : > { %v3928_v3 = vadd.f32 %v3927_v52, %v3770_v62  ;;  %v3959_v61 = vmax.f32 %v3924_v29, 0.0 }
 0x600   : > { %v3960_v20 = vmax.f32 %v3926_v7, 0.0  ;;  %v4032_v7 = vpop.permute.xlu0 %4031 }
 0x601   : > { %v3961_v4 = vmax.f32 %v3928_v3, 0.0 }
 0x602   : > { %v3974_v53 = vpack.c.bf16 %v3960_v20, %v3958_v60 }
 0x603   : > { %v3975_v5 = vpack.c.bf16 %v3961_v4, %v3959_v61  ;;  %v3931_v27 = vpop.f32.mrb[132].mxu1 }
 0x604   : > { %v3932_v46 = vadd.f32 %v3931_v27, %v3775_v39  ;;  %v3933_v48 = vpop.f32.mrb[133].mxu1 }
 0x605   : > { %v3934_v41 = vadd.f32 %v3933_v48, %v3775_v39  ;;  %v3935_v35 = vpop.f32.mrb[134].mxu1  ;;  %4139 = vmatprep.subr.bf16.mxu1 %v3975_v5 }
 0x606   : > { %v3962_v23 = vmax.f32 %v3932_v46, 0.0  ;;  %v3936_v40 = vpop.f32.mrb[135].mxu1  ;;  %4140 = vmatpush1.bf16.msra.mxu1 %v3974_v53  ;;  %v4037_v46 = vpop.permute.xlu1 %4036 }
 0x607   : > { %v3963_v43 = vmax.f32 %v3934_v41, 0.0  ;;  %v4042_v40 = vpop.permute.xlu0 %4041 }
 0x608   : > { %v3976_v47 = vpack.c.bf16 %v3962_v23, %v3962_v23 }
 0x609   : > { %v3977_v37 = vpack.c.bf16 %v3963_v43, %v3963_v43 }
 0x60a   : > { %v4124_v38 = vsel %vm3538_vm3, %v3976_v47, 0 }
 0x60b   : > { %4642 = vmatprep.subr.msk.bf16.mxu1 %vm3538_vm3, %v3977_v37 }
 0x60c   : > { %4142 = vmatpush1.bf16.msra.mxu1 %v4124_v38 }
 0x60f   : > { %4643 = vmatmul.mubr.msk.bf16.vlgmr.msra.gmra.mrb[136].mxu1 %vm3516_vm4, %v4827_v1 }
 0x610   : > { %4171 = vmatprep.mubr.bf16.mxu1 %v7808_v45 }
 0x617   : > { %4644 = vmatmul.mubr.msk.bf16.gmra.mrb[140].mxu1 %vm3516_vm4, %v4828_v55 }
 0x618   : > { %4181 = vmatprep.mubr.bf16.mxu1 %v7808_v45 }
 0x61f   : > { %4645 = vmatmul.mubr.msk.bf16.gmra.mrb[144].mxu1 %vm3516_vm4, %v4829_v32 }
 0x620   : > { %4191 = vmatprep.mubr.bf16.mxu1 %v7808_v45 }
 0x627   : > { %4646 = vmatmul.mubr.msk.bf16.gmra.mrb[148].mxu1 %vm3516_vm4, %v4830_v54 }
 0x628   : > { %4201 = vmatprep.mubr.bf16.mxu1 %v7808_v45 }
 0x62f   : > { %4647 = vmatmul.mubr.msk.bf16.gmra.mrb[152].mxu1 %vm3516_vm4, %v4831_v28 }
 0x630   : > { %4211 = vmatprep.mubr.bf16.mxu1 %v7808_v45 }
 0x637   : > { %4648 = vmatmul.mubr.msk.bf16.gmra.mrb[156].mxu1 %vm3516_vm4, %v4832_v13 }
 0x638   : > { %4221 = vmatprep.mubr.bf16.mxu1 %v7808_v45 }
 0x63f   : > { %4649 = vmatmul.mubr.msk.bf16.gmra.mrb[160].mxu1 %vm3516_vm4, %v4833_v26  ;;  %v4047_v26 = vpop.permute.xlu1 %4046 }
 0x640   : > { %4322 = vmatprep.mubr.bf16.mxu1 %v7808_v45 }
 0x6e2   : > { %v4163_v25 = vpop.f32.mrb[136].mxu1 }
 0x6e3   : > { %v4164_v15 = vadd.f32 %v4163_v25, %v4007_v0  ;;  %v4165_v58 = vpop.f32.mrb[137].mxu1 }
 0x6e4   : > { %v4166_v16 = vadd.f32 %v4165_v58, %v4007_v0  ;;  %v4167_v34 = vpop.f32.mrb[138].mxu1 }
 0x6e5   : > { %v4168_v50 = vadd.f32 %v4167_v34, %v4012_v42  ;;  %v4169_v56 = vpop.f32.mrb[139].mxu1  ;;  %v4230_v6 = vmax.f32 %v4164_v15, 0.0 }
 0x6e6   : > { %v4170_v19 = vadd.f32 %v4169_v56, %v4012_v42  ;;  %v4231_v14 = vmax.f32 %v4166_v16, 0.0  ;;  %v4052_v42 = vpop.permute.xlu0 %4051 }
 0x6e7   : > { %v4232_v12 = vmax.f32 %v4168_v50, 0.0 }
 0x6e8   : > { %v4233_v33 = vmax.f32 %v4170_v19, 0.0 }
 0x6e9   : > { %v4256_v63 = vpack.c.bf16 %v4232_v12, %v4230_v6 }
 0x6ea   : > { %v4257_v36 = vpack.c.bf16 %v4233_v33, %v4231_v14  ;;  %v4173_v24 = vpop.f32.mrb[140].mxu1 }
 0x6eb   : > { %v4174_v44 = vadd.f32 %v4173_v24, %v4017_v51  ;;  %v4175_v45 = vpop.f32.mrb[141].mxu1 }
 0x6ec   : > { %v4176_v21 = vadd.f32 %v4175_v45, %v4017_v51  ;;  %v4177_v11 = vpop.f32.mrb[142].mxu1  ;;  %4290 = vmatprep.subr.bf16.mxu1 %v4257_v36  ;;  %v4057_v51 = vpop.permute.xlu1 %4056 }
 0x6ed   : > { %v4178_v30 = vadd.f32 %v4177_v11, %v4022_v31  ;;  %v4179_v49 = vpop.f32.mrb[143].mxu1  ;;  %4291 = vmatpush1.bf16.msra.mxu1 %v4256_v63  ;;  %v4234_v57 = vmax.f32 %v4174_v44, 0.0 }
 0x6ee   : > { %v4180_v59 = vadd.f32 %v4179_v49, %v4022_v31  ;;  %v4235_v10 = vmax.f32 %v4176_v21, 0.0  ;;  %v4062_v31 = vpop.permute.xlu0 %4061 }
 0x6ef   : > { %v4236_v8 = vmax.f32 %v4178_v30, 0.0 }
 0x6f0   : > { %v4237_v22 = vmax.f32 %v4180_v59, 0.0 }
 0x6f1   : > { %v4258_v18 = vpack.c.bf16 %v4236_v8, %v4234_v57 }
 0x6f2   : > { %v4259_v9 = vpack.c.bf16 %v4237_v22, %v4235_v10  ;;  %v4183_v62 = vpop.f32.mrb[144].mxu1 }
 0x6f3   : > { %v4184_v29 = vadd.f32 %v4183_v62, %v4027_v2  ;;  %v4185_v17 = vpop.f32.mrb[145].mxu1 }
 0x6f4   : > { %v4186_v52 = vadd.f32 %v4185_v17, %v4027_v2  ;;  %v4187_v3 = vpop.f32.mrb[146].mxu1  ;;  %4292 = vmatprep.subr.bf16.mxu1 %v4259_v9  ;;  %v4067_v2 = vpop.permute.xlu1 %4066 }
 0x6f5   : > { %v4188_v60 = vadd.f32 %v4187_v3, %v4032_v7  ;;  %v4189_v20 = vpop.f32.mrb[147].mxu1  ;;  %4293 = vmatpush1.bf16.msra.mxu1 %v4258_v18  ;;  %v4238_v4 = vmax.f32 %v4184_v29, 0.0 }
 0x6f6   : > { %v4190_v61 = vadd.f32 %v4189_v20, %v4032_v7  ;;  %v4239_v39 = vmax.f32 %v4186_v52, 0.0 }
 0x6f7   : > { %v4240_v53 = vmax.f32 %v4188_v60, 0.0 }
 0x6f8   : > { %v4241_v5 = vmax.f32 %v4190_v61, 0.0 }
 0x6f9   : > { %v4260_v27 = vpack.c.bf16 %v4240_v53, %v4238_v4 }
 0x6fa   : > { %v4261_v48 = vpack.c.bf16 %v4241_v5, %v4239_v39  ;;  %v4193_v41 = vpop.f32.mrb[148].mxu1  ;;  %v4270_v39 = vld [vmem:[%s7383_s11] sm:$0x1]  ;;  %v4277_v5 = vlaneseq }
 0x6fb   : > { %v4194_v35 = vadd.f32 %v4193_v41, %v4037_v46  ;;  %v4195_v23 = vpop.f32.mrb[149].mxu1 }
 0x6fc   : > { %v4196_v43 = vadd.f32 %v4195_v23, %v4037_v46  ;;  %v4197_v47 = vpop.f32.mrb[150].mxu1  ;;  %4294 = vmatprep.subr.bf16.mxu1 %v4261_v48  ;;  %v4275_v48 = vpop.permute.xlu0 %4274  ;;  %vm4353_vm5 = vcmp.lt.s32.totalorder %v4277_v5, 256 }
 0x6fd   : > { %v4198_v37 = vadd.f32 %v4197_v47, %v4042_v40  ;;  %v4199_v38 = vpop.f32.mrb[151].mxu1  ;;  %4295 = vmatpush1.bf16.msra.mxu1 %v4260_v27  ;;  %v4242_v55 = vmax.f32 %v4194_v35, 0.0  ;;  %v4278_v27 = vshrl.u32 %v4277_v5, 7 }
 0x6fe   : > { %v4200_v1 = vadd.f32 %v4199_v38, %v4042_v40  ;;  %v4243_v54 = vmax.f32 %v4196_v43, 0.0  ;;  %v4904_v38 = vmov 1966171168  }
 0x6ff   : > { %v4244_v32 = vmax.f32 %v4198_v37, 0.0  ;;  %v4279_v46 = vsub.s32 0, %v4278_v27 }
 0x700   : > { %v4245_v28 = vmax.f32 %v4200_v1, 0.0  ;;  %v4337_v1 = vunpack.c.l.s4 %v4904_v38 }
 0x701   : > { %v4262_v13 = vpack.c.bf16 %v4244_v32, %v4242_v55  ;;  %v4280_v41 = vrot.slane %v4275_v48, %v4279_v46 }
 0x702   : > { %v4263_v0 = vpack.c.bf16 %v4245_v28, %v4243_v54  ;;  %v4203_v25 = vpop.f32.mrb[152].mxu1  ;;  %v4338_v55 = vunpack.c.0.s8 %v4337_v1 }
 0x703   : > { %v4204_v15 = vadd.f32 %v4203_v25, %v4047_v26  ;;  %v4205_v58 = vpop.f32.mrb[153].mxu1 }
 0x704   : > { %v4206_v16 = vadd.f32 %v4205_v58, %v4047_v26  ;;  %v4207_v34 = vpop.f32.mrb[154].mxu1  ;;  %4296 = vmatprep.subr.bf16.mxu1 %v4263_v0  ;;  %v4341_v54 = vsub.s32 %v4338_v55, %v4278_v27 }
 0x705   : > { %v4208_v50 = vadd.f32 %v4207_v34, %v4052_v42  ;;  %v4209_v56 = vpop.f32.mrb[155].mxu1  ;;  %4297 = vmatpush1.bf16.msra.mxu1 %v4262_v13  ;;  %v4246_v6 = vmax.f32 %v4204_v15, 0.0 }
 0x706   : > { %v4210_v19 = vadd.f32 %v4209_v56, %v4052_v42  ;;  %v4247_v14 = vmax.f32 %v4206_v16, 0.0 }
 0x707   : > { %v4248_v12 = vmax.f32 %v4208_v50, 0.0 }
 0x708   : > { %v4249_v33 = vmax.f32 %v4210_v19, 0.0 }
 0x709   : > { %v4264_v63 = vpack.c.bf16 %v4248_v12, %v4246_v6 }
 0x70a   : > { %v4265_v36 = vpack.c.bf16 %v4249_v33, %v4247_v14  ;;  %v4213_v24 = vpop.f32.mrb[156].mxu1 }
 0x70b   : > { %v4214_v44 = vadd.f32 %v4213_v24, %v4057_v51  ;;  %v4215_v45 = vpop.f32.mrb[157].mxu1 }
 0x70c   : > { %v4216_v21 = vadd.f32 %v4215_v45, %v4057_v51  ;;  %v4217_v11 = vpop.f32.mrb[158].mxu1  ;;  %4298 = vmatprep.subr.bf16.mxu1 %v4265_v36 }
 0x70d   : > { %v4218_v30 = vadd.f32 %v4217_v11, %v4062_v31  ;;  %v4219_v49 = vpop.f32.mrb[159].mxu1  ;;  %4299 = vmatpush1.bf16.msra.mxu1 %v4264_v63  ;;  %v4250_v57 = vmax.f32 %v4214_v44, 0.0 }
 0x70e   : > { %v4220_v59 = vadd.f32 %v4219_v49, %v4062_v31  ;;  %v4251_v10 = vmax.f32 %v4216_v21, 0.0 }
 0x70f   : > { %v4252_v8 = vmax.f32 %v4218_v30, 0.0 }
 0x710   : > { %v4253_v22 = vmax.f32 %v4220_v59, 0.0 }
 0x711   : > { %v4266_v18 = vpack.c.bf16 %v4252_v8, %v4250_v57 }
 0x712   : > { %v4267_v9 = vpack.c.bf16 %v4253_v22, %v4251_v10  ;;  %v4223_v62 = vpop.f32.mrb[160].mxu1 }
 0x713   : > { %v4224_v29 = vadd.f32 %v4223_v62, %v4067_v2  ;;  %v4225_v17 = vpop.f32.mrb[161].mxu1 }
 0x714   : > { %v4226_v7 = vadd.f32 %v4225_v17, %v4067_v2  ;;  %v4227_v52 = vpop.f32.mrb[162].mxu1  ;;  %4300 = vmatprep.subr.bf16.mxu1 %v4267_v9 }
 0x715   : > { %v4254_v3 = vmax.f32 %v4224_v29, 0.0  ;;  %v4228_v60 = vpop.f32.mrb[163].mxu1  ;;  %4301 = vmatpush1.bf16.msra.mxu1 %v4266_v18 }
 0x716   : > { %v4255_v20 = vmax.f32 %v4226_v7, 0.0 }
 0x717   : > { %v4268_v61 = vpack.c.bf16 %v4254_v3, %v4254_v3 }
 0x718   : > { %v4269_v4 = vpack.c.bf16 %v4255_v20, %v4255_v20 }
 0x719   : > { %v4285_v53 = vsel %vm3538_vm3, %v4268_v61, 0 }
 0x71a   : > { %4650 = vmatprep.subr.msk.bf16.mxu1 %vm3538_vm3, %v4269_v4 }
 0x71b   : > { %4303 = vmatpush1.bf16.msra.mxu1 %v4285_v53 }
 0x71e   : > { %4651 = vmatmul.mubr.msk.bf16.vlgmr.msra.gmra.mrb[164].mxu1 %vm3516_vm4, %v4270_v39 }
 0x7f1   : > { %v4324_v35 = vpop.f32.mrb[164].mxu1 }
 0x7f2   : > { %v4325_v23 = vadd.f32 %v4324_v35, %v4280_v41  ;;  %v4326_v40 = vpop.f32.mrb[165].mxu1 }
 0x7f3   : > { %v4327_v43 = vadd.f32 %v4326_v40, %v4280_v41  ;;  %v4328_v47 = vpop.f32.mrb[166].mxu1 }
 0x7f4   : > { %4834 = vtanh.f32 %v4325_v23  ;;  %v4329_v37 = vpop.f32.mrb[167].mxu1 }
 0x7f5   : > { %4836 = vtanh.f32 %v4327_v43 }
 0x7fe   : > { %v4835_v32 = vpop.eup %4834 }
 0x7ff   : > { %v4837_v28 = vpop.eup %4836 }
 0x800   : > { %v4335_v13 = vcombine.low %v4835_v32, %v4837_v28 }
 0x802   : > { %v4342_v26 = vrot.slane %v4335_v13, %v4341_v54 }
 0x804   : > { %v4349_v0 = vrot.slane %v4342_v26, %v4341_v54 }
 0x806   : > { %4355 = vst.msk [vmem:[%s478_s16] sm:$0x3] %vm4353_vm5, %v4349_v0 }
 0x807   : > { %4851 = shalt.err (!%p4848_p5)
}
 0x808   : > { %s4852_s23 = scalar_lea.hbm %s7328_s24, 32  ;;  %s4856_s22 = scalar_lea.hbm %s7385_s13, 64 }
 0x809   : > { %p4853_p7 = scmp.ne.s32.totalorder %s7328_s24, %s4852_s23  ;;  %p4857_p12 = scmp.lt.u32.totalorder %s7328_s24, %s7385_s13 }
 0x80a   : > { %p4858_p13 = scmp.lt.u32.totalorder %s4856_s22, %s4852_s23  ;;  %p4860_p1 = scmp.lt.u32.totalorder %s4852_s23, %s7328_s24 }
 0x80b   : > { %p4854_p10 = pnand %p4853_p7, %p5017_p6 }
 0x80c   : > { %p4859_p0 = por %p4858_p13, %p4857_p12 }
 0x80d   : > { %p4855_p11 = pneg %p4854_p10 }
 0x80e   : > { %p4861_p2 = por %p4860_p1, %p4859_p0 }
 0x810   : > { %p4862_p3 = pnand %p4861_p2, %p4855_p11 }
 0x812   : > { %4865 = shalt.err (!%p4862_p3)
}
 0x813   : > { %4729 = dma.vmem_to_hbm [thread:$0]  (%p5017_p6), %s7330_s21, 32, %s7328_s24, %s4357_s25  }
 0x814 PF: > { %s4383_s1 = sand.u32 1, %s4888_s27   ;;  %p4732_p4 = pnand %p4438_p9, %p5021_p8 }
 0x815   : > { %s4384_s26 = scalar_lea.sflag [#allocation5], %s4383_s1 }
 0x816   : > { %4883 = dma.done.wait (!%p4732_p4), %s4384_s26, 32  }
 0x817   : > { %4885 = vsyncadd (!%p4732_p4), %s4384_s26, 4294967264  ;;  %p25_p5 = scmp.ge.s32.totalorder %s5002_s15, 4   ;;  %s7810_s27 = smov %s4892_s28 }
 0x818   : > { %s7811_s28 = smov %s4896_s29  ;;  %s7812_s29 = smov %s5015_s18 }
 0x819   : > { %s7813_s30 = smov %s5002_s15  ;;  %27 = sbr.rel (!%p25_p5) target bundleno = 6 (0x6), region = 135 }
 0x820   :  { %4389 = vsyncpa [#allocation5], 1 }
 0x821   :  { %4391 = vsyncpa [#allocation5 + $0x1], 1 }

</bundles_post_ra>
